<compile_context>
chip_gen: v6e
topology: v6e:2x2x1
jax: 0.10.0
libtpu: 0.0.40
codegen_flags: <defaults>
</compile_context>

<pallas_src>
import functools

import jax
import jax.numpy as jnp
from jax import lax
from jax.experimental import pallas as pl
from jax.experimental.pallas import tpu as pltpu


_VMEM_LIMIT = 32 * 1024 * 1024  # explicit scoped-VMEM budget; safe on v5e/v6e/v7x

# Set to jnp.bfloat16 on v6e/v7x to hit the fast MXU path (accumulation stays f32).
# Kept at f32 here to match PyTorch f32 numerics tightly.
_MXU_DTYPE = jnp.float32


# ----------------------------------------------------------------------------------
# Kernel 1: 3x3x3 conv (stride 1, zero pad 1, no bias) for one (n, d) output plane,
# with optional fused input-side affine+ReLU (= previous layer's folded BN+ReLU) and
# per-sample per-channel sum / sum-of-squares accumulation of the conv output.
# Grid = (N, D); inputs are three clamped depth planes of the UNPADDED activation.
# ----------------------------------------------------------------------------------
def _conv_kernel(apply_affine, *refs):
    if apply_affine:
        (pm_ref, p0_ref, pp_ref, w_ref, scale_ref, shift_ref,
         y_ref, sum_ref, sq_ref) = refs
    else:
        pm_ref, p0_ref, pp_ref, w_ref, y_ref, sum_ref, sq_ref = refs

    d = pl.program_id(1)
    D = pl.num_programs(1)
    H, W, Cout = y_ref.shape[2], y_ref.shape[3], y_ref.shape[4]
    Cin = p0_ref.shape[4]

    # Per-sample stat accumulators stay resident across the d axis; zero at d == 0.
    @pl.when(d == 0)
    def _():
        sum_ref[...] = jnp.zeros_like(sum_ref)
        sq_ref[...] = jnp.zeros_like(sq_ref)

    planes = (pm_ref, p0_ref, pp_ref)
    acc = jnp.zeros((H * W, Cout), jnp.float32)

    for kd in range(3):
        pln = planes[kd][...].reshape(H, W, Cin)

        if apply_affine:
            # Previous layer's BatchNorm (folded to scale/shift) + ReLU, fused here.
            pln = jnp.maximum(pln * scale_ref[...] + shift_ref[...], 0.0)

        # Depth zero padding: the index_map clamps d+kd-1 into range; mask it here
        # (after the activation, so the padding is applied to the activated tensor).
        dz = d + kd - 1
        in_range = jnp.logical_and(dz >= 0, dz < D)
        pln = pln * in_range.astype(jnp.float32)

        # Spatial zero padding (pad=1), materialized in VMEM (no HBM round trip).
        zrow = jnp.zeros((1, W, Cin), jnp.float32)
        zcol = jnp.zeros((H + 2, 1, Cin), jnp.float32)
        padded = jnp.concatenate([zrow, pln, zrow], axis=0)          # (H+2, W,   Cin)
        padded = jnp.concatenate([zcol, padded, zcol], axis=1)       # (H+2, W+2, Cin)

        # im2col over (kh, kw): one matmul per depth tap with K = 9*Cin.
        cols = [padded[kh:kh + H, kw:kw + W, :].reshape(H * W, Cin)
                for kh in range(3) for kw in range(3)]
        patch = jnp.concatenate(cols, axis=-1)                       # (H*W, 9*Cin)

        acc = acc + jnp.dot(patch.astype(_MXU_DTYPE),
                            w_ref[kd].astype(_MXU_DTYPE),
                            preferred_element_type=jnp.float32)

    # NOTE: for Cout < 128 this store is lane-masked; at typical UNet widths
    # (Cout >= 128) it is lane-dense. A W*Cout-flattened output layout would help
    # the narrow case but needs relayouts on both producer and consumer.
    y_ref[...] = acc.reshape(y_ref.shape)
    sum_ref[...] += jnp.sum(acc, axis=0).reshape(sum_ref.shape)
    sq_ref[...] += jnp.sum(acc * acc, axis=0).reshape(sq_ref.shape)


def conv3d_bn_stats(x, w_folded, scale=None, shift=None):
    """x: (N, D, H, W, Cin) f32, UNPADDED.  w_folded: (3, 9*Cin, Cout).
    If scale/shift (each (1, Cin)) are given, relu(x*scale+shift) is applied to the
    input on the fly (fused BN+ReLU of the previous layer).
    Returns (y, per-sample channel sum, per-sample channel sumsq)."""
    N, D, H, W, Cin = x.shape
    Cout = w_folded.shape[-1]
    apply_affine = scale is not None

    def plane_spec(kd):
        def idx(n, d):
            dz = jnp.minimum(jnp.maximum(d + kd - 1, 0), D - 1)  # clamp; masked in-kernel
            return (n, dz, 0, 0, 0)
        return pl.BlockSpec((1, 1, H, W, Cin), idx)

    in_specs = [plane_spec(0), plane_spec(1), plane_spec(2),
                pl.BlockSpec((3, 9 * Cin, Cout), lambda n, d: (0, 0, 0))]
    args = [x, x, x, w_folded]
    if apply_affine:
        in_specs += [pl.BlockSpec((1, Cin), lambda n, d: (0, 0)),
                     pl.BlockSpec((1, Cin), lambda n, d: (0, 0))]
        args += [scale, shift]

    y, s, sq = pl.pallas_call(
        functools.partial(_conv_kernel, apply_affine),
        out_shape=[
            jax.ShapeDtypeStruct((N, D, H, W, Cout), jnp.float32),
            jax.ShapeDtypeStruct((N, 1, Cout), jnp.float32),
            jax.ShapeDtypeStruct((N, 1, Cout), jnp.float32),
        ],
        grid=(N, D),
        in_specs=in_specs,
        out_specs=[
            pl.BlockSpec((1, 1, H, W, Cout), lambda n, d: (n, d, 0, 0, 0)),
            pl.BlockSpec((1, 1, Cout), lambda n, d: (n, 0, 0)),
            pl.BlockSpec((1, 1, Cout), lambda n, d: (n, 0, 0)),
        ],
        compiler_params=pltpu.CompilerParams(
            # per-sample accumulators -> n can be megacore-parallel (v7x);
            # d carries the resident stats accumulators -> arbitrary.
            dimension_semantics=("parallel", "arbitrary"),
            vmem_limit_bytes=_VMEM_LIMIT,
        ),
    )(*args)
    return y, s, sq


# ----------------------------------------------------------------------------------
# Kernel 2: final fused per-channel affine (folded BatchNorm) + ReLU.
# One whole (D, H, W, C) tile per sample (large tiles amortize per-step overhead).
# ----------------------------------------------------------------------------------
def _bn_relu_kernel(y_ref, scale_ref, shift_ref, o_ref):
    o_ref[...] = jnp.maximum(y_ref[...] * scale_ref[...] + shift_ref[...], 0.0)


def bn_relu(y, scale, shift):
    """y: (N, D, H, W, C); scale/shift: (1, C)."""
    N, D, H, W, C = y.shape
    return pl.pallas_call(
        _bn_relu_kernel,
        out_shape=jax.ShapeDtypeStruct(y.shape, jnp.float32),
        grid=(N,),
        in_specs=[
            pl.BlockSpec((1, D, H, W, C), lambda n: (n, 0, 0, 0, 0)),
            pl.BlockSpec((1, C), lambda n: (0, 0)),
            pl.BlockSpec((1, C), lambda n: (0, 0)),
        ],
        out_specs=pl.BlockSpec((1, D, H, W, C), lambda n: (n, 0, 0, 0, 0)),
        compiler_params=pltpu.CompilerParams(
            dimension_semantics=("parallel",),
            vmem_limit_bytes=_VMEM_LIMIT,
        ),
    )(y, scale, shift)


# ----------------------------------------------------------------------------------
# DoubleConv forward
# ----------------------------------------------------------------------------------
def _fold_weight(w):
    # (3, 3, 3, Cin, Cout) -> (3, 9*Cin, Cout); row order (kh*3+kw)*Cin + cin matches
    # the in-kernel im2col concat order.
    kd, kh, kw, cin, cout = w.shape
    return w.reshape(kd, kh * kw * cin, cout)


def _bn_scale_shift(s, sq, gamma, beta, count, eps):
    # Training-mode BatchNorm: biased batch statistics of the conv output.
    # (E[x^2]-E[x]^2 in f32; the conv outputs are ~zero-mean so cancellation is benign.)
    total = jnp.sum(s, axis=(0, 1))
    total_sq = jnp.sum(sq, axis=(0, 1))
    mean = total / count
    var = total_sq / count - mean * mean
    invstd = lax.rsqrt(var + eps)
    scale = gamma * invstd
    shift = beta - mean * scale
    return (scale.reshape(1, -1).astype(jnp.float32),
            shift.reshape(1, -1).astype(jnp.float32))


def double_conv_forward(x_ncdhw, w1, g1, b1, w2, g2, b2, eps=1e-5):
    x = jnp.transpose(x_ncdhw, (0, 2, 3, 4, 1))  # NCDHW -> NDHWC
    N, D, H, W, _ = x.shape
    count = N * D * H * W

    wf1 = _fold_weight(w1)
    wf2 = _fold_weight(w2)

    # conv1 (+ stats of y1); padding handled in-kernel, no jnp.pad round trip.
    y1, s1, sq1 = conv3d_bn_stats(x, wf1)
    sc1, sh1 = _bn_scale_shift(s1, sq1, g1, b1, count, eps)

    # conv2 with layer-1 BN+ReLU fused into its input path (+ stats of y2).
    y2, s2, sq2 = conv3d_bn_stats(y1, wf2, scale=sc1, shift=sh1)
    sc2, sh2 = _bn_scale_shift(s2, sq2, g2, b2, count, eps)

    # final BN + ReLU.
    a2 = bn_relu(y2, sc2, sh2)
    return jnp.transpose(a2, (0, 4, 1, 2, 3))  # NDHWC -> NCDHW


# ----------------------------------------------------------------------------------
# Pure-JAX reference (correctness check only)
# ----------------------------------------------------------------------------------
def _ref_forward(x_ncdhw, w1, g1, b1, w2, g2, b2, eps=1e-5):
    x = jnp.transpose(x_ncdhw, (0, 2, 3, 4, 1))
    dn = ("NDHWC", "DHWIO", "NDHWC")

    def conv(a, w):
        return lax.conv_general_dilated(
            a, w, (1, 1, 1), [(1, 1)] * 3, dimension_numbers=dn,
            precision=lax.Precision.HIGHEST)

    def bn_relu_ref(y, gamma, beta):
        mean = jnp.mean(y, axis=(0, 1, 2, 3), keepdims=True)
        var = jnp.mean((y - mean) ** 2, axis=(0, 1, 2, 3), keepdims=True)
        return jnp.maximum((y - mean) * lax.rsqrt(var + eps) * gamma + beta, 0.0)

    a1 = bn_relu_ref(conv(x, w1), g1, b1)
    a2 = bn_relu_ref(conv(a1, w2), g2, b2)
    return jnp.transpose(a2, (0, 4, 1, 2, 3))


if __name__ == "__main__":
    N, Cin, Cout, D, H, W = 2, 4, 8, 8, 8, 8

    key = jax.random.PRNGKey(0)
    kx, kw1, kw2 = jax.random.split(key, 3)

    # Input in PyTorch NCDHW layout.
    x = jax.random.normal(kx, (N, Cin, D, H, W), jnp.float32)

    # Conv3d weights (no bias), stored as DHWIO = (kD, kH, kW, Cin, Cout).
    w1 = jax.random.normal(kw1, (3, 3, 3, Cin, Cout), jnp.float32) * 0.2
    w2 = jax.random.normal(kw2, (3, 3, 3, Cout, Cout), jnp.float32) * 0.2

    # BatchNorm3d affine params, PyTorch default init (weight=1, bias=0).
    g1 = jnp.ones((Cout,), jnp.float32)
    b1 = jnp.zeros((Cout,), jnp.float32)
    g2 = jnp.ones((Cout,), jnp.float32)
    b2 = jnp.zeros((Cout,), jnp.float32)

    fwd = jax.jit(double_conv_forward)
    out = fwd(x, w1, g1, b1, w2, g2, b2)
    out = jax.block_until_ready(out)

    ref = _ref_forward(x, w1, g1, b1, w2, g2, b2)
    assert out.shape == (N, Cout, D, H, W), out.shape
    assert jnp.allclose(out, ref, atol=1e-2, rtol=1e-2), (
        f"max abs err = {float(jnp.max(jnp.abs(out - ref)))}")

    print("KERNEL_OK")
</pallas_src>

<mosaic_0001>
module attributes {stable_mosaic.version = 11 : i64} {
  func.func @_conv_kernel(%arg0: i32, %arg1: i32, %arg2: memref<1x1x8x8x4xf32, #tpu.memory_space<vmem>>, %arg3: memref<1x1x8x8x4xf32, #tpu.memory_space<vmem>>, %arg4: memref<1x1x8x8x4xf32, #tpu.memory_space<vmem>>, %arg5: memref<3x36x8xf32, #tpu.memory_space<vmem>>, %arg6: memref<1x1x8x8x8xf32, #tpu.memory_space<vmem>>, %arg7: memref<1x1x8xf32, #tpu.memory_space<vmem>>, %arg8: memref<1x1x8xf32, #tpu.memory_space<vmem>>) attributes {dimension_semantics = [#tpu.dimension_semantics<parallel>, #tpu.dimension_semantics<arbitrary>], iteration_bounds = array<i64: 2, 8>, scalar_prefetch = 0 : i64, scratch_operands = 0 : i64, tpu.core_type = #tpu.core_type<tc>, window_params = [{transform_indices = @transform_0, window_bounds = array<i64: 1, 1, 8, 8, 4>}, {transform_indices = @transform_1, window_bounds = array<i64: 1, 1, 8, 8, 4>}, {transform_indices = @transform_2, window_bounds = array<i64: 1, 1, 8, 8, 4>}, {pipeline_mode = #tpu.pipeline_mode<synchronous>, transform_indices = @transform_3, window_bounds = array<i64: 3, 36, 8>}, {transform_indices = @transform_4, window_bounds = array<i64: 1, 1, 8, 8, 8>}, {transform_indices = @transform_5, window_bounds = array<i64: 1, 1, 8>}, {transform_indices = @transform_6, window_bounds = array<i64: 1, 1, 8>}]} {
    %c0_i32 = arith.constant 0 : i32
    %0 = arith.cmpi eq, %arg1, %c0_i32 : i32
    %1 = arith.extui %0 : i1 to i32
    %c0_i32_0 = arith.constant 0 : i32
    %2 = arith.cmpi ne, %1, %c0_i32_0 : i32
    scf.if %2 {
      %cst_59 = arith.constant 0.000000e+00 : f32
      %131 = vector.broadcast %cst_59 : f32 to vector<1x1x8xf32>
      %c0_60 = arith.constant 0 : index
      %c0_61 = arith.constant 0 : index
      %c0_62 = arith.constant 0 : index
      %132 = vector.load %arg7[%c0_60, %c0_61, %c0_62] : memref<1x1x8xf32, #tpu.memory_space<vmem>>, vector<1x1x8xf32>
      tpu.vector_store %arg7[%c0_60, %c0_61, %c0_62], %131 {strides = array<i32>} : memref<1x1x8xf32, #tpu.memory_space<vmem>>, vector<1x1x8xf32>,
      %cst_63 = arith.constant 0.000000e+00 : f32
      %133 = vector.broadcast %cst_63 : f32 to vector<1x1x8xf32>
      %c0_64 = arith.constant 0 : index
      %c0_65 = arith.constant 0 : index
      %c0_66 = arith.constant 0 : index
      %134 = vector.load %arg8[%c0_64, %c0_65, %c0_66] : memref<1x1x8xf32, #tpu.memory_space<vmem>>, vector<1x1x8xf32>
      tpu.vector_store %arg8[%c0_64, %c0_65, %c0_66], %133 {strides = array<i32>} : memref<1x1x8xf32, #tpu.memory_space<vmem>>, vector<1x1x8xf32>,
    } else {
    }
    %cst = arith.constant 0.000000e+00 : f32
    %3 = vector.broadcast %cst : f32 to vector<64x8xf32>
    %c0 = arith.constant 0 : index
    %c0_1 = arith.constant 0 : index
    %c0_2 = arith.constant 0 : index
    %c0_3 = arith.constant 0 : index
    %c0_4 = arith.constant 0 : index
    %4 = vector.load %arg2[%c0, %c0_1, %c0_2, %c0_3, %c0_4] : memref<1x1x8x8x4xf32, #tpu.memory_space<vmem>>, vector<1x1x8x8x4xf32>
    %5 = vector.shape_cast %4 : vector<1x1x8x8x4xf32> to vector<8x8x4xf32>
    %c0_i32_5 = arith.constant 0 : i32
    %6 = arith.addi %arg1, %c0_i32_5 : i32
    %c1_i32 = arith.constant 1 : i32
    %7 = arith.subi %6, %c1_i32 : i32
    %c0_i32_6 = arith.constant 0 : i32
    %8 = arith.cmpi sge, %7, %c0_i32_6 : i32
    %c8_i32 = arith.constant 8 : i32
    %9 = arith.cmpi slt, %7, %c8_i32 : i32
    %10 = arith.andi %8, %9 : i1
    %11 = arith.extui %10 : i1 to i32
    %12 = arith.sitofp %11 : i32 to f32
    %13 = vector.broadcast %12 : f32 to vector<8x8x4xf32>
    %14 = arith.mulf %5, %13 : vector<8x8x4xf32>
    %cst_7 = arith.constant 0.000000e+00 : f32
    %15 = vector.broadcast %cst_7 : f32 to vector<1x8x4xf32>
    %cst_8 = arith.constant 0.000000e+00 : f32
    %16 = vector.broadcast %cst_8 : f32 to vector<10x1x4xf32>
    %17 = tpu.concatenate %15, %14, %15 in 0 : vector<1x8x4xf32>, vector<8x8x4xf32>, vector<1x8x4xf32> -> vector<10x8x4xf32>
    %18 = tpu.concatenate %16, %17, %16 in 1 : vector<10x1x4xf32>, vector<10x8x4xf32>, vector<10x1x4xf32> -> vector<10x10x4xf32>
    %19 = vector.extract_strided_slice %18 {offsets = [0, 0, 0], sizes = [8, 8, 4], strides = [1, 1, 1]} : vector<10x10x4xf32> to vector<8x8x4xf32>
    %20 = vector.shape_cast %19 : vector<8x8x4xf32> to vector<64x4xf32>
    %21 = vector.extract_strided_slice %18 {offsets = [0, 1, 0], sizes = [8, 8, 4], strides = [1, 1, 1]} : vector<10x10x4xf32> to vector<8x8x4xf32>
    %22 = vector.shape_cast %21 : vector<8x8x4xf32> to vector<64x4xf32>
    %23 = vector.extract_strided_slice %18 {offsets = [0, 2, 0], sizes = [8, 8, 4], strides = [1, 1, 1]} : vector<10x10x4xf32> to vector<8x8x4xf32>
    %24 = vector.shape_cast %23 : vector<8x8x4xf32> to vector<64x4xf32>
    %25 = vector.extract_strided_slice %18 {offsets = [1, 0, 0], sizes = [8, 8, 4], strides = [1, 1, 1]} : vector<10x10x4xf32> to vector<8x8x4xf32>
    %26 = vector.shape_cast %25 : vector<8x8x4xf32> to vector<64x4xf32>
    %27 = vector.extract_strided_slice %18 {offsets = [1, 1, 0], sizes = [8, 8, 4], strides = [1, 1, 1]} : vector<10x10x4xf32> to vector<8x8x4xf32>
    %28 = vector.shape_cast %27 : vector<8x8x4xf32> to vector<64x4xf32>
    %29 = vector.extract_strided_slice %18 {offsets = [1, 2, 0], sizes = [8, 8, 4], strides = [1, 1, 1]} : vector<10x10x4xf32> to vector<8x8x4xf32>
    %30 = vector.shape_cast %29 : vector<8x8x4xf32> to vector<64x4xf32>
    %31 = vector.extract_strided_slice %18 {offsets = [2, 0, 0], sizes = [8, 8, 4], strides = [1, 1, 1]} : vector<10x10x4xf32> to vector<8x8x4xf32>
    %32 = vector.shape_cast %31 : vector<8x8x4xf32> to vector<64x4xf32>
    %33 = vector.extract_strided_slice %18 {offsets = [2, 1, 0], sizes = [8, 8, 4], strides = [1, 1, 1]} : vector<10x10x4xf32> to vector<8x8x4xf32>
    %34 = vector.shape_cast %33 : vector<8x8x4xf32> to vector<64x4xf32>
    %35 = vector.extract_strided_slice %18 {offsets = [2, 2, 0], sizes = [8, 8, 4], strides = [1, 1, 1]} : vector<10x10x4xf32> to vector<8x8x4xf32>
    %36 = vector.shape_cast %35 : vector<8x8x4xf32> to vector<64x4xf32>
    %37 = tpu.concatenate %20, %22, %24, %26, %28, %30, %32, %34, %36 in 1 : vector<64x4xf32>, vector<64x4xf32>, vector<64x4xf32>, vector<64x4xf32>, vector<64x4xf32>, vector<64x4xf32>, vector<64x4xf32>, vector<64x4xf32>, vector<64x4xf32> -> vector<64x36xf32>
    %c0_9 = arith.constant 0 : index
    %c0_10 = arith.constant 0 : index
    %c0_11 = arith.constant 0 : index
    %38 = vector.load %arg5[%c0_9, %c0_10, %c0_11] : memref<3x36x8xf32, #tpu.memory_space<vmem>>, vector<1x36x8xf32>
    %39 = vector.shape_cast %38 : vector<1x36x8xf32> to vector<36x8xf32>
    %cst_12 = arith.constant dense<0.000000e+00> : vector<64x8xf32>
    %40 = tpu.matmul %37, %39, %cst_12 {dimension_numbers = #tpu.dot_dimension_numbers<[1], [0], [0], [1], [0, 0, 1, 1], [], []>} : vector<64x36xf32>, vector<36x8xf32>, vector<64x8xf32> -> vector<64x8xf32>
    %41 = arith.addf %3, %40 : vector<64x8xf32>
    %c0_13 = arith.constant 0 : index
    %c0_14 = arith.constant 0 : index
    %c0_15 = arith.constant 0 : index
    %c0_16 = arith.constant 0 : index
    %c0_17 = arith.constant 0 : index
    %42 = vector.load %arg3[%c0_13, %c0_14, %c0_15, %c0_16, %c0_17] : memref<1x1x8x8x4xf32, #tpu.memory_space<vmem>>, vector<1x1x8x8x4xf32>
    %43 = vector.shape_cast %42 : vector<1x1x8x8x4xf32> to vector<8x8x4xf32>
    %c1_i32_18 = arith.constant 1 : i32
    %44 = arith.addi %arg1, %c1_i32_18 : i32
    %c1_i32_19 = arith.constant 1 : i32
    %45 = arith.subi %44, %c1_i32_19 : i32
    %c0_i32_20 = arith.constant 0 : i32
    %46 = arith.cmpi sge, %45, %c0_i32_20 : i32
    %c8_i32_21 = arith.constant 8 : i32
    %47 = arith.cmpi slt, %45, %c8_i32_21 : i32
    %48 = arith.andi %46, %47 : i1
    %49 = arith.extui %48 : i1 to i32
    %50 = arith.sitofp %49 : i32 to f32
    %51 = vector.broadcast %50 : f32 to vector<8x8x4xf32>
    %52 = arith.mulf %43, %51 : vector<8x8x4xf32>
    %cst_22 = arith.constant 0.000000e+00 : f32
    %53 = vector.broadcast %cst_22 : f32 to vector<1x8x4xf32>
    %cst_23 = arith.constant 0.000000e+00 : f32
    %54 = vector.broadcast %cst_23 : f32 to vector<10x1x4xf32>
    %55 = tpu.concatenate %53, %52, %53 in 0 : vector<1x8x4xf32>, vector<8x8x4xf32>, vector<1x8x4xf32> -> vector<10x8x4xf32>
    %56 = tpu.concatenate %54, %55, %54 in 1 : vector<10x1x4xf32>, vector<10x8x4xf32>, vector<10x1x4xf32> -> vector<10x10x4xf32>
    %57 = vector.extract_strided_slice %56 {offsets = [0, 0, 0], sizes = [8, 8, 4], strides = [1, 1, 1]} : vector<10x10x4xf32> to vector<8x8x4xf32>
    %58 = vector.shape_cast %57 : vector<8x8x4xf32> to vector<64x4xf32>
    %59 = vector.extract_strided_slice %56 {offsets = [0, 1, 0], sizes = [8, 8, 4], strides = [1, 1, 1]} : vector<10x10x4xf32> to vector<8x8x4xf32>
    %60 = vector.shape_cast %59 : vector<8x8x4xf32> to vector<64x4xf32>
    %61 = vector.extract_strided_slice %56 {offsets = [0, 2, 0], sizes = [8, 8, 4], strides = [1, 1, 1]} : vector<10x10x4xf32> to vector<8x8x4xf32>
    %62 = vector.shape_cast %61 : vector<8x8x4xf32> to vector<64x4xf32>
    %63 = vector.extract_strided_slice %56 {offsets = [1, 0, 0], sizes = [8, 8, 4], strides = [1, 1, 1]} : vector<10x10x4xf32> to vector<8x8x4xf32>
    %64 = vector.shape_cast %63 : vector<8x8x4xf32> to vector<64x4xf32>
    %65 = vector.extract_strided_slice %56 {offsets = [1, 1, 0], sizes = [8, 8, 4], strides = [1, 1, 1]} : vector<10x10x4xf32> to vector<8x8x4xf32>
    %66 = vector.shape_cast %65 : vector<8x8x4xf32> to vector<64x4xf32>
    %67 = vector.extract_strided_slice %56 {offsets = [1, 2, 0], sizes = [8, 8, 4], strides = [1, 1, 1]} : vector<10x10x4xf32> to vector<8x8x4xf32>
    %68 = vector.shape_cast %67 : vector<8x8x4xf32> to vector<64x4xf32>
    %69 = vector.extract_strided_slice %56 {offsets = [2, 0, 0], sizes = [8, 8, 4], strides = [1, 1, 1]} : vector<10x10x4xf32> to vector<8x8x4xf32>
    %70 = vector.shape_cast %69 : vector<8x8x4xf32> to vector<64x4xf32>
    %71 = vector.extract_strided_slice %56 {offsets = [2, 1, 0], sizes = [8, 8, 4], strides = [1, 1, 1]} : vector<10x10x4xf32> to vector<8x8x4xf32>
    %72 = vector.shape_cast %71 : vector<8x8x4xf32> to vector<64x4xf32>
    %73 = vector.extract_strided_slice %56 {offsets = [2, 2, 0], sizes = [8, 8, 4], strides = [1, 1, 1]} : vector<10x10x4xf32> to vector<8x8x4xf32>
    %74 = vector.shape_cast %73 : vector<8x8x4xf32> to vector<64x4xf32>
    %75 = tpu.concatenate %58, %60, %62, %64, %66, %68, %70, %72, %74 in 1 : vector<64x4xf32>, vector<64x4xf32>, vector<64x4xf32>, vector<64x4xf32>, vector<64x4xf32>, vector<64x4xf32>, vector<64x4xf32>, vector<64x4xf32>, vector<64x4xf32> -> vector<64x36xf32>
    %c1 = arith.constant 1 : index
    %c0_24 = arith.constant 0 : index
    %c0_25 = arith.constant 0 : index
    %76 = vector.load %arg5[%c1, %c0_24, %c0_25] : memref<3x36x8xf32, #tpu.memory_space<vmem>>, vector<1x36x8xf32>
    %77 = vector.shape_cast %76 : vector<1x36x8xf32> to vector<36x8xf32>
    %cst_26 = arith.constant dense<0.000000e+00> : vector<64x8xf32>
    %78 = tpu.matmul %75, %77, %cst_26 {dimension_numbers = #tpu.dot_dimension_numbers<[1], [0], [0], [1], [0, 0, 1, 1], [], []>} : vector<64x36xf32>, vector<36x8xf32>, vector<64x8xf32> -> vector<64x8xf32>
    %79 = arith.addf %41, %78 : vector<64x8xf32>
    %c0_27 = arith.constant 0 : index
    %c0_28 = arith.constant 0 : index
    %c0_29 = arith.constant 0 : index
    %c0_30 = arith.constant 0 : index
    %c0_31 = arith.constant 0 : index
    %80 = vector.load %arg4[%c0_27, %c0_28, %c0_29, %c0_30, %c0_31] : memref<1x1x8x8x4xf32, #tpu.memory_space<vmem>>, vector<1x1x8x8x4xf32>
    %81 = vector.shape_cast %80 : vector<1x1x8x8x4xf32> to vector<8x8x4xf32>
    %c2_i32 = arith.constant 2 : i32
    %82 = arith.addi %arg1, %c2_i32 : i32
    %c1_i32_32 = arith.constant 1 : i32
    %83 = arith.subi %82, %c1_i32_32 : i32
    %c0_i32_33 = arith.constant 0 : i32
    %84 = arith.cmpi sge, %83, %c0_i32_33 : i32
    %c8_i32_34 = arith.constant 8 : i32
    %85 = arith.cmpi slt, %83, %c8_i32_34 : i32
    %86 = arith.andi %84, %85 : i1
    %87 = arith.extui %86 : i1 to i32
    %88 = arith.sitofp %87 : i32 to f32
    %89 = vector.broadcast %88 : f32 to vector<8x8x4xf32>
    %90 = arith.mulf %81, %89 : vector<8x8x4xf32>
    %cst_35 = arith.constant 0.000000e+00 : f32
    %91 = vector.broadcast %cst_35 : f32 to vector<1x8x4xf32>
    %cst_36 = arith.constant 0.000000e+00 : f32
    %92 = vector.broadcast %cst_36 : f32 to vector<10x1x4xf32>
    %93 = tpu.concatenate %91, %90, %91 in 0 : vector<1x8x4xf32>, vector<8x8x4xf32>, vector<1x8x4xf32> -> vector<10x8x4xf32>
    %94 = tpu.concatenate %92, %93, %92 in 1 : vector<10x1x4xf32>, vector<10x8x4xf32>, vector<10x1x4xf32> -> vector<10x10x4xf32>
    %95 = vector.extract_strided_slice %94 {offsets = [0, 0, 0], sizes = [8, 8, 4], strides = [1, 1, 1]} : vector<10x10x4xf32> to vector<8x8x4xf32>
    %96 = vector.shape_cast %95 : vector<8x8x4xf32> to vector<64x4xf32>
    %97 = vector.extract_strided_slice %94 {offsets = [0, 1, 0], sizes = [8, 8, 4], strides = [1, 1, 1]} : vector<10x10x4xf32> to vector<8x8x4xf32>
    %98 = vector.shape_cast %97 : vector<8x8x4xf32> to vector<64x4xf32>
    %99 = vector.extract_strided_slice %94 {offsets = [0, 2, 0], sizes = [8, 8, 4], strides = [1, 1, 1]} : vector<10x10x4xf32> to vector<8x8x4xf32>
    %100 = vector.shape_cast %99 : vector<8x8x4xf32> to vector<64x4xf32>
    %101 = vector.extract_strided_slice %94 {offsets = [1, 0, 0], sizes = [8, 8, 4], strides = [1, 1, 1]} : vector<10x10x4xf32> to vector<8x8x4xf32>
    %102 = vector.shape_cast %101 : vector<8x8x4xf32> to vector<64x4xf32>
    %103 = vector.extract_strided_slice %94 {offsets = [1, 1, 0], sizes = [8, 8, 4], strides = [1, 1, 1]} : vector<10x10x4xf32> to vector<8x8x4xf32>
    %104 = vector.shape_cast %103 : vector<8x8x4xf32> to vector<64x4xf32>
    %105 = vector.extract_strided_slice %94 {offsets = [1, 2, 0], sizes = [8, 8, 4], strides = [1, 1, 1]} : vector<10x10x4xf32> to vector<8x8x4xf32>
    %106 = vector.shape_cast %105 : vector<8x8x4xf32> to vector<64x4xf32>
    %107 = vector.extract_strided_slice %94 {offsets = [2, 0, 0], sizes = [8, 8, 4], strides = [1, 1, 1]} : vector<10x10x4xf32> to vector<8x8x4xf32>
    %108 = vector.shape_cast %107 : vector<8x8x4xf32> to vector<64x4xf32>
    %109 = vector.extract_strided_slice %94 {offsets = [2, 1, 0], sizes = [8, 8, 4], strides = [1, 1, 1]} : vector<10x10x4xf32> to vector<8x8x4xf32>
    %110 = vector.shape_cast %109 : vector<8x8x4xf32> to vector<64x4xf32>
    %111 = vector.extract_strided_slice %94 {offsets = [2, 2, 0], sizes = [8, 8, 4], strides = [1, 1, 1]} : vector<10x10x4xf32> to vector<8x8x4xf32>
    %112 = vector.shape_cast %111 : vector<8x8x4xf32> to vector<64x4xf32>
    %113 = tpu.concatenate %96, %98, %100, %102, %104, %106, %108, %110, %112 in 1 : vector<64x4xf32>, vector<64x4xf32>, vector<64x4xf32>, vector<64x4xf32>, vector<64x4xf32>, vector<64x4xf32>, vector<64x4xf32>, vector<64x4xf32>, vector<64x4xf32> -> vector<64x36xf32>
    %c2 = arith.constant 2 : index
    %c0_37 = arith.constant 0 : index
    %c0_38 = arith.constant 0 : index
    %114 = vector.load %arg5[%c2, %c0_37, %c0_38] : memref<3x36x8xf32, #tpu.memory_space<vmem>>, vector<1x36x8xf32>
    %115 = vector.shape_cast %114 : vector<1x36x8xf32> to vector<36x8xf32>
    %cst_39 = arith.constant dense<0.000000e+00> : vector<64x8xf32>
    %116 = tpu.matmul %113, %115, %cst_39 {dimension_numbers = #tpu.dot_dimension_numbers<[1], [0], [0], [1], [0, 0, 1, 1], [], []>} : vector<64x36xf32>, vector<36x8xf32>, vector<64x8xf32> -> vector<64x8xf32>
    %117 = arith.addf %79, %116 : vector<64x8xf32>
    %118 = vector.shape_cast %117 : vector<64x8xf32> to vector<1x1x8x8x8xf32>
    %c0_40 = arith.constant 0 : index
    %c0_41 = arith.constant 0 : index
    %c0_42 = arith.constant 0 : index
    %c0_43 = arith.constant 0 : index
    %c0_44 = arith.constant 0 : index
    %119 = vector.load %arg6[%c0_40, %c0_41, %c0_42, %c0_43, %c0_44] : memref<1x1x8x8x8xf32, #tpu.memory_space<vmem>>, vector<1x1x8x8x8xf32>
    tpu.vector_store %arg6[%c0_40, %c0_41, %c0_42, %c0_43, %c0_44], %118 {strides = array<i32>} : memref<1x1x8x8x8xf32, #tpu.memory_space<vmem>>, vector<1x1x8x8x8xf32>,
    %c0_45 = arith.constant 0 : index
    %c0_46 = arith.constant 0 : index
    %c0_47 = arith.constant 0 : index
    %120 = vector.load %arg7[%c0_45, %c0_46, %c0_47] : memref<1x1x8xf32, #tpu.memory_space<vmem>>, vector<1x1x8xf32>
    %cst_48 = arith.constant dense<0.000000e+00> : vector<8xf32>
    %121 = vector.multi_reduction <add>, %117, %cst_48 [0] : vector<64x8xf32> to vector<8xf32>
    %122 = vector.shape_cast %121 : vector<8xf32> to vector<1x1x8xf32>
    %123 = arith.addf %120, %122 : vector<1x1x8xf32>
    %c0_49 = arith.constant 0 : index
    %c0_50 = arith.constant 0 : index
    %c0_51 = arith.constant 0 : index
    %124 = vector.load %arg7[%c0_49, %c0_50, %c0_51] : memref<1x1x8xf32, #tpu.memory_space<vmem>>, vector<1x1x8xf32>
    tpu.vector_store %arg7[%c0_49, %c0_50, %c0_51], %123 {strides = array<i32>} : memref<1x1x8xf32, #tpu.memory_space<vmem>>, vector<1x1x8xf32>,
    %c0_52 = arith.constant 0 : index
    %c0_53 = arith.constant 0 : index
    %c0_54 = arith.constant 0 : index
    %125 = vector.load %arg8[%c0_52, %c0_53, %c0_54] : memref<1x1x8xf32, #tpu.memory_space<vmem>>, vector<1x1x8xf32>
    %126 = arith.mulf %117, %117 : vector<64x8xf32>
    %cst_55 = arith.constant dense<0.000000e+00> : vector<8xf32>
    %127 = vector.multi_reduction <add>, %126, %cst_55 [0] : vector<64x8xf32> to vector<8xf32>
    %128 = vector.shape_cast %127 : vector<8xf32> to vector<1x1x8xf32>
    %129 = arith.addf %125, %128 : vector<1x1x8xf32>
    %c0_56 = arith.constant 0 : index
    %c0_57 = arith.constant 0 : index
    %c0_58 = arith.constant 0 : index
    %130 = vector.load %arg8[%c0_56, %c0_57, %c0_58] : memref<1x1x8xf32, #tpu.memory_space<vmem>>, vector<1x1x8xf32>
    tpu.vector_store %arg8[%c0_56, %c0_57, %c0_58], %129 {strides = array<i32>} : memref<1x1x8xf32, #tpu.memory_space<vmem>>, vector<1x1x8xf32>,
    return
  }
  func.func @transform_0(%arg0: i32, %arg1: i32) -> (i32, i32, i32, i32, i32) {
    %c0_i32 = arith.constant 0 : i32
    %0 = arith.addi %arg1, %c0_i32 : i32
    %c1_i32 = arith.constant 1 : i32
    %1 = arith.subi %0, %c1_i32 : i32
    %c0_i32_0 = arith.constant 0 : i32
    %2 = arith.maxsi %1, %c0_i32_0 : i32
    %c7_i32 = arith.constant 7 : i32
    %3 = arith.minsi %2, %c7_i32 : i32
    %c0_i32_1 = arith.constant 0 : i32
    %c0_i32_2 = arith.constant 0 : i32
    %c0_i32_3 = arith.constant 0 : i32
    %c0_i32_4 = arith.constant 0 : i32
    return %arg0, %3, %c0_i32_1, %c0_i32_2, %c0_i32_3 : i32, i32, i32, i32, i32
  }
  func.func @transform_1(%arg0: i32, %arg1: i32) -> (i32, i32, i32, i32, i32) {
    %c1_i32 = arith.constant 1 : i32
    %0 = arith.addi %arg1, %c1_i32 : i32
    %c1_i32_0 = arith.constant 1 : i32
    %1 = arith.subi %0, %c1_i32_0 : i32
    %c0_i32 = arith.constant 0 : i32
    %2 = arith.maxsi %1, %c0_i32 : i32
    %c7_i32 = arith.constant 7 : i32
    %3 = arith.minsi %2, %c7_i32 : i32
    %c0_i32_1 = arith.constant 0 : i32
    %c0_i32_2 = arith.constant 0 : i32
    %c0_i32_3 = arith.constant 0 : i32
    %c0_i32_4 = arith.constant 0 : i32
    return %arg0, %3, %c0_i32_1, %c0_i32_2, %c0_i32_3 : i32, i32, i32, i32, i32
  }
  func.func @transform_2(%arg0: i32, %arg1: i32) -> (i32, i32, i32, i32, i32) {
    %c2_i32 = arith.constant 2 : i32
    %0 = arith.addi %arg1, %c2_i32 : i32
    %c1_i32 = arith.constant 1 : i32
    %1 = arith.subi %0, %c1_i32 : i32
    %c0_i32 = arith.constant 0 : i32
    %2 = arith.maxsi %1, %c0_i32 : i32
    %c7_i32 = arith.constant 7 : i32
    %3 = arith.minsi %2, %c7_i32 : i32
    %c0_i32_0 = arith.constant 0 : i32
    %c0_i32_1 = arith.constant 0 : i32
    %c0_i32_2 = arith.constant 0 : i32
    %c0_i32_3 = arith.constant 0 : i32
    return %arg0, %3, %c0_i32_0, %c0_i32_1, %c0_i32_2 : i32, i32, i32, i32, i32
  }
  func.func @transform_3(%arg0: i32, %arg1: i32) -> (i32, i32, i32) {
    %c0_i32 = arith.constant 0 : i32
    %c0_i32_0 = arith.constant 0 : i32
    %c0_i32_1 = arith.constant 0 : i32
    %c0_i32_2 = arith.constant 0 : i32
    return %c0_i32, %c0_i32_0, %c0_i32_1 : i32, i32, i32
  }
  func.func @transform_4(%arg0: i32, %arg1: i32) -> (i32, i32, i32, i32, i32) {
    %c0_i32 = arith.constant 0 : i32
    %c0_i32_0 = arith.constant 0 : i32
    %c0_i32_1 = arith.constant 0 : i32
    %c0_i32_2 = arith.constant 0 : i32
    return %arg0, %arg1, %c0_i32, %c0_i32_0, %c0_i32_1 : i32, i32, i32, i32, i32
  }
  func.func @transform_5(%arg0: i32, %arg1: i32) -> (i32, i32, i32) {
    %c0_i32 = arith.constant 0 : i32
    %c0_i32_0 = arith.constant 0 : i32
    %c0_i32_1 = arith.constant 0 : i32
    return %arg0, %c0_i32, %c0_i32_0 : i32, i32, i32
  }
  func.func @transform_6(%arg0: i32, %arg1: i32) -> (i32, i32, i32) {
    %c0_i32 = arith.constant 0 : i32
    %c0_i32_0 = arith.constant 0 : i32
    %c0_i32_1 = arith.constant 0 : i32
    return %arg0, %c0_i32, %c0_i32_0 : i32, i32, i32
  }
}

module attributes {stable_mosaic.version = 11 : i64} {
  func.func @_bn_relu_kernel(%arg0: i32, %arg1: memref<1x8x8x8x8xf32, #tpu.memory_space<vmem>>, %arg2: memref<1x8xf32, #tpu.memory_space<vmem>>, %arg3: memref<1x8xf32, #tpu.memory_space<vmem>>, %arg4: memref<1x8x8x8x8xf32, #tpu.memory_space<vmem>>) attributes {dimension_semantics = [#tpu.dimension_semantics<parallel>], iteration_bounds = array<i64: 2>, scalar_prefetch = 0 : i64, scratch_operands = 0 : i64, tpu.core_type = #tpu.core_type<tc>, window_params = [{transform_indices = @transform_0, window_bounds = array<i64: 1, 8, 8, 8, 8>}, {pipeline_mode = #tpu.pipeline_mode<synchronous>, transform_indices = @transform_1, window_bounds = array<i64: 1, 8>}, {pipeline_mode = #tpu.pipeline_mode<synchronous>, transform_indices = @transform_2, window_bounds = array<i64: 1, 8>}, {transform_indices = @transform_3, window_bounds = array<i64: 1, 8, 8, 8, 8>}]} {
    %c0 = arith.constant 0 : index
    %c0_0 = arith.constant 0 : index
    %c0_1 = arith.constant 0 : index
    %c0_2 = arith.constant 0 : index
    %c0_3 = arith.constant 0 : index
    %0 = vector.load %arg1[%c0, %c0_0, %c0_1, %c0_2, %c0_3] : memref<1x8x8x8x8xf32, #tpu.memory_space<vmem>>, vector<1x8x8x8x8xf32>
    %c0_4 = arith.constant 0 : index
    %c0_5 = arith.constant 0 : index
    %1 = vector.load %arg2[%c0_4, %c0_5] : memref<1x8xf32, #tpu.memory_space<vmem>>, vector<1x8xf32>
    %2 = vector.shape_cast %1 : vector<1x8xf32> to vector<1x1x1x1x8xf32>
    %3 = vector.broadcast %2 : vector<1x1x1x1x8xf32> to vector<1x8x8x8x8xf32>
    %4 = arith.mulf %0, %3 : vector<1x8x8x8x8xf32>
    %c0_6 = arith.constant 0 : index
    %c0_7 = arith.constant 0 : index
    %5 = vector.load %arg3[%c0_6, %c0_7] : memref<1x8xf32, #tpu.memory_space<vmem>>, vector<1x8xf32>
    %6 = vector.shape_cast %5 : vector<1x8xf32> to vector<1x1x1x1x8xf32>
    %7 = vector.broadcast %6 : vector<1x1x1x1x8xf32> to vector<1x8x8x8x8xf32>
    %8 = arith.addf %4, %7 : vector<1x8x8x8x8xf32>
    %cst = arith.constant 0.000000e+00 : f32
    %9 = vector.broadcast %cst : f32 to vector<1x8x8x8x8xf32>
    %10 = arith.maximumf %8, %9 : vector<1x8x8x8x8xf32>
    %c0_8 = arith.constant 0 : index
    %c0_9 = arith.constant 0 : index
    %c0_10 = arith.constant 0 : index
    %c0_11 = arith.constant 0 : index
    %c0_12 = arith.constant 0 : index
    %11 = vector.load %arg4[%c0_8, %c0_9, %c0_10, %c0_11, %c0_12] : memref<1x8x8x8x8xf32, #tpu.memory_space<vmem>>, vector<1x8x8x8x8xf32>
    tpu.vector_store %arg4[%c0_8, %c0_9, %c0_10, %c0_11, %c0_12], %10 {strides = array<i32>} : memref<1x8x8x8x8xf32, #tpu.memory_space<vmem>>, vector<1x8x8x8x8xf32>,
    return
  }
  func.func @transform_0(%arg0: i32) -> (i32, i32, i32, i32, i32) {
    %c0_i32 = arith.constant 0 : i32
    %c0_i32_0 = arith.constant 0 : i32
    %c0_i32_1 = arith.constant 0 : i32
    %c0_i32_2 = arith.constant 0 : i32
    %c0_i32_3 = arith.constant 0 : i32
    return %arg0, %c0_i32, %c0_i32_0, %c0_i32_1, %c0_i32_2 : i32, i32, i32, i32, i32
  }
  func.func @transform_1(%arg0: i32) -> (i32, i32) {
    %c0_i32 = arith.constant 0 : i32
    %c0_i32_0 = arith.constant 0 : i32
    %c0_i32_1 = arith.constant 0 : i32
    return %c0_i32, %c0_i32_0 : i32, i32
  }
  func.func @transform_2(%arg0: i32) -> (i32, i32) {
    %c0_i32 = arith.constant 0 : i32
    %c0_i32_0 = arith.constant 0 : i32
    %c0_i32_1 = arith.constant 0 : i32
    return %c0_i32, %c0_i32_0 : i32, i32
  }
  func.func @transform_3(%arg0: i32) -> (i32, i32, i32, i32, i32) {
    %c0_i32 = arith.constant 0 : i32
    %c0_i32_0 = arith.constant 0 : i32
    %c0_i32_1 = arith.constant 0 : i32
    %c0_i32_2 = arith.constant 0 : i32
    %c0_i32_3 = arith.constant 0 : i32
    return %arg0, %c0_i32, %c0_i32_0, %c0_i32_1, %c0_i32_2 : i32, i32, i32, i32, i32
  }
}

module attributes {stable_mosaic.version = 11 : i64} {
  func.func @_conv_kernel(%arg0: i32, %arg1: i32, %arg2: memref<1x1x8x8x8xf32, #tpu.memory_space<vmem>>, %arg3: memref<1x1x8x8x8xf32, #tpu.memory_space<vmem>>, %arg4: memref<1x1x8x8x8xf32, #tpu.memory_space<vmem>>, %arg5: memref<3x72x8xf32, #tpu.memory_space<vmem>>, %arg6: memref<1x8xf32, #tpu.memory_space<vmem>>, %arg7: memref<1x8xf32, #tpu.memory_space<vmem>>, %arg8: memref<1x1x8x8x8xf32, #tpu.memory_space<vmem>>, %arg9: memref<1x1x8xf32, #tpu.memory_space<vmem>>, %arg10: memref<1x1x8xf32, #tpu.memory_space<vmem>>) attributes {dimension_semantics = [#tpu.dimension_semantics<parallel>, #tpu.dimension_semantics<arbitrary>], iteration_bounds = array<i64: 2, 8>, scalar_prefetch = 0 : i64, scratch_operands = 0 : i64, tpu.core_type = #tpu.core_type<tc>, window_params = [{transform_indices = @transform_0, window_bounds = array<i64: 1, 1, 8, 8, 8>}, {transform_indices = @transform_1, window_bounds = array<i64: 1, 1, 8, 8, 8>}, {transform_indices = @transform_2, window_bounds = array<i64: 1, 1, 8, 8, 8>}, {pipeline_mode = #tpu.pipeline_mode<synchronous>, transform_indices = @transform_3, window_bounds = array<i64: 3, 72, 8>}, {pipeline_mode = #tpu.pipeline_mode<synchronous>, transform_indices = @transform_4, window_bounds = array<i64: 1, 8>}, {pipeline_mode = #tpu.pipeline_mode<synchronous>, transform_indices = @transform_5, window_bounds = array<i64: 1, 8>}, {transform_indices = @transform_6, window_bounds = array<i64: 1, 1, 8, 8, 8>}, {transform_indices = @transform_7, window_bounds = array<i64: 1, 1, 8>}, {transform_indices = @transform_8, window_bounds = array<i64: 1, 1, 8>}]} {
    %c0_i32 = arith.constant 0 : i32
    %0 = arith.cmpi eq, %arg1, %c0_i32 : i32
    %1 = arith.extui %0 : i1 to i32
    %c0_i32_0 = arith.constant 0 : i32
    %2 = arith.cmpi ne, %1, %c0_i32_0 : i32
    scf.if %2 {
      %cst_74 = arith.constant 0.000000e+00 : f32
      %161 = vector.broadcast %cst_74 : f32 to vector<1x1x8xf32>
      %c0_75 = arith.constant 0 : index
      %c0_76 = arith.constant 0 : index
      %c0_77 = arith.constant 0 : index
      %162 = vector.load %arg9[%c0_75, %c0_76, %c0_77] : memref<1x1x8xf32, #tpu.memory_space<vmem>>, vector<1x1x8xf32>
      tpu.vector_store %arg9[%c0_75, %c0_76, %c0_77], %161 {strides = array<i32>} : memref<1x1x8xf32, #tpu.memory_space<vmem>>, vector<1x1x8xf32>,
      %cst_78 = arith.constant 0.000000e+00 : f32
      %163 = vector.broadcast %cst_78 : f32 to vector<1x1x8xf32>
      %c0_79 = arith.constant 0 : index
      %c0_80 = arith.constant 0 : index
      %c0_81 = arith.constant 0 : index
      %164 = vector.load %arg10[%c0_79, %c0_80, %c0_81] : memref<1x1x8xf32, #tpu.memory_space<vmem>>, vector<1x1x8xf32>
      tpu.vector_store %arg10[%c0_79, %c0_80, %c0_81], %163 {strides = array<i32>} : memref<1x1x8xf32, #tpu.memory_space<vmem>>, vector<1x1x8xf32>,
    } else {
    }
    %cst = arith.constant 0.000000e+00 : f32
    %3 = vector.broadcast %cst : f32 to vector<64x8xf32>
    %c0 = arith.constant 0 : index
    %c0_1 = arith.constant 0 : index
    %c0_2 = arith.constant 0 : index
    %c0_3 = arith.constant 0 : index
    %c0_4 = arith.constant 0 : index
    %4 = vector.load %arg2[%c0, %c0_1, %c0_2, %c0_3, %c0_4] : memref<1x1x8x8x8xf32, #tpu.memory_space<vmem>>, vector<1x1x8x8x8xf32>
    %5 = vector.shape_cast %4 : vector<1x1x8x8x8xf32> to vector<8x8x8xf32>
    %c0_5 = arith.constant 0 : index
    %c0_6 = arith.constant 0 : index
    %6 = vector.load %arg6[%c0_5, %c0_6] : memref<1x8xf32, #tpu.memory_space<vmem>>, vector<1x8xf32>
    %7 = vector.shape_cast %6 : vector<1x8xf32> to vector<1x1x8xf32>
    %8 = vector.broadcast %7 : vector<1x1x8xf32> to vector<8x8x8xf32>
    %9 = arith.mulf %5, %8 : vector<8x8x8xf32>
    %c0_7 = arith.constant 0 : index
    %c0_8 = arith.constant 0 : index
    %10 = vector.load %arg7[%c0_7, %c0_8] : memref<1x8xf32, #tpu.memory_space<vmem>>, vector<1x8xf32>
    %11 = vector.shape_cast %10 : vector<1x8xf32> to vector<1x1x8xf32>
    %12 = vector.broadcast %11 : vector<1x1x8xf32> to vector<8x8x8xf32>
    %13 = arith.addf %9, %12 : vector<8x8x8xf32>
    %cst_9 = arith.constant 0.000000e+00 : f32
    %14 = vector.broadcast %cst_9 : f32 to vector<8x8x8xf32>
    %15 = arith.maximumf %13, %14 : vector<8x8x8xf32>
    %c0_i32_10 = arith.constant 0 : i32
    %16 = arith.addi %arg1, %c0_i32_10 : i32
    %c1_i32 = arith.constant 1 : i32
    %17 = arith.subi %16, %c1_i32 : i32
    %c0_i32_11 = arith.constant 0 : i32
    %18 = arith.cmpi sge, %17, %c0_i32_11 : i32
    %c8_i32 = arith.constant 8 : i32
    %19 = arith.cmpi slt, %17, %c8_i32 : i32
    %20 = arith.andi %18, %19 : i1
    %21 = arith.extui %20 : i1 to i32
    %22 = arith.sitofp %21 : i32 to f32
    %23 = vector.broadcast %22 : f32 to vector<8x8x8xf32>
    %24 = arith.mulf %15, %23 : vector<8x8x8xf32>
    %cst_12 = arith.constant 0.000000e+00 : f32
    %25 = vector.broadcast %cst_12 : f32 to vector<1x8x8xf32>
    %cst_13 = arith.constant 0.000000e+00 : f32
    %26 = vector.broadcast %cst_13 : f32 to vector<10x1x8xf32>
    %27 = tpu.concatenate %25, %24, %25 in 0 : vector<1x8x8xf32>, vector<8x8x8xf32>, vector<1x8x8xf32> -> vector<10x8x8xf32>
    %28 = tpu.concatenate %26, %27, %26 in 1 : vector<10x1x8xf32>, vector<10x8x8xf32>, vector<10x1x8xf32> -> vector<10x10x8xf32>
    %29 = vector.extract_strided_slice %28 {offsets = [0, 0, 0], sizes = [8, 8, 8], strides = [1, 1, 1]} : vector<10x10x8xf32> to vector<8x8x8xf32>
    %30 = vector.shape_cast %29 : vector<8x8x8xf32> to vector<64x8xf32>
    %31 = vector.extract_strided_slice %28 {offsets = [0, 1, 0], sizes = [8, 8, 8], strides = [1, 1, 1]} : vector<10x10x8xf32> to vector<8x8x8xf32>
    %32 = vector.shape_cast %31 : vector<8x8x8xf32> to vector<64x8xf32>
    %33 = vector.extract_strided_slice %28 {offsets = [0, 2, 0], sizes = [8, 8, 8], strides = [1, 1, 1]} : vector<10x10x8xf32> to vector<8x8x8xf32>
    %34 = vector.shape_cast %33 : vector<8x8x8xf32> to vector<64x8xf32>
    %35 = vector.extract_strided_slice %28 {offsets = [1, 0, 0], sizes = [8, 8, 8], strides = [1, 1, 1]} : vector<10x10x8xf32> to vector<8x8x8xf32>
    %36 = vector.shape_cast %35 : vector<8x8x8xf32> to vector<64x8xf32>
    %37 = vector.extract_strided_slice %28 {offsets = [1, 1, 0], sizes = [8, 8, 8], strides = [1, 1, 1]} : vector<10x10x8xf32> to vector<8x8x8xf32>
    %38 = vector.shape_cast %37 : vector<8x8x8xf32> to vector<64x8xf32>
    %39 = vector.extract_strided_slice %28 {offsets = [1, 2, 0], sizes = [8, 8, 8], strides = [1, 1, 1]} : vector<10x10x8xf32> to vector<8x8x8xf32>
    %40 = vector.shape_cast %39 : vector<8x8x8xf32> to vector<64x8xf32>
    %41 = vector.extract_strided_slice %28 {offsets = [2, 0, 0], sizes = [8, 8, 8], strides = [1, 1, 1]} : vector<10x10x8xf32> to vector<8x8x8xf32>
    %42 = vector.shape_cast %41 : vector<8x8x8xf32> to vector<64x8xf32>
    %43 = vector.extract_strided_slice %28 {offsets = [2, 1, 0], sizes = [8, 8, 8], strides = [1, 1, 1]} : vector<10x10x8xf32> to vector<8x8x8xf32>
    %44 = vector.shape_cast %43 : vector<8x8x8xf32> to vector<64x8xf32>
    %45 = vector.extract_strided_slice %28 {offsets = [2, 2, 0], sizes = [8, 8, 8], strides = [1, 1, 1]} : vector<10x10x8xf32> to vector<8x8x8xf32>
    %46 = vector.shape_cast %45 : vector<8x8x8xf32> to vector<64x8xf32>
    %47 = tpu.concatenate %30, %32, %34, %36, %38, %40, %42, %44, %46 in 1 : vector<64x8xf32>, vector<64x8xf32>, vector<64x8xf32>, vector<64x8xf32>, vector<64x8xf32>, vector<64x8xf32>, vector<64x8xf32>, vector<64x8xf32>, vector<64x8xf32> -> vector<64x72xf32>
    %c0_14 = arith.constant 0 : index
    %c0_15 = arith.constant 0 : index
    %c0_16 = arith.constant 0 : index
    %48 = vector.load %arg5[%c0_14, %c0_15, %c0_16] : memref<3x72x8xf32, #tpu.memory_space<vmem>>, vector<1x72x8xf32>
    %49 = vector.shape_cast %48 : vector<1x72x8xf32> to vector<72x8xf32>
    %cst_17 = arith.constant dense<0.000000e+00> : vector<64x8xf32>
    %50 = tpu.matmul %47, %49, %cst_17 {dimension_numbers = #tpu.dot_dimension_numbers<[1], [0], [0], [1], [0, 0, 1, 1], [], []>} : vector<64x72xf32>, vector<72x8xf32>, vector<64x8xf32> -> vector<64x8xf32>
    %51 = arith.addf %3, %50 : vector<64x8xf32>
    %c0_18 = arith.constant 0 : index
    %c0_19 = arith.constant 0 : index
    %c0_20 = arith.constant 0 : index
    %c0_21 = arith.constant 0 : index
    %c0_22 = arith.constant 0 : index
    %52 = vector.load %arg3[%c0_18, %c0_19, %c0_20, %c0_21, %c0_22] : memref<1x1x8x8x8xf32, #tpu.memory_space<vmem>>, vector<1x1x8x8x8xf32>
    %53 = vector.shape_cast %52 : vector<1x1x8x8x8xf32> to vector<8x8x8xf32>
    %c0_23 = arith.constant 0 : index
    %c0_24 = arith.constant 0 : index
    %54 = vector.load %arg6[%c0_23, %c0_24] : memref<1x8xf32, #tpu.memory_space<vmem>>, vector<1x8xf32>
    %55 = vector.shape_cast %54 : vector<1x8xf32> to vector<1x1x8xf32>
    %56 = vector.broadcast %55 : vector<1x1x8xf32> to vector<8x8x8xf32>
    %57 = arith.mulf %53, %56 : vector<8x8x8xf32>
    %c0_25 = arith.constant 0 : index
    %c0_26 = arith.constant 0 : index
    %58 = vector.load %arg7[%c0_25, %c0_26] : memref<1x8xf32, #tpu.memory_space<vmem>>, vector<1x8xf32>
    %59 = vector.shape_cast %58 : vector<1x8xf32> to vector<1x1x8xf32>
    %60 = vector.broadcast %59 : vector<1x1x8xf32> to vector<8x8x8xf32>
    %61 = arith.addf %57, %60 : vector<8x8x8xf32>
    %cst_27 = arith.constant 0.000000e+00 : f32
    %62 = vector.broadcast %cst_27 : f32 to vector<8x8x8xf32>
    %63 = arith.maximumf %61, %62 : vector<8x8x8xf32>
    %c1_i32_28 = arith.constant 1 : i32
    %64 = arith.addi %arg1, %c1_i32_28 : i32
    %c1_i32_29 = arith.constant 1 : i32
    %65 = arith.subi %64, %c1_i32_29 : i32
    %c0_i32_30 = arith.constant 0 : i32
    %66 = arith.cmpi sge, %65, %c0_i32_30 : i32
    %c8_i32_31 = arith.constant 8 : i32
    %67 = arith.cmpi slt, %65, %c8_i32_31 : i32
    %68 = arith.andi %66, %67 : i1
    %69 = arith.extui %68 : i1 to i32
    %70 = arith.sitofp %69 : i32 to f32
    %71 = vector.broadcast %70 : f32 to vector<8x8x8xf32>
    %72 = arith.mulf %63, %71 : vector<8x8x8xf32>
    %cst_32 = arith.constant 0.000000e+00 : f32
    %73 = vector.broadcast %cst_32 : f32 to vector<1x8x8xf32>
    %cst_33 = arith.constant 0.000000e+00 : f32
    %74 = vector.broadcast %cst_33 : f32 to vector<10x1x8xf32>
    %75 = tpu.concatenate %73, %72, %73 in 0 : vector<1x8x8xf32>, vector<8x8x8xf32>, vector<1x8x8xf32> -> vector<10x8x8xf32>
    %76 = tpu.concatenate %74, %75, %74 in 1 : vector<10x1x8xf32>, vector<10x8x8xf32>, vector<10x1x8xf32> -> vector<10x10x8xf32>
    %77 = vector.extract_strided_slice %76 {offsets = [0, 0, 0], sizes = [8, 8, 8], strides = [1, 1, 1]} : vector<10x10x8xf32> to vector<8x8x8xf32>
    %78 = vector.shape_cast %77 : vector<8x8x8xf32> to vector<64x8xf32>
    %79 = vector.extract_strided_slice %76 {offsets = [0, 1, 0], sizes = [8, 8, 8], strides = [1, 1, 1]} : vector<10x10x8xf32> to vector<8x8x8xf32>
    %80 = vector.shape_cast %79 : vector<8x8x8xf32> to vector<64x8xf32>
    %81 = vector.extract_strided_slice %76 {offsets = [0, 2, 0], sizes = [8, 8, 8], strides = [1, 1, 1]} : vector<10x10x8xf32> to vector<8x8x8xf32>
    %82 = vector.shape_cast %81 : vector<8x8x8xf32> to vector<64x8xf32>
    %83 = vector.extract_strided_slice %76 {offsets = [1, 0, 0], sizes = [8, 8, 8], strides = [1, 1, 1]} : vector<10x10x8xf32> to vector<8x8x8xf32>
    %84 = vector.shape_cast %83 : vector<8x8x8xf32> to vector<64x8xf32>
    %85 = vector.extract_strided_slice %76 {offsets = [1, 1, 0], sizes = [8, 8, 8], strides = [1, 1, 1]} : vector<10x10x8xf32> to vector<8x8x8xf32>
    %86 = vector.shape_cast %85 : vector<8x8x8xf32> to vector<64x8xf32>
    %87 = vector.extract_strided_slice %76 {offsets = [1, 2, 0], sizes = [8, 8, 8], strides = [1, 1, 1]} : vector<10x10x8xf32> to vector<8x8x8xf32>
    %88 = vector.shape_cast %87 : vector<8x8x8xf32> to vector<64x8xf32>
    %89 = vector.extract_strided_slice %76 {offsets = [2, 0, 0], sizes = [8, 8, 8], strides = [1, 1, 1]} : vector<10x10x8xf32> to vector<8x8x8xf32>
    %90 = vector.shape_cast %89 : vector<8x8x8xf32> to vector<64x8xf32>
    %91 = vector.extract_strided_slice %76 {offsets = [2, 1, 0], sizes = [8, 8, 8], strides = [1, 1, 1]} : vector<10x10x8xf32> to vector<8x8x8xf32>
    %92 = vector.shape_cast %91 : vector<8x8x8xf32> to vector<64x8xf32>
    %93 = vector.extract_strided_slice %76 {offsets = [2, 2, 0], sizes = [8, 8, 8], strides = [1, 1, 1]} : vector<10x10x8xf32> to vector<8x8x8xf32>
    %94 = vector.shape_cast %93 : vector<8x8x8xf32> to vector<64x8xf32>
    %95 = tpu.concatenate %78, %80, %82, %84, %86, %88, %90, %92, %94 in 1 : vector<64x8xf32>, vector<64x8xf32>, vector<64x8xf32>, vector<64x8xf32>, vector<64x8xf32>, vector<64x8xf32>, vector<64x8xf32>, vector<64x8xf32>, vector<64x8xf32> -> vector<64x72xf32>
    %c1 = arith.constant 1 : index
    %c0_34 = arith.constant 0 : index
    %c0_35 = arith.constant 0 : index
    %96 = vector.load %arg5[%c1, %c0_34, %c0_35] : memref<3x72x8xf32, #tpu.memory_space<vmem>>, vector<1x72x8xf32>
    %97 = vector.shape_cast %96 : vector<1x72x8xf32> to vector<72x8xf32>
    %cst_36 = arith.constant dense<0.000000e+00> : vector<64x8xf32>
    %98 = tpu.matmul %95, %97, %cst_36 {dimension_numbers = #tpu.dot_dimension_numbers<[1], [0], [0], [1], [0, 0, 1, 1], [], []>} : vector<64x72xf32>, vector<72x8xf32>, vector<64x8xf32> -> vector<64x8xf32>
    %99 = arith.addf %51, %98 : vector<64x8xf32>
    %c0_37 = arith.constant 0 : index
    %c0_38 = arith.constant 0 : index
    %c0_39 = arith.constant 0 : index
    %c0_40 = arith.constant 0 : index
    %c0_41 = arith.constant 0 : index
    %100 = vector.load %arg4[%c0_37, %c0_38, %c0_39, %c0_40, %c0_41] : memref<1x1x8x8x8xf32, #tpu.memory_space<vmem>>, vector<1x1x8x8x8xf32>
    %101 = vector.shape_cast %100 : vector<1x1x8x8x8xf32> to vector<8x8x8xf32>
    %c0_42 = arith.constant 0 : index
    %c0_43 = arith.constant 0 : index
    %102 = vector.load %arg6[%c0_42, %c0_43] : memref<1x8xf32, #tpu.memory_space<vmem>>, vector<1x8xf32>
    %103 = vector.shape_cast %102 : vector<1x8xf32> to vector<1x1x8xf32>
    %104 = vector.broadcast %103 : vector<1x1x8xf32> to vector<8x8x8xf32>
    %105 = arith.mulf %101, %104 : vector<8x8x8xf32>
    %c0_44 = arith.constant 0 : index
    %c0_45 = arith.constant 0 : index
    %106 = vector.load %arg7[%c0_44, %c0_45] : memref<1x8xf32, #tpu.memory_space<vmem>>, vector<1x8xf32>
    %107 = vector.shape_cast %106 : vector<1x8xf32> to vector<1x1x8xf32>
    %108 = vector.broadcast %107 : vector<1x1x8xf32> to vector<8x8x8xf32>
    %109 = arith.addf %105, %108 : vector<8x8x8xf32>
    %cst_46 = arith.constant 0.000000e+00 : f32
    %110 = vector.broadcast %cst_46 : f32 to vector<8x8x8xf32>
    %111 = arith.maximumf %109, %110 : vector<8x8x8xf32>
    %c2_i32 = arith.constant 2 : i32
    %112 = arith.addi %arg1, %c2_i32 : i32
    %c1_i32_47 = arith.constant 1 : i32
    %113 = arith.subi %112, %c1_i32_47 : i32
    %c0_i32_48 = arith.constant 0 : i32
    %114 = arith.cmpi sge, %113, %c0_i32_48 : i32
    %c8_i32_49 = arith.constant 8 : i32
    %115 = arith.cmpi slt, %113, %c8_i32_49 : i32
    %116 = arith.andi %114, %115 : i1
    %117 = arith.extui %116 : i1 to i32
    %118 = arith.sitofp %117 : i32 to f32
    %119 = vector.broadcast %118 : f32 to vector<8x8x8xf32>
    %120 = arith.mulf %111, %119 : vector<8x8x8xf32>
    %cst_50 = arith.constant 0.000000e+00 : f32
    %121 = vector.broadcast %cst_50 : f32 to vector<1x8x8xf32>
    %cst_51 = arith.constant 0.000000e+00 : f32
    %122 = vector.broadcast %cst_51 : f32 to vector<10x1x8xf32>
    %123 = tpu.concatenate %121, %120, %121 in 0 : vector<1x8x8xf32>, vector<8x8x8xf32>, vector<1x8x8xf32> -> vector<10x8x8xf32>
    %124 = tpu.concatenate %122, %123, %122 in 1 : vector<10x1x8xf32>, vector<10x8x8xf32>, vector<10x1x8xf32> -> vector<10x10x8xf32>
    %125 = vector.extract_strided_slice %124 {offsets = [0, 0, 0], sizes = [8, 8, 8], strides = [1, 1, 1]} : vector<10x10x8xf32> to vector<8x8x8xf32>
    %126 = vector.shape_cast %125 : vector<8x8x8xf32> to vector<64x8xf32>
    %127 = vector.extract_strided_slice %124 {offsets = [0, 1, 0], sizes = [8, 8, 8], strides = [1, 1, 1]} : vector<10x10x8xf32> to vector<8x8x8xf32>
    %128 = vector.shape_cast %127 : vector<8x8x8xf32> to vector<64x8xf32>
    %129 = vector.extract_strided_slice %124 {offsets = [0, 2, 0], sizes = [8, 8, 8], strides = [1, 1, 1]} : vector<10x10x8xf32> to vector<8x8x8xf32>
    %130 = vector.shape_cast %129 : vector<8x8x8xf32> to vector<64x8xf32>
    %131 = vector.extract_strided_slice %124 {offsets = [1, 0, 0], sizes = [8, 8, 8], strides = [1, 1, 1]} : vector<10x10x8xf32> to vector<8x8x8xf32>
    %132 = vector.shape_cast %131 : vector<8x8x8xf32> to vector<64x8xf32>
    %133 = vector.extract_strided_slice %124 {offsets = [1, 1, 0], sizes = [8, 8, 8], strides = [1, 1, 1]} : vector<10x10x8xf32> to vector<8x8x8xf32>
    %134 = vector.shape_cast %133 : vector<8x8x8xf32> to vector<64x8xf32>
    %135 = vector.extract_strided_slice %124 {offsets = [1, 2, 0], sizes = [8, 8, 8], strides = [1, 1, 1]} : vector<10x10x8xf32> to vector<8x8x8xf32>
    %136 = vector.shape_cast %135 : vector<8x8x8xf32> to vector<64x8xf32>
    %137 = vector.extract_strided_slice %124 {offsets = [2, 0, 0], sizes = [8, 8, 8], strides = [1, 1, 1]} : vector<10x10x8xf32> to vector<8x8x8xf32>
    %138 = vector.shape_cast %137 : vector<8x8x8xf32> to vector<64x8xf32>
    %139 = vector.extract_strided_slice %124 {offsets = [2, 1, 0], sizes = [8, 8, 8], strides = [1, 1, 1]} : vector<10x10x8xf32> to vector<8x8x8xf32>
    %140 = vector.shape_cast %139 : vector<8x8x8xf32> to vector<64x8xf32>
    %141 = vector.extract_strided_slice %124 {offsets = [2, 2, 0], sizes = [8, 8, 8], strides = [1, 1, 1]} : vector<10x10x8xf32> to vector<8x8x8xf32>
    %142 = vector.shape_cast %141 : vector<8x8x8xf32> to vector<64x8xf32>
    %143 = tpu.concatenate %126, %128, %130, %132, %134, %136, %138, %140, %142 in 1 : vector<64x8xf32>, vector<64x8xf32>, vector<64x8xf32>, vector<64x8xf32>, vector<64x8xf32>, vector<64x8xf32>, vector<64x8xf32>, vector<64x8xf32>, vector<64x8xf32> -> vector<64x72xf32>
    %c2 = arith.constant 2 : index
    %c0_52 = arith.constant 0 : index
    %c0_53 = arith.constant 0 : index
    %144 = vector.load %arg5[%c2, %c0_52, %c0_53] : memref<3x72x8xf32, #tpu.memory_space<vmem>>, vector<1x72x8xf32>
    %145 = vector.shape_cast %144 : vector<1x72x8xf32> to vector<72x8xf32>
    %cst_54 = arith.constant dense<0.000000e+00> : vector<64x8xf32>
    %146 = tpu.matmul %143, %145, %cst_54 {dimension_numbers = #tpu.dot_dimension_numbers<[1], [0], [0], [1], [0, 0, 1, 1], [], []>} : vector<64x72xf32>, vector<72x8xf32>, vector<64x8xf32> -> vector<64x8xf32>
    %147 = arith.addf %99, %146 : vector<64x8xf32>
    %148 = vector.shape_cast %147 : vector<64x8xf32> to vector<1x1x8x8x8xf32>
    %c0_55 = arith.constant 0 : index
    %c0_56 = arith.constant 0 : index
    %c0_57 = arith.constant 0 : index
    %c0_58 = arith.constant 0 : index
    %c0_59 = arith.constant 0 : index
    %149 = vector.load %arg8[%c0_55, %c0_56, %c0_57, %c0_58, %c0_59] : memref<1x1x8x8x8xf32, #tpu.memory_space<vmem>>, vector<1x1x8x8x8xf32>
    tpu.vector_store %arg8[%c0_55, %c0_56, %c0_57, %c0_58, %c0_59], %148 {strides = array<i32>} : memref<1x1x8x8x8xf32, #tpu.memory_space<vmem>>, vector<1x1x8x8x8xf32>,
    %c0_60 = arith.constant 0 : index
    %c0_61 = arith.constant 0 : index
    %c0_62 = arith.constant 0 : index
    %150 = vector.load %arg9[%c0_60, %c0_61, %c0_62] : memref<1x1x8xf32, #tpu.memory_space<vmem>>, vector<1x1x8xf32>
    %cst_63 = arith.constant dense<0.000000e+00> : vector<8xf32>
    %151 = vector.multi_reduction <add>, %147, %cst_63 [0] : vector<64x8xf32> to vector<8xf32>
    %152 = vector.shape_cast %151 : vector<8xf32> to vector<1x1x8xf32>
    %153 = arith.addf %150, %152 : vector<1x1x8xf32>
    %c0_64 = arith.constant 0 : index
    %c0_65 = arith.constant 0 : index
    %c0_66 = arith.constant 0 : index
    %154 = vector.load %arg9[%c0_64, %c0_65, %c0_66] : memref<1x1x8xf32, #tpu.memory_space<vmem>>, vector<1x1x8xf32>
    tpu.vector_store %arg9[%c0_64, %c0_65, %c0_66], %153 {strides = array<i32>} : memref<1x1x8xf32, #tpu.memory_space<vmem>>, vector<1x1x8xf32>,
    %c0_67 = arith.constant 0 : index
    %c0_68 = arith.constant 0 : index
    %c0_69 = arith.constant 0 : index
    %155 = vector.load %arg10[%c0_67, %c0_68, %c0_69] : memref<1x1x8xf32, #tpu.memory_space<vmem>>, vector<1x1x8xf32>
    %156 = arith.mulf %147, %147 : vector<64x8xf32>
    %cst_70 = arith.constant dense<0.000000e+00> : vector<8xf32>
    %157 = vector.multi_reduction <add>, %156, %cst_70 [0] : vector<64x8xf32> to vector<8xf32>
    %158 = vector.shape_cast %157 : vector<8xf32> to vector<1x1x8xf32>
    %159 = arith.addf %155, %158 : vector<1x1x8xf32>
    %c0_71 = arith.constant 0 : index
    %c0_72 = arith.constant 0 : index
    %c0_73 = arith.constant 0 : index
    %160 = vector.load %arg10[%c0_71, %c0_72, %c0_73] : memref<1x1x8xf32, #tpu.memory_space<vmem>>, vector<1x1x8xf32>
    tpu.vector_store %arg10[%c0_71, %c0_72, %c0_73], %159 {strides = array<i32>} : memref<1x1x8xf32, #tpu.memory_space<vmem>>, vector<1x1x8xf32>,
    return
  }
  func.func @transform_0(%arg0: i32, %arg1: i32) -> (i32, i32, i32, i32, i32) {
    %c0_i32 = arith.constant 0 : i32
    %0 = arith.addi %arg1, %c0_i32 : i32
    %c1_i32 = arith.constant 1 : i32
    %1 = arith.subi %0, %c1_i32 : i32
    %c0_i32_0 = arith.constant 0 : i32
    %2 = arith.maxsi %1, %c0_i32_0 : i32
    %c7_i32 = arith.constant 7 : i32
    %3 = arith.minsi %2, %c7_i32 : i32
    %c0_i32_1 = arith.constant 0 : i32
    %c0_i32_2 = arith.constant 0 : i32
    %c0_i32_3 = arith.constant 0 : i32
    %c0_i32_4 = arith.constant 0 : i32
    return %arg0, %3, %c0_i32_1, %c0_i32_2, %c0_i32_3 : i32, i32, i32, i32, i32
  }
  func.func @transform_1(%arg0: i32, %arg1: i32) -> (i32, i32, i32, i32, i32) {
    %c1_i32 = arith.constant 1 : i32
    %0 = arith.addi %arg1, %c1_i32 : i32
    %c1_i32_0 = arith.constant 1 : i32
    %1 = arith.subi %0, %c1_i32_0 : i32
    %c0_i32 = arith.constant 0 : i32
    %2 = arith.maxsi %1, %c0_i32 : i32
    %c7_i32 = arith.constant 7 : i32
    %3 = arith.minsi %2, %c7_i32 : i32
    %c0_i32_1 = arith.constant 0 : i32
    %c0_i32_2 = arith.constant 0 : i32
    %c0_i32_3 = arith.constant 0 : i32
    %c0_i32_4 = arith.constant 0 : i32
    return %arg0, %3, %c0_i32_1, %c0_i32_2, %c0_i32_3 : i32, i32, i32, i32, i32
  }
  func.func @transform_2(%arg0: i32, %arg1: i32) -> (i32, i32, i32, i32, i32) {
    %c2_i32 = arith.constant 2 : i32
    %0 = arith.addi %arg1, %c2_i32 : i32
    %c1_i32 = arith.constant 1 : i32
    %1 = arith.subi %0, %c1_i32 : i32
    %c0_i32 = arith.constant 0 : i32
    %2 = arith.maxsi %1, %c0_i32 : i32
    %c7_i32 = arith.constant 7 : i32
    %3 = arith.minsi %2, %c7_i32 : i32
    %c0_i32_0 = arith.constant 0 : i32
    %c0_i32_1 = arith.constant 0 : i32
    %c0_i32_2 = arith.constant 0 : i32
    %c0_i32_3 = arith.constant 0 : i32
    return %arg0, %3, %c0_i32_0, %c0_i32_1, %c0_i32_2 : i32, i32, i32, i32, i32
  }
  func.func @transform_3(%arg0: i32, %arg1: i32) -> (i32, i32, i32) {
    %c0_i32 = arith.constant 0 : i32
    %c0_i32_0 = arith.constant 0 : i32
    %c0_i32_1 = arith.constant 0 : i32
    %c0_i32_2 = arith.constant 0 : i32
    return %c0_i32, %c0_i32_0, %c0_i32_1 : i32, i32, i32
  }
  func.func @transform_4(%arg0: i32, %arg1: i32) -> (i32, i32) {
    %c0_i32 = arith.constant 0 : i32
    %c0_i32_0 = arith.constant 0 : i32
    %c0_i32_1 = arith.constant 0 : i32
    return %c0_i32, %c0_i32_0 : i32, i32
  }
  func.func @transform_5(%arg0: i32, %arg1: i32) -> (i32, i32) {
    %c0_i32 = arith.constant 0 : i32
    %c0_i32_0 = arith.constant 0 : i32
    %c0_i32_1 = arith.constant 0 : i32
    return %c0_i32, %c0_i32_0 : i32, i32
  }
  func.func @transform_6(%arg0: i32, %arg1: i32) -> (i32, i32, i32, i32, i32) {
    %c0_i32 = arith.constant 0 : i32
    %c0_i32_0 = arith.constant 0 : i32
    %c0_i32_1 = arith.constant 0 : i32
    %c0_i32_2 = arith.constant 0 : i32
    return %arg0, %arg1, %c0_i32, %c0_i32_0, %c0_i32_1 : i32, i32, i32, i32, i32
  }
  func.func @transform_7(%arg0: i32, %arg1: i32) -> (i32, i32, i32) {
    %c0_i32 = arith.constant 0 : i32
    %c0_i32_0 = arith.constant 0 : i32
    %c0_i32_1 = arith.constant 0 : i32
    return %arg0, %c0_i32, %c0_i32_0 : i32, i32, i32
  }
  func.func @transform_8(%arg0: i32, %arg1: i32) -> (i32, i32, i32) {
    %c0_i32 = arith.constant 0 : i32
    %c0_i32_0 = arith.constant 0 : i32
    %c0_i32_1 = arith.constant 0 : i32
    return %arg0, %c0_i32, %c0_i32_0 : i32, i32, i32
  }
}

</mosaic_0001>

<bundles_post_ra>
// kernel: double_conv_forward.5
= control target key start
LH: loop header
LB: loop body
LE: loop exit
PB: predicated region body
PF: predicated region fallthrough
CT: control target
= control target key end

     0   :  { %s612_s12 = smov 0   ;;  %s963_s0 = inlined_call_operand.vmem [shape: f32[2,8,8,8,8], index: 0, kind: input, shape index: {}]   ;;  %s964_s1 = inlined_call_operand.vmem [shape: f32[1,8], index: 1, kind: input, shape index: {}]   ;;  %s965_s2 = inlined_call_operand.vmem [shape: f32[1,8], index: 2, kind: input, shape index: {}]   ;;  %s966_s3 = inlined_call_operand.vmem [shape: f32[2,8,8,8,8], index: 3, kind: output, shape index: {}]  }
   0x1 LB: > { %s561_s13 = sadd.s32 4294967295, %s590_s12   ;;  %p565_p0 = scmp.ge.s32.totalorder %s590_s12, 1  ;;  %s590_s12 = sphi %s612_s12, %s13_s12  }
   0x2   : > { %p137_p1 = scmp.lt.s32.totalorder %s590_s12, 3 }
   0x4   : > { %p138_p2 = pnand %p565_p0, %p137_p1 }
   0x5   : > { %p161_p3 = scmp.lt.s32.totalorder (!%p138_p2), %s561_s13, 1 }
   0x6   : > { %141 = sbr.rel (%p138_p2) target bundleno = 68 (0x44), region = 32 }
   0xb   : > { %s968_s13 = smov (!%p161_p3, %s561_s13), 1  ;;  %v623_v0 = vld [vmem:[%s964_s1] ss:$0 sm:$0xff]  ;;  %vm441_vm0 = vcmask 64512  }
   0xc   : > { %s574_s14 = sshll.u32 %s968_s13, 9  ;;  %v633_v1 = vld [vmem:[%s965_s2] ss:$0 sm:$0xff] }
   0xd   : > { %s628_s19 = scalar_lea.vmem %s963_s0, %s574_s14  ;;  %s656_s24 = scalar_lea.vmem %s966_s3, %s574_s14 }
   0xe   : > { %v171_v2 = vld [vmem:[%s628_s19] sm:$0xff]  ;;  %v172_v3 = vld [vmem:[%s628_s19 + $0x8] sm:$0xff]  ;;  %v173_v4 = vld [vmem:[%s628_s19 + $0x10] sm:$0xff] }
   0xf   : > { %v242_v5 = vmul.f32 %v623_v0, %v171_v2  ;;  %v243_v6 = vmul.f32 %v623_v0, %v172_v3  ;;  %v244_v7 = vmul.f32 %v623_v0, %v173_v4  ;;  %v174_v8 = vld [vmem:[%s628_s19 + $0x18] sm:$0xff]  ;;  %v175_v9 = vld [vmem:[%s628_s19 + $0x20] sm:$0xff]  ;;  %v176_v10 = vld [vmem:[%s628_s19 + $0x28] sm:$0xff] }
  0x10   : > { %v245_v11 = vmul.f32 %v623_v0, %v174_v8  ;;  %v246_v12 = vmul.f32 %v623_v0, %v175_v9  ;;  %v247_v13 = vmul.f32 %v623_v0, %v176_v10  ;;  %v177_v14 = vld [vmem:[%s628_s19 + $0x30] sm:$0xff]  ;;  %v178_v15 = vld [vmem:[%s628_s19 + $0x38] sm:$0xff]  ;;  %v179_v24 = vld [vmem:[%s628_s19 + $0x40] sm:$0xff] }
  0x11   : > { %v313_v16 = vadd.f32 %v633_v1, %v242_v5  ;;  %v314_v17 = vadd.f32 %v633_v1, %v243_v6  ;;  %v315_v18 = vadd.f32 %v633_v1, %v244_v7  ;;  %v248_v19 = vmul.f32 %v623_v0, %v177_v14  ;;  %v180_v25 = vld [vmem:[%s628_s19 + $0x48] sm:$0xff]  ;;  %v181_v26 = vld [vmem:[%s628_s19 + $0x50] sm:$0xff]  ;;  %v182_v31 = vld [vmem:[%s628_s19 + $0x58] sm:$0xff] }
  0x12   : > { %v316_v20 = vadd.f32 %v633_v1, %v245_v11  ;;  %v317_v21 = vadd.f32 %v633_v1, %v246_v12  ;;  %v318_v22 = vadd.f32 %v633_v1, %v247_v13  ;;  %v249_v23 = vmul.f32 %v623_v0, %v178_v15  ;;  %v183_v32 = vld [vmem:[%s628_s19 + $0x60] sm:$0xff]  ;;  %v184_v33 = vld [vmem:[%s628_s19 + $0x68] sm:$0xff]  ;;  %v185_v38 = vld [vmem:[%s628_s19 + $0x70] sm:$0xff] }
  0x13   : > { %v377_v27 = vmax.f32 %v313_v16, 0.0  ;;  %v378_v28 = vmax.f32 %v314_v17, 0.0  ;;  %v379_v29 = vmax.f32 %v315_v18, 0.0  ;;  %v319_v30 = vadd.f32 %v633_v1, %v248_v19  ;;  %v186_v43 = vld [vmem:[%s628_s19 + $0x78] sm:$0xff]  ;;  %v187_v56 = vld [vmem:[%s628_s19 + $0x80] sm:$0xff]  ;;  %v188_v57 = vld [vmem:[%s628_s19 + $0x88] sm:$0xff] }
  0x14   : > { %v380_v34 = vmax.f32 %v316_v20, 0.0  ;;  %v381_v35 = vmax.f32 %v317_v21, 0.0  ;;  %v382_v36 = vmax.f32 %v318_v22, 0.0  ;;  %v320_v37 = vadd.f32 %v633_v1, %v249_v23  ;;  %v189_v58 = vld [vmem:[%s628_s19 + $0x90] sm:$0xff]  ;;  %v190_v63 = vld [vmem:[%s628_s19 + $0x98] sm:$0xff]  ;;  %v191_v2 = vld [vmem:[%s628_s19 + $0xa0] sm:$0xff] }
  0x15   : > { %442 = vst.msk [vmem:[%s656_s24] sm:$0xff] %vm441_vm0, %v377_v27  ;;  %443 = vst.msk [vmem:[%s656_s24 + $0x8] sm:$0xff] %vm441_vm0, %v378_v28  ;;  %v383_v39 = vmax.f32 %v319_v30, 0.0  ;;  %v250_v40 = vmul.f32 %v623_v0, %v179_v24  ;;  %v251_v41 = vmul.f32 %v623_v0, %v180_v25  ;;  %v252_v42 = vmul.f32 %v623_v0, %v181_v26  ;;  %v192_v3 = vld [vmem:[%s628_s19 + $0xa8] sm:$0xff]  ;;  %v193_v8 = vld [vmem:[%s628_s19 + $0xb0] sm:$0xff] }
  0x16   : > { %444 = vst.msk [vmem:[%s656_s24 + $0x10] sm:$0xff] %vm441_vm0, %v379_v29  ;;  %445 = vst.msk [vmem:[%s656_s24 + $0x18] sm:$0xff] %vm441_vm0, %v380_v34  ;;  %v384_v44 = vmax.f32 %v320_v37, 0.0  ;;  %v253_v45 = vmul.f32 %v623_v0, %v182_v31  ;;  %v254_v46 = vmul.f32 %v623_v0, %v183_v32  ;;  %v255_v47 = vmul.f32 %v623_v0, %v184_v33  ;;  %v194_v13 = vld [vmem:[%s628_s19 + $0xb8] sm:$0xff]  ;;  %v195_v26 = vld [vmem:[%s628_s19 + $0xc0] sm:$0xff] }
  0x17   : > { %446 = vst.msk [vmem:[%s656_s24 + $0x20] sm:$0xff] %vm441_vm0, %v381_v35  ;;  %447 = vst.msk [vmem:[%s656_s24 + $0x28] sm:$0xff] %vm441_vm0, %v382_v36  ;;  %v321_v48 = vadd.f32 %v633_v1, %v250_v40  ;;  %v322_v49 = vadd.f32 %v633_v1, %v251_v41  ;;  %v323_v50 = vadd.f32 %v633_v1, %v252_v42  ;;  %v196_v27 = vld [vmem:[%s628_s19 + $0xc8] sm:$0xff]  ;;  %v197_v28 = vld [vmem:[%s628_s19 + $0xd0] sm:$0xff] }
  0x18   : > { %448 = vst.msk [vmem:[%s656_s24 + $0x30] sm:$0xff] %vm441_vm0, %v383_v39  ;;  %v256_v51 = vmul.f32 %v623_v0, %v185_v38  ;;  %449 = vst.msk [vmem:[%s656_s24 + $0x38] sm:$0xff] %vm441_vm0, %v384_v44  ;;  %v324_v52 = vadd.f32 %v633_v1, %v253_v45  ;;  %v325_v53 = vadd.f32 %v633_v1, %v254_v46  ;;  %v198_v33 = vld [vmem:[%s628_s19 + $0xd8] sm:$0xff]  ;;  %v199_v34 = vld [vmem:[%s628_s19 + $0xe0] sm:$0xff] }
  0x19   : > { %v326_v54 = vadd.f32 %v633_v1, %v255_v47  ;;  %v257_v55 = vmul.f32 %v623_v0, %v186_v43  ;;  %v385_v59 = vmax.f32 %v321_v48, 0.0  ;;  %v386_v60 = vmax.f32 %v322_v49, 0.0  ;;  %v200_v35 = vld [vmem:[%s628_s19 + $0xe8] sm:$0xff]  ;;  %v201_v40 = vld [vmem:[%s628_s19 + $0xf0] sm:$0xff]  ;;  %v202_v45 = vld [vmem:[%s628_s19 + $0xf8] sm:$0xff] }
  0x1a   : > { %v387_v61 = vmax.f32 %v323_v50, 0.0  ;;  %v327_v62 = vadd.f32 %v633_v1, %v256_v51  ;;  %v388_v4 = vmax.f32 %v324_v52, 0.0  ;;  %v389_v5 = vmax.f32 %v325_v53, 0.0 }
  0x1b   : > { %v390_v6 = vmax.f32 %v326_v54, 0.0  ;;  %v328_v7 = vadd.f32 %v633_v1, %v257_v55  ;;  %450 = vst.msk [vmem:[%s656_s24 + $0x40] sm:$0xff] %vm441_vm0, %v385_v59  ;;  %451 = vst.msk [vmem:[%s656_s24 + $0x48] sm:$0xff] %vm441_vm0, %v386_v60  ;;  %v258_v10 = vmul.f32 %v623_v0, %v187_v56  ;;  %v259_v11 = vmul.f32 %v623_v0, %v188_v57  ;;  %v204_v59 = vld [vmem:[%s628_s19 + $0x108] sm:$0xff]  ;;  %v205_v60 = vld [vmem:[%s628_s19 + $0x110] sm:$0xff] }
  0x1c   : > { %452 = vst.msk [vmem:[%s656_s24 + $0x50] sm:$0xff] %vm441_vm0, %v387_v61  ;;  %v391_v9 = vmax.f32 %v327_v62, 0.0  ;;  %v260_v12 = vmul.f32 %v623_v0, %v189_v58  ;;  %453 = vst.msk [vmem:[%s656_s24 + $0x58] sm:$0xff] %vm441_vm0, %v388_v4  ;;  %v261_v15 = vmul.f32 %v623_v0, %v190_v63  ;;  %v262_v16 = vmul.f32 %v623_v0, %v191_v2  ;;  %v203_v58 = vld [vmem:[%s628_s19 + $0x100] sm:$0xff] }
  0x1d   : > { %454 = vst.msk [vmem:[%s656_s24 + $0x60] sm:$0xff] %vm441_vm0, %v389_v5  ;;  %455 = vst.msk [vmem:[%s656_s24 + $0x68] sm:$0xff] %vm441_vm0, %v390_v6  ;;  %v392_v14 = vmax.f32 %v328_v7, 0.0  ;;  %v263_v17 = vmul.f32 %v623_v0, %v192_v3  ;;  %v329_v18 = vadd.f32 %v633_v1, %v258_v10  ;;  %v330_v19 = vadd.f32 %v633_v1, %v259_v11  ;;  %v206_v3 = vld [vmem:[%s628_s19 + $0x118] sm:$0xff]  ;;  %v207_v4 = vld [vmem:[%s628_s19 + $0x120] sm:$0xff] }
  0x1e   : > { %456 = vst.msk [vmem:[%s656_s24 + $0x70] sm:$0xff] %vm441_vm0, %v391_v9  ;;  %v331_v20 = vadd.f32 %v633_v1, %v260_v12  ;;  %v264_v21 = vmul.f32 %v623_v0, %v193_v8  ;;  %v332_v22 = vadd.f32 %v633_v1, %v261_v15  ;;  %v333_v23 = vadd.f32 %v633_v1, %v262_v16  ;;  %v208_v5 = vld [vmem:[%s628_s19 + $0x128] sm:$0xff]  ;;  %v209_v10 = vld [vmem:[%s628_s19 + $0x130] sm:$0xff]  ;;  %v210_v15 = vld [vmem:[%s628_s19 + $0x138] sm:$0xff] }
  0x1f   : > { %457 = vst.msk [vmem:[%s656_s24 + $0x78] sm:$0xff] %vm441_vm0, %v392_v14  ;;  %v334_v24 = vadd.f32 %v633_v1, %v263_v17  ;;  %v265_v25 = vmul.f32 %v623_v0, %v194_v13  ;;  %v393_v29 = vmax.f32 %v329_v18, 0.0  ;;  %v394_v30 = vmax.f32 %v330_v19, 0.0 }
  0x20   : > { %v395_v31 = vmax.f32 %v331_v20, 0.0  ;;  %v335_v32 = vadd.f32 %v633_v1, %v264_v21  ;;  %v396_v36 = vmax.f32 %v332_v22, 0.0  ;;  %v397_v37 = vmax.f32 %v333_v23, 0.0 }
  0x21   : > { %v398_v38 = vmax.f32 %v334_v24, 0.0  ;;  %v336_v39 = vadd.f32 %v633_v1, %v265_v25  ;;  %458 = vst.msk [vmem:[%s656_s24 + $0x80] sm:$0xff] %vm441_vm0, %v393_v29  ;;  %459 = vst.msk [vmem:[%s656_s24 + $0x88] sm:$0xff] %vm441_vm0, %v394_v30  ;;  %v266_v42 = vmul.f32 %v623_v0, %v195_v26  ;;  %v267_v43 = vmul.f32 %v623_v0, %v196_v27  ;;  %v212_v29 = vld [vmem:[%s628_s19 + $0x148] sm:$0xff]  ;;  %v213_v30 = vld [vmem:[%s628_s19 + $0x150] sm:$0xff] }
  0x22   : > { %460 = vst.msk [vmem:[%s656_s24 + $0x90] sm:$0xff] %vm441_vm0, %v395_v31  ;;  %v399_v41 = vmax.f32 %v335_v32, 0.0  ;;  %v268_v44 = vmul.f32 %v623_v0, %v197_v28  ;;  %461 = vst.msk [vmem:[%s656_s24 + $0x98] sm:$0xff] %vm441_vm0, %v396_v36  ;;  %v269_v47 = vmul.f32 %v623_v0, %v198_v33  ;;  %v270_v48 = vmul.f32 %v623_v0, %v199_v34  ;;  %v211_v28 = vld [vmem:[%s628_s19 + $0x140] sm:$0xff] }
  0x23   : > { %462 = vst.msk [vmem:[%s656_s24 + $0xa0] sm:$0xff] %vm441_vm0, %v397_v37  ;;  %463 = vst.msk [vmem:[%s656_s24 + $0xa8] sm:$0xff] %vm441_vm0, %v398_v38  ;;  %v400_v46 = vmax.f32 %v336_v39, 0.0  ;;  %v271_v49 = vmul.f32 %v623_v0, %v200_v35  ;;  %v337_v50 = vadd.f32 %v633_v1, %v266_v42  ;;  %v338_v51 = vadd.f32 %v633_v1, %v267_v43  ;;  %v214_v35 = vld [vmem:[%s628_s19 + $0x158] sm:$0xff]  ;;  %v215_v36 = vld [vmem:[%s628_s19 + $0x160] sm:$0xff] }
  0x24   : > { %464 = vst.msk [vmem:[%s656_s24 + $0xb0] sm:$0xff] %vm441_vm0, %v399_v41  ;;  %v339_v52 = vadd.f32 %v633_v1, %v268_v44  ;;  %v272_v53 = vmul.f32 %v623_v0, %v201_v40  ;;  %v340_v54 = vadd.f32 %v633_v1, %v269_v47  ;;  %v341_v55 = vadd.f32 %v633_v1, %v270_v48  ;;  %v216_v37 = vld [vmem:[%s628_s19 + $0x168] sm:$0xff]  ;;  %v217_v42 = vld [vmem:[%s628_s19 + $0x170] sm:$0xff]  ;;  %v218_v47 = vld [vmem:[%s628_s19 + $0x178] sm:$0xff] }
  0x25   : > { %465 = vst.msk [vmem:[%s656_s24 + $0xb8] sm:$0xff] %vm441_vm0, %v400_v46  ;;  %v342_v56 = vadd.f32 %v633_v1, %v271_v49  ;;  %v273_v57 = vmul.f32 %v623_v0, %v202_v45  ;;  %v401_v61 = vmax.f32 %v337_v50, 0.0  ;;  %v402_v62 = vmax.f32 %v338_v51, 0.0 }
  0x26   : > { %v403_v63 = vmax.f32 %v339_v52, 0.0  ;;  %v343_v2 = vadd.f32 %v633_v1, %v272_v53  ;;  %v404_v6 = vmax.f32 %v340_v54, 0.0  ;;  %v405_v7 = vmax.f32 %v341_v55, 0.0 }
  0x27   : > { %v406_v8 = vmax.f32 %v342_v56, 0.0  ;;  %v344_v9 = vadd.f32 %v633_v1, %v273_v57  ;;  %466 = vst.msk [vmem:[%s656_s24 + $0xc0] sm:$0xff] %vm441_vm0, %v401_v61  ;;  %467 = vst.msk [vmem:[%s656_s24 + $0xc8] sm:$0xff] %vm441_vm0, %v402_v62  ;;  %v274_v12 = vmul.f32 %v623_v0, %v203_v58  ;;  %v275_v13 = vmul.f32 %v623_v0, %v204_v59  ;;  %v220_v61 = vld [vmem:[%s628_s19 + $0x188] sm:$0xff]  ;;  %v221_v62 = vld [vmem:[%s628_s19 + $0x190] sm:$0xff] }
  0x28   : > { %468 = vst.msk [vmem:[%s656_s24 + $0xd0] sm:$0xff] %vm441_vm0, %v403_v63  ;;  %v407_v11 = vmax.f32 %v343_v2, 0.0  ;;  %v276_v14 = vmul.f32 %v623_v0, %v205_v60  ;;  %469 = vst.msk [vmem:[%s656_s24 + $0xd8] sm:$0xff] %vm441_vm0, %v404_v6  ;;  %v277_v17 = vmul.f32 %v623_v0, %v206_v3  ;;  %v278_v18 = vmul.f32 %v623_v0, %v207_v4  ;;  %v219_v60 = vld [vmem:[%s628_s19 + $0x180] sm:$0xff] }
  0x29   : > { %470 = vst.msk [vmem:[%s656_s24 + $0xe0] sm:$0xff] %vm441_vm0, %v405_v7  ;;  %471 = vst.msk [vmem:[%s656_s24 + $0xe8] sm:$0xff] %vm441_vm0, %v406_v8  ;;  %v408_v16 = vmax.f32 %v344_v9, 0.0  ;;  %v279_v19 = vmul.f32 %v623_v0, %v208_v5  ;;  %v345_v20 = vadd.f32 %v633_v1, %v274_v12  ;;  %v346_v21 = vadd.f32 %v633_v1, %v275_v13  ;;  %v222_v5 = vld [vmem:[%s628_s19 + $0x198] sm:$0xff]  ;;  %v223_v6 = vld [vmem:[%s628_s19 + $0x1a0] sm:$0xff] }
  0x2a   : > { %472 = vst.msk [vmem:[%s656_s24 + $0xf0] sm:$0xff] %vm441_vm0, %v407_v11  ;;  %v347_v22 = vadd.f32 %v633_v1, %v276_v14  ;;  %v280_v23 = vmul.f32 %v623_v0, %v209_v10  ;;  %v348_v24 = vadd.f32 %v633_v1, %v277_v17  ;;  %v349_v25 = vadd.f32 %v633_v1, %v278_v18  ;;  %v224_v7 = vld [vmem:[%s628_s19 + $0x1a8] sm:$0xff]  ;;  %v225_v12 = vld [vmem:[%s628_s19 + $0x1b0] sm:$0xff]  ;;  %v226_v17 = vld [vmem:[%s628_s19 + $0x1b8] sm:$0xff] }
  0x2b   : > { %473 = vst.msk [vmem:[%s656_s24 + $0xf8] sm:$0xff] %vm441_vm0, %v408_v16  ;;  %v350_v26 = vadd.f32 %v633_v1, %v279_v19  ;;  %v281_v27 = vmul.f32 %v623_v0, %v210_v15  ;;  %v409_v31 = vmax.f32 %v345_v20, 0.0  ;;  %v410_v32 = vmax.f32 %v346_v21, 0.0 }
  0x2c   : > { %v411_v33 = vmax.f32 %v347_v22, 0.0  ;;  %v351_v34 = vadd.f32 %v633_v1, %v280_v23  ;;  %v412_v38 = vmax.f32 %v348_v24, 0.0  ;;  %v413_v39 = vmax.f32 %v349_v25, 0.0 }
  0x2d   : > { %v414_v40 = vmax.f32 %v350_v26, 0.0  ;;  %v352_v41 = vadd.f32 %v633_v1, %v281_v27  ;;  %474 = vst.msk [vmem:[%s656_s24 + $0x100] sm:$0xff] %vm441_vm0, %v409_v31  ;;  %475 = vst.msk [vmem:[%s656_s24 + $0x108] sm:$0xff] %vm441_vm0, %v410_v32  ;;  %v282_v44 = vmul.f32 %v623_v0, %v211_v28  ;;  %v283_v45 = vmul.f32 %v623_v0, %v212_v29  ;;  %v228_v31 = vld [vmem:[%s628_s19 + $0x1c8] sm:$0xff]  ;;  %v229_v32 = vld [vmem:[%s628_s19 + $0x1d0] sm:$0xff] }
  0x2e   : > { %476 = vst.msk [vmem:[%s656_s24 + $0x110] sm:$0xff] %vm441_vm0, %v411_v33  ;;  %v415_v43 = vmax.f32 %v351_v34, 0.0  ;;  %v284_v46 = vmul.f32 %v623_v0, %v213_v30  ;;  %477 = vst.msk [vmem:[%s656_s24 + $0x118] sm:$0xff] %vm441_vm0, %v412_v38  ;;  %v285_v49 = vmul.f32 %v623_v0, %v214_v35  ;;  %v286_v50 = vmul.f32 %v623_v0, %v215_v36  ;;  %v227_v30 = vld [vmem:[%s628_s19 + $0x1c0] sm:$0xff] }
  0x2f   : > { %478 = vst.msk [vmem:[%s656_s24 + $0x120] sm:$0xff] %vm441_vm0, %v413_v39  ;;  %479 = vst.msk [vmem:[%s656_s24 + $0x128] sm:$0xff] %vm441_vm0, %v414_v40  ;;  %v416_v48 = vmax.f32 %v352_v41, 0.0  ;;  %v287_v51 = vmul.f32 %v623_v0, %v216_v37  ;;  %v353_v52 = vadd.f32 %v633_v1, %v282_v44  ;;  %v354_v53 = vadd.f32 %v633_v1, %v283_v45  ;;  %v230_v37 = vld [vmem:[%s628_s19 + $0x1d8] sm:$0xff]  ;;  %v231_v38 = vld [vmem:[%s628_s19 + $0x1e0] sm:$0xff] }
  0x30   : > { %480 = vst.msk [vmem:[%s656_s24 + $0x130] sm:$0xff] %vm441_vm0, %v415_v43  ;;  %v355_v54 = vadd.f32 %v633_v1, %v284_v46  ;;  %v288_v55 = vmul.f32 %v623_v0, %v217_v42  ;;  %v356_v56 = vadd.f32 %v633_v1, %v285_v49  ;;  %v357_v57 = vadd.f32 %v633_v1, %v286_v50  ;;  %v232_v39 = vld [vmem:[%s628_s19 + $0x1e8] sm:$0xff]  ;;  %v233_v44 = vld [vmem:[%s628_s19 + $0x1f0] sm:$0xff]  ;;  %v234_v49 = vld [vmem:[%s628_s19 + $0x1f8] sm:$0xff] }
  0x31   : > { %481 = vst.msk [vmem:[%s656_s24 + $0x138] sm:$0xff] %vm441_vm0, %v416_v48  ;;  %v358_v58 = vadd.f32 %v633_v1, %v287_v51  ;;  %v289_v59 = vmul.f32 %v623_v0, %v218_v47  ;;  %v417_v63 = vmax.f32 %v353_v52, 0.0  ;;  %v418_v2 = vmax.f32 %v354_v53, 0.0 }
  0x32   : > { %v419_v3 = vmax.f32 %v355_v54, 0.0  ;;  %v359_v4 = vadd.f32 %v633_v1, %v288_v55  ;;  %v420_v8 = vmax.f32 %v356_v56, 0.0  ;;  %v421_v9 = vmax.f32 %v357_v57, 0.0 }
  0x33   : > { %v422_v10 = vmax.f32 %v358_v58, 0.0  ;;  %v360_v11 = vadd.f32 %v633_v1, %v289_v59  ;;  %482 = vst.msk [vmem:[%s656_s24 + $0x140] sm:$0xff] %vm441_vm0, %v417_v63  ;;  %483 = vst.msk [vmem:[%s656_s24 + $0x148] sm:$0xff] %vm441_vm0, %v418_v2  ;;  %v290_v14 = vmul.f32 %v623_v0, %v219_v60  ;;  %v291_v15 = vmul.f32 %v623_v0, %v220_v61 }
  0x34   : > { %484 = vst.msk [vmem:[%s656_s24 + $0x150] sm:$0xff] %vm441_vm0, %v419_v3  ;;  %v423_v13 = vmax.f32 %v359_v4, 0.0  ;;  %v292_v16 = vmul.f32 %v623_v0, %v221_v62  ;;  %485 = vst.msk [vmem:[%s656_s24 + $0x158] sm:$0xff] %vm441_vm0, %v420_v8  ;;  %v293_v19 = vmul.f32 %v623_v0, %v222_v5  ;;  %v294_v20 = vmul.f32 %v623_v0, %v223_v6 }
  0x35   : > { %486 = vst.msk [vmem:[%s656_s24 + $0x160] sm:$0xff] %vm441_vm0, %v421_v9  ;;  %487 = vst.msk [vmem:[%s656_s24 + $0x168] sm:$0xff] %vm441_vm0, %v422_v10  ;;  %v424_v18 = vmax.f32 %v360_v11, 0.0  ;;  %v295_v21 = vmul.f32 %v623_v0, %v224_v7  ;;  %v361_v22 = vadd.f32 %v633_v1, %v290_v14  ;;  %v362_v23 = vadd.f32 %v633_v1, %v291_v15 }
  0x36   : > { %488 = vst.msk [vmem:[%s656_s24 + $0x170] sm:$0xff] %vm441_vm0, %v423_v13  ;;  %v363_v24 = vadd.f32 %v633_v1, %v292_v16  ;;  %v296_v25 = vmul.f32 %v623_v0, %v225_v12  ;;  %v364_v26 = vadd.f32 %v633_v1, %v293_v19  ;;  %v365_v27 = vadd.f32 %v633_v1, %v294_v20 }
  0x37   : > { %489 = vst.msk [vmem:[%s656_s24 + $0x178] sm:$0xff] %vm441_vm0, %v424_v18  ;;  %v366_v28 = vadd.f32 %v633_v1, %v295_v21  ;;  %v297_v29 = vmul.f32 %v623_v0, %v226_v17  ;;  %v425_v33 = vmax.f32 %v361_v22, 0.0  ;;  %v426_v34 = vmax.f32 %v362_v23, 0.0 }
  0x38   : > { %v427_v35 = vmax.f32 %v363_v24, 0.0  ;;  %v367_v36 = vadd.f32 %v633_v1, %v296_v25  ;;  %v428_v40 = vmax.f32 %v364_v26, 0.0  ;;  %v429_v41 = vmax.f32 %v365_v27, 0.0 }
  0x39   : > { %v430_v42 = vmax.f32 %v366_v28, 0.0  ;;  %v368_v43 = vadd.f32 %v633_v1, %v297_v29  ;;  %490 = vst.msk [vmem:[%s656_s24 + $0x180] sm:$0xff] %vm441_vm0, %v425_v33  ;;  %491 = vst.msk [vmem:[%s656_s24 + $0x188] sm:$0xff] %vm441_vm0, %v426_v34  ;;  %v298_v46 = vmul.f32 %v623_v0, %v227_v30  ;;  %v299_v47 = vmul.f32 %v623_v0, %v228_v31 }
  0x3a   : > { %492 = vst.msk [vmem:[%s656_s24 + $0x190] sm:$0xff] %vm441_vm0, %v427_v35  ;;  %v431_v45 = vmax.f32 %v367_v36, 0.0  ;;  %v300_v48 = vmul.f32 %v623_v0, %v229_v32  ;;  %493 = vst.msk [vmem:[%s656_s24 + $0x198] sm:$0xff] %vm441_vm0, %v428_v40  ;;  %v301_v51 = vmul.f32 %v623_v0, %v230_v37  ;;  %v302_v52 = vmul.f32 %v623_v0, %v231_v38 }
  0x3b   : > { %494 = vst.msk [vmem:[%s656_s24 + $0x1a0] sm:$0xff] %vm441_vm0, %v429_v41  ;;  %495 = vst.msk [vmem:[%s656_s24 + $0x1a8] sm:$0xff] %vm441_vm0, %v430_v42  ;;  %v432_v50 = vmax.f32 %v368_v43, 0.0  ;;  %v303_v53 = vmul.f32 %v623_v0, %v232_v39  ;;  %v369_v54 = vadd.f32 %v633_v1, %v298_v46  ;;  %v370_v55 = vadd.f32 %v633_v1, %v299_v47 }
  0x3c   : > { %496 = vst.msk [vmem:[%s656_s24 + $0x1b0] sm:$0xff] %vm441_vm0, %v431_v45  ;;  %v371_v56 = vadd.f32 %v633_v1, %v300_v48  ;;  %v304_v57 = vmul.f32 %v623_v0, %v233_v44  ;;  %v372_v58 = vadd.f32 %v633_v1, %v301_v51  ;;  %v373_v59 = vadd.f32 %v633_v1, %v302_v52 }
  0x3d   : > { %497 = vst.msk [vmem:[%s656_s24 + $0x1b8] sm:$0xff] %vm441_vm0, %v432_v50  ;;  %v374_v60 = vadd.f32 %v633_v1, %v303_v53  ;;  %v305_v61 = vmul.f32 %v623_v0, %v234_v49  ;;  %v433_v62 = vmax.f32 %v369_v54, 0.0  ;;  %v434_v63 = vmax.f32 %v370_v55, 0.0 }
  0x3e   : > { %v435_v2 = vmax.f32 %v371_v56, 0.0  ;;  %v375_v3 = vadd.f32 %v633_v1, %v304_v57  ;;  %v436_v4 = vmax.f32 %v372_v58, 0.0  ;;  %v437_v5 = vmax.f32 %v373_v59, 0.0 }
  0x3f   : > { %v438_v6 = vmax.f32 %v374_v60, 0.0  ;;  %v376_v7 = vadd.f32 %v633_v1, %v305_v61  ;;  %498 = vst.msk [vmem:[%s656_s24 + $0x1c0] sm:$0xff] %vm441_vm0, %v433_v62  ;;  %499 = vst.msk [vmem:[%s656_s24 + $0x1c8] sm:$0xff] %vm441_vm0, %v434_v63 }
  0x40   : > { %500 = vst.msk [vmem:[%s656_s24 + $0x1d0] sm:$0xff] %vm441_vm0, %v435_v2  ;;  %v439_v8 = vmax.f32 %v375_v3, 0.0  ;;  %501 = vst.msk [vmem:[%s656_s24 + $0x1d8] sm:$0xff] %vm441_vm0, %v436_v4 }
  0x41   : > { %502 = vst.msk [vmem:[%s656_s24 + $0x1e0] sm:$0xff] %vm441_vm0, %v437_v5  ;;  %503 = vst.msk [vmem:[%s656_s24 + $0x1e8] sm:$0xff] %vm441_vm0, %v438_v6  ;;  %v440_v0 = vmax.f32 %v376_v7, 0.0 }
  0x42   : > { %504 = vst.msk [vmem:[%s656_s24 + $0x1f0] sm:$0xff] %vm441_vm0, %v439_v8 }
  0x43   : > { %505 = vst.msk [vmem:[%s656_s24 + $0x1f8] sm:$0xff] %vm441_vm0, %v440_v0 }
  0x44 PF: > { %s13_s12 = sadd.s32 1, %s590_s12  }
  0x45   : > { %p10_p4 = scmp.ge.s32.totalorder %s13_s12, 4  }
  0x47   :  { %12 = sbr.rel (!%p10_p4) target bundleno = 1 (0x1), region = 62 }

// kernel: double_conv_forward.3
= control target key start
LH: loop header
LB: loop body
LE: loop exit
PB: predicated region body
PF: predicated region fallthrough
CT: control target
= control target key end

     0   :  { %s2667_s21 = smov 0   ;;  %s2669_s22 = smov 0   ;;  %s4043_s0 = inlined_call_operand.vmem [shape: f32[2,8,8,8,4], index: 0, kind: input, shape index: {}, may-alias: {0,1,2}]   ;;  %s4044_s1 = inlined_call_operand.vmem [shape: f32[2,8,8,8,4], index: 1, kind: input, shape index: {}, may-alias: {0,1,2}]   ;;  %s4045_s2 = inlined_call_operand.vmem [shape: f32[2,8,8,8,4], index: 2, kind: input, shape index: {}, may-alias: {0,1,2}]   ;;  %s4046_s3 = inlined_call_operand.vmem [shape: f32[3,36,8], index: 3, kind: input, shape index: {}]   ;;  %s4047_s4 = inlined_call_operand.vmem [shape: f32[2,8,8,8,8], index: 4, kind: output, shape index: {0}]   ;;  %s4048_s5 = inlined_call_operand.vmem [shape: f32[2,1,8], index: 5, kind: output, shape index: {1}]   ;;  %s4049_s6 = inlined_call_operand.vmem [shape: f32[2,1,8], index: 6, kind: output, shape index: {2}]  }
   0x1   :  { %4059 = sst [smem:[#allocation26_spill]] %s4043_s0  ;;  %s2671_s23 = smov 0  }
   0x2   :  { %4060 = sst [smem:[#allocation27_spill]] %s4048_s5  ;;  %s2673_s24 = smov 0  }
   0x3   :  { %4061 = sst [smem:[#allocation28_spill]] %s4049_s6  ;;  %s2675_s25 = smov 0  }
   0x4 LB: > { %s26_s26 = sadd.s32 1, %s2612_s23  ;;  %s29_s27 = sadd.s32 1, %s2616_s24  ;;  %s2620_s25 = sphi %s2675_s25, %s17_s25   ;;  %s2616_s24 = sphi %s2673_s24, %s4119_s24   ;;  %s2612_s23 = sphi %s2671_s23, %s4118_s23   ;;  %s2608_s22 = sphi %s2669_s22, %s4117_s22   ;;  %s2604_s21 = sphi %s2667_s21, %s4116_s21  }
   0x5   : > { %p27_p0 = scmp.ge.s32.totalorder %s26_s26, 8  ;;  %p2328_p1 = scmp.ge.s32.totalorder %s2620_s25, 1 }
   0x6   : > { %p325_p2 = scmp.lt.s32.totalorder %s2620_s25, 17 }
   0x7   : > { %s4121_s26 = smov (%p27_p0, %s26_s26), 0  ;;  %s4123_s27 = smov (!%p27_p0, %s29_s27), %s2616_s24 }
   0x8   : > { %p326_p3 = pnand %p2328_p1, %p325_p2  ;;  %p31_p4 = scmp.ge.s32.totalorder %s4123_s27, 2 }
   0xa   : > { %s4125_s27 = smov (%p31_p4, %s4123_s27), 0  ;;  %329 = sbr.rel (%p326_p3) target bundleno = 760 (0x2f8), region = 36 }
   0xb   : > { %4062 = sst [smem:[#allocation2_spill]] %s4125_s27 }
   0xf   : > { %s2700_s28 = sadd.s32 4294967295, %s2604_s21  ;;  %p406_p5 = scmp.lt.s32.totalorder %s2608_s22, 1 }
  0x10   : > { %p402_p6 = scmp.gt.s32.totalorder %s2700_s28, 0  ;;  %p2329_p7 = scmp.lt.s32.totalorder %s2700_s28, 7 }
  0x11   : > { %s4127_s22 = smov (!%p406_p5, %s2608_s22), 1  ;;  %p420_p8 = scmp.gt.s32.totalorder %s2604_s21, 0 }
  0x12   : > { %s403_s29 = scalar_select %p402_p6, %s2700_s28, 0 }
  0x13   : > { %s2705_s30 = sshll.u32 %s4127_s22, 6  ;;  %p2337_p10 = scmp.lt.s32.totalorder %s2604_s21, 7 }
  0x14   : > { %s4129_s29 = smov (!%p2329_p7, %s403_s29), 7  ;;  %s2711_s8 = sadd.s32 1, %s2604_s21 }
  0x15   : > { %s421_s7 = scalar_select %p420_p8, %s2604_s21, 0 }
  0x16   : > { %p408_p9 = scmp.lt.s32.totalorder %s4129_s29, 7  ;;  %s4063_s5 = sld [smem:[#allocation27_spill]] }
  0x17   : > { %s4133_s7 = smov (!%p2337_p10, %s421_s7), 7  ;;  %p438_p11 = scmp.gt.s32.totalorder %s2711_s8, 0 }
  0x18   : > { %s4131_s29 = smov (!%p408_p9, %s4129_s29), 7  ;;  %p426_p12 = scmp.lt.s32.totalorder %s4133_s7, 7 }
  0x19   : > { %s2334_s12 = sshll.u32 %s4131_s29, 3  ;;  %s4064_s0 = sld [smem:[#allocation26_spill]] }
  0x1a   : > { %s412_s13 = sadd.s32 %s2705_s30, %s2334_s12  ;;  %s4065_s6 = sld [smem:[#allocation28_spill]] }
  0x1b   : > { %s2336_s14 = sshll.u32 %s412_s13, 3  ;;  %s4135_s7 = smov (!%p426_p12, %s4133_s7), 7 }
  0x1c   : > { %s2716_s11 = scalar_lea.vmem %s4063_s5, %s4127_s22  ;;  %s2342_s10 = sshll.u32 %s4135_s7, 3 }
  0x1d   : > { %s439_s9 = scalar_select %p438_p11, %s2711_s8, 0 }
  0x1e   : > { %p2345_p13 = scmp.lt.s32.totalorder %s2711_s8, 7  ;;  %s430_s29 = sadd.s32 %s2342_s10, %s2705_s30 }
  0x1f   : > { %s2725_s17 = scalar_lea.vmem %s4064_s0, %s2336_s14  ;;  %s2344_s12 = sshll.u32 %s430_s29, 3 }
  0x20   : > { %s2730_s20 = scalar_lea.vmem %s4065_s6, %s4127_s22  ;;  %s2738_s13 = scalar_lea.vmem %s4044_s1, %s2344_s12 }
  0x21   : > { %s4137_s9 = smov (!%p2345_p13, %s439_s9), 7  ;;  %p2356_p1 = scmp.ne.s32.totalorder %s2604_s21, 0 }
  0x22   : > { %s459_s14 = scalar_select %p2337_p10, %s2604_s21, 7 }
  0x23   : > { %p444_p0 = scmp.lt.s32.totalorder %s4137_s9, 7 }
  0x24   : > { %s2353_s15 = sshll.u32 %s459_s14, 3 }
  0x25   : > { %s4139_s9 = smov (!%p444_p0, %s4137_s9), 7  ;;  %s462_s22 = sadd.s32 %s2353_s15, %s2705_s30 }
  0x26   : > { %s2350_s16 = sshll.u32 %s4139_s9, 3  ;;  %s2355_s18 = sshll.u32 %s462_s22, 3 }
  0x27   : > { %s448_s19 = sadd.s32 %s2350_s16, %s2705_s30  ;;  %s2748_s10 = scalar_lea.vmem %s4047_s4, %s2355_s18 }
  0x28   : > { %s2352_s29 = sshll.u32 %s448_s19, 3  ;;  %474 = sbr.rel (%p2356_p1) target bundleno = 47 (0x2f), region = 40 }
  0x29   : > { %s2753_s27 = scalar_lea.vmem %s4045_s2, %s2352_s29 }
  0x2d   : > { %vm475_vm0 = vcmask 57344   ;;  %v2622_v0 = vmov 0.0  }
  0x2e   : > { %476 = vst.msk [vmem:[%s2716_s11] sm:$0x1] %vm475_vm0, %v2622_v0  ;;  %477 = vst.msk [vmem:[%s2730_s20] sm:$0x1] %vm475_vm0, %v2622_v0 }
  0x2f PF: > { %vm529_vm1 = vcmask 1040384   ;;  %v2623_v1 = vmov 0.0   ;;  %p487_p2 = scmp.ge.s32.totalorder %s2700_s28, 0  ;;  %p488_p3 = scmp.lt.s32.totalorder %s2700_s28, 8  ;;  %vm564_vm2 = vcmask 1046528   ;;  %vm589_vm3 = vcmask 1045504  }
  0x30   : > { %v511_v2 = vrot.slane %v2623_v1, 7  ;;  %v479_v10 = vld [vmem:[%s2725_s17 + $0x8] sm:$0xff]  ;;  %s2624_s6 = smov 4   ;;  %v478_v11 = vld [vmem:[%s2725_s17] sm:$0xff]  ;;  %v480_v12 = vld [vmem:[%s2725_s17 + $0x10] sm:$0xff]  ;;  %s2625_s30 = smov 8  }
  0x31   : > { %p489_p4 = pnand %p488_p3, %p487_p2  ;;  %v481_v13 = vld [vmem:[%s2725_s17 + $0x18] sm:$0xff]  ;;  %v482_v15 = vld [vmem:[%s2725_s17 + $0x20] sm:$0xff]  ;;  %v483_v16 = vld [vmem:[%s2725_s17 + $0x28] sm:$0xff]  ;;  %p899_p5 = scmp.ge.s32.totalorder %s2604_s21, 0  ;;  %vm1288_vm4 = vcmask 1043456   ;;  %vm814_vm5 = vcmask 31744  }
  0x32   : > { %v2761_v3 = vsel %vm529_vm1, 0.0, %v511_v2  ;;  %v539_v4 = vsel %vm529_vm1, %v511_v2, 0.0  ;;  %v484_v17 = vld [vmem:[%s2725_s17 + $0x30] sm:$0xff]  ;;  %p900_p6 = scmp.lt.s32.totalorder %s2604_s21, 8  ;;  %s2626_s14 = smov 12   ;;  %vm823_vm6 = vcmask 64512  }
  0x33   : > { %v565_v5 = vrot.slane %v2761_v3, 1  ;;  %v566_v6 = vrot.slane %v539_v4, 1  ;;  %v590_v7 = vrot.slane %v2761_v3, 2  ;;  %v591_v8 = vrot.slane %v539_v4, 2  ;;  %s2357_s0 = scalar_select %p489_p4, 0, 1 }
  0x34   : > { %p2868_p7 = pnand %p900_p6, %p899_p5  ;;  %s2628_s15 = smov 20   ;;  %vm832_vm7 = vcmask 97280   ;;  %vm850_vm8 = vcmask 162816   ;;  %vm841_vm9 = vcmask 130048   ;;  %vm859_vm10 = vcmask 195584  }
  0x35   : > { %v2767_v9 = vsel %vm564_vm2, %v565_v5, %v566_v6  ;;  %s492_s28 = scvt.s32.f32 %s2357_s0  ;;  %v2776_v14 = vsel %vm589_vm3, %v590_v7, %v591_v8  ;;  %s2629_s22 = smov 24   ;;  %vm868_vm11 = vcmask 228352   ;;  %vm877_vm12 = vcmask 261120  }
  0x36   : > { %622 = vrot.lane.b32.xlu0 %v2767_v9, %s2624_s6  ;;  %s2358_s9 = scalar_select %p2868_p7, 0, 1  ;;  %vm1263_vm13 = vcmask 293888   ;;  %vm2073_vm14 = vcmask 57344  }
  0x37   : > { %v2781_v18 = vstv %s492_s28  ;;  %s2630_s21 = smov 28   ;;  %s2631_s16 = smov 32  }
  0x38   : > { %v495_v19 = vmul.f32 %v2781_v18, %v479_v10  ;;  %v494_v20 = vmul.f32 %v2781_v18, %v478_v11  ;;  %v496_v21 = vmul.f32 %v2781_v18, %v480_v12  ;;  %v497_v22 = vmul.f32 %v2781_v18, %v481_v13  ;;  %s904_s12 = scvt.s32.f32 %s2358_s9  ;;  %p1538_p8 = scmp.ge.s32.totalorder %s2711_s8, 0 }
  0x39   : > { %v498_v23 = vmul.f32 %v2781_v18, %v482_v15  ;;  %v499_v24 = vmul.f32 %v2781_v18, %v483_v16  ;;  %v500_v25 = vmul.f32 %v2781_v18, %v484_v17  ;;  %p1539_p9 = scmp.lt.s32.totalorder %s2711_s8, 8 }
  0x3a   : > { %646 = vrot.lane.b32.xlu0 %v2776_v14, %s2625_s30  ;;  %v513_v26 = vrot.slane %v495_v19, 7  ;;  %v512_v27 = vrot.slane %v494_v20, 7  ;;  %v514_v28 = vrot.slane %v496_v21, 7  ;;  %v515_v29 = vrot.slane %v497_v22, 7 }
  0x3b   : > { %v516_v30 = vrot.slane %v498_v23, 7  ;;  %v517_v31 = vrot.slane %v499_v24, 7  ;;  %v518_v32 = vrot.slane %v500_v25, 7  ;;  %p3166_p10 = pnand %p1539_p9, %p1538_p8 }
  0x3c   : > { %v2793_v33 = vsel %vm529_vm1, 0.0, %v513_v26  ;;  %v541_v34 = vsel %vm529_vm1, %v513_v26, 0.0  ;;  %v2797_v35 = vsel %vm529_vm1, 0.0, %v512_v27  ;;  %v540_v36 = vsel %vm529_vm1, %v512_v27, 0.0 }
  0x3d   : > { %v571_v37 = vrot.slane %v2793_v33, 1  ;;  %v572_v38 = vrot.slane %v541_v34, 1  ;;  %v568_v39 = vrot.slane %v2797_v35, 1  ;;  %v569_v40 = vrot.slane %v540_v36, 1  ;;  %s2382_s18 = scalar_select %p3166_p10, 0, 1 }
  0x3e   : > { %v2803_v41 = vsel %vm529_vm1, 0.0, %v514_v28  ;;  %v542_v42 = vsel %vm529_vm1, %v514_v28, 0.0  ;;  %v2807_v43 = vsel %vm529_vm1, 0.0, %v515_v29  ;;  %v543_v44 = vsel %vm529_vm1, %v515_v29, 0.0  ;;  %v891_v28 = vld [vmem:[%s2738_s13] sm:$0xff] }
  0x3f   : > { %4066 = vst [vmem:[#allocation3_spill] sm:$0xff] %v2803_v41  ;;  %4067 = vst [vmem:[#allocation4_spill] sm:$0xff] %v2807_v43  ;;  %v2811_v45 = vsel %vm564_vm2, %v571_v37, %v572_v38  ;;  %v2814_v46 = vsel %vm564_vm2, %v568_v39, %v569_v40  ;;  %v574_v47 = vrot.slane %v2803_v41, 1  ;;  %v575_v48 = vrot.slane %v542_v42, 1  ;;  %v892_v39 = vld [vmem:[%s2738_s13 + $0x8] sm:$0xff]  ;;  %s1543_s19 = scvt.s32.f32 %s2382_s18 }
  0x40   : > { %626 = vrot.lane.b32.xlu1 %v2811_v45, %s2624_s6  ;;  %624 = vrot.lane.b32.xlu0 %v2814_v46, %s2624_s6  ;;  %v577_v49 = vrot.slane %v2807_v43, 1  ;;  %v578_v50 = vrot.slane %v543_v44, 1  ;;  %v2823_v51 = vsel %vm529_vm1, 0.0, %v516_v30  ;;  %v544_v52 = vsel %vm529_vm1, %v516_v30, 0.0 }
  0x41   : > { %4068 = vst [vmem:[#allocation5_spill] sm:$0xff] %v2823_v51  ;;  %v2827_v53 = vsel %vm564_vm2, %v574_v47, %v575_v48  ;;  %v580_v54 = vrot.slane %v2823_v51, 1  ;;  %v581_v55 = vrot.slane %v544_v52, 1  ;;  %v2831_v56 = vsel %vm529_vm1, 0.0, %v517_v31  ;;  %v893_v47 = vld [vmem:[%s2738_s13 + $0x10] sm:$0xff] }
  0x42   : > { %4069 = vst [vmem:[#allocation6_spill] sm:$0xff] %v2831_v56  ;;  %v2834_v57 = vsel %vm564_vm2, %v577_v49, %v578_v50  ;;  %v545_v58 = vsel %vm529_vm1, %v517_v31, 0.0  ;;  %v583_v59 = vrot.slane %v2831_v56, 1  ;;  %v2839_v60 = vsel %vm529_vm1, 0.0, %v518_v32 }
  0x43   : > { %4070 = vst [vmem:[#allocation7_spill] sm:$0xff] %v2839_v60  ;;  %v584_v61 = vrot.slane %v545_v58, 1  ;;  %v546_v62 = vsel %vm529_vm1, %v518_v32, 0.0  ;;  %v2847_v63 = vsel %vm564_vm2, %v580_v54, %v581_v55  ;;  %v586_v0 = vrot.slane %v2839_v60, 1  ;;  %v485_v32 = vld [vmem:[%s2725_s17 + $0x38] sm:$0xff]  ;;  %s2627_s17 = smov 16  }
  0x44   : > { %628 = vrot.lane.b32.xlu1 %v2827_v53, %s2624_s6  ;;  %630 = vrot.lane.b32.xlu0 %v2834_v57, %s2624_s6  ;;  %v587_v2 = vrot.slane %v546_v62, 1  ;;  %v596_v4 = vrot.slane %v2793_v33, 2  ;;  %v597_v5 = vrot.slane %v541_v34, 2  ;;  %v593_v6 = vrot.slane %v2797_v35, 2 }
  0x45   : > { %v2851_v1 = vsel %vm564_vm2, %v583_v59, %v584_v61  ;;  %v594_v7 = vrot.slane %v540_v36, 2  ;;  %v602_v11 = vrot.slane %v2807_v43, 2  ;;  %v603_v12 = vrot.slane %v543_v44, 2 }
  0x46   : > { %v2862_v8 = vsel %vm564_vm2, %v586_v0, %v587_v2  ;;  %v2865_v10 = vsel %vm589_vm3, %v596_v4, %v597_v5  ;;  %v599_v13 = vrot.slane %v2803_v41, 2  ;;  %v600_v15 = vrot.slane %v542_v42, 2 }
  0x47   : > { %v2878_v16 = vsel %vm589_vm3, %v593_v6, %v594_v7  ;;  %v2881_v17 = vsel %vm589_vm3, %v602_v11, %v603_v12  ;;  %v608_v19 = vrot.slane %v2831_v56, 2  ;;  %v609_v20 = vrot.slane %v545_v58, 2 }
  0x48   : > { %632 = vrot.lane.b32.xlu1 %v2847_v63, %s2624_s6  ;;  %634 = vrot.lane.b32.xlu0 %v2851_v1, %s2624_s6  ;;  %v2891_v21 = vsel %vm589_vm3, %v599_v13, %v600_v15  ;;  %v605_v23 = vrot.slane %v2823_v51, 2  ;;  %v606_v24 = vrot.slane %v544_v52, 2  ;;  %v611_v26 = vrot.slane %v2839_v60, 2 }
  0x49   : > { %v2894_v22 = vsel %vm589_vm3, %v608_v19, %v609_v20  ;;  %v612_v27 = vrot.slane %v546_v62, 2  ;;  %v2906_v29 = vstv %s904_s12  ;;  %v2926_v36 = vmul.f32 %v2781_v18, %v485_v32 }
  0x4a   : > { %v2902_v25 = vsel %vm589_vm3, %v605_v23, %v606_v24  ;;  %v906_v31 = vmul.f32 %v2906_v29, %v891_v28  ;;  %v907_v18 = vmul.f32 %v2906_v29, %v892_v39  ;;  %v908_v52 = vmul.f32 %v2906_v29, %v893_v47  ;;  %v894_v23 = vld [vmem:[%s2738_s13 + $0x18] sm:$0xff]  ;;  %v895_v28 = vld [vmem:[%s2738_s13 + $0x20] sm:$0xff] }
  0x4b   : > { %v2913_v30 = vsel %vm589_vm3, %v611_v26, %v612_v27  ;;  %v4050_v40 = vrot.slane %v2926_v36, 7  ;;  %v909_v26 = vmul.f32 %v2906_v29, %v894_v23  ;;  %v2362_v39 = vld [vmem:[%s4046_s3 + $0x40] sm:$0xff] }
  0x4c   : > { %636 = vrot.lane.b32.xlu1 %v2862_v8, %s2624_s6  ;;  %650 = vrot.lane.b32.xlu0 %v2865_v10, %s2625_s30  ;;  %v922_v34 = vrot.slane %v906_v31, 7  ;;  %v923_v50 = vrot.slane %v907_v18, 7  ;;  %v924_v59 = vrot.slane %v908_v52, 7  ;;  %v2363_v31 = vld [vmem:[%s4046_s3 + $0x48] sm:$0xf]  ;;  %v2361_v18 = vld [vmem:[%s4046_s3 + $0x38] sm:$0xff] }
  0x4d   : > { %v2948_v48 = vsel %vm529_vm1, 0.0, %v4050_v40  ;;  %v925_v27 = vrot.slane %v909_v26, 7  ;;  %2456 = vmatprep.subr.msk.mxu0 %vm1288_vm4, %v2363_v31 }
  0x4e   : > { %v2929_v37 = vsel %vm529_vm1, 0.0, %v922_v34  ;;  %v946_v38 = vsel %vm529_vm1, %v922_v34, 0.0  ;;  %v947_v58 = vsel %vm529_vm1, %v923_v50, 0.0  ;;  %v2967_v2 = vsel %vm529_vm1, 0.0, %v924_v59  ;;  %2457 = vmatpush3.msk.msra.mxu0 %vm1288_vm4, %v2363_v31  ;;  %v897_v31 = vld [vmem:[%s2738_s13 + $0x30] sm:$0xff] }
  0x4f   : > { %v968_v42 = vrot.slane %v2929_v37, 1  ;;  %v969_v44 = vrot.slane %v946_v38, 1  ;;  %v989_v54 = vrot.slane %v2929_v37, 2  ;;  %v990_v55 = vrot.slane %v946_v38, 2  ;;  %2458 = vmatprep.subr.mxu0 %v2362_v39 }
  0x50   : > { %648 = vrot.lane.b32.xlu1 %v2878_v16, %s2625_s30  ;;  %654 = vrot.lane.b32.xlu0 %v2881_v17, %s2625_s30  ;;  %v972_v0 = vrot.slane %v947_v58, 1  ;;  %v948_v4 = vsel %vm529_vm1, %v924_v59, 0.0  ;;  %v974_v6 = vrot.slane %v2967_v2, 1  ;;  %v993_v13 = vrot.slane %v947_v58, 2 }
  0x51   : > { %v970_v49 = vsel %vm564_vm2, %v968_v42, %v969_v44  ;;  %v991_v61 = vsel %vm589_vm3, %v989_v54, %v990_v55  ;;  %v975_v7 = vrot.slane %v948_v4, 1  ;;  %v995_v19 = vrot.slane %v2967_v2, 2  ;;  %2459 = vmatpush3.msra.mxu0 %v2362_v39  ;;  %v2359_v55 = vld [vmem:[%s4046_s3 + $0x28] sm:$0xff] }
  0x52   : > { %v996_v20 = vrot.slane %v948_v4, 2  ;;  %v2999_v32 = vsel %vm529_vm1, 0.0, %v925_v27  ;;  %v949_v34 = vsel %vm529_vm1, %v925_v27, 0.0  ;;  %v910_v38 = vmul.f32 %v2906_v29, %v895_v28  ;;  %2460 = vmatprep.subr.mxu0 %v2361_v18 }
  0x53   : > { %v976_v11 = vsel %vm564_vm2, %v974_v6, %v975_v7  ;;  %v977_v42 = vrot.slane %v2999_v32, 1  ;;  %v978_v44 = vrot.slane %v949_v34, 1  ;;  %2461 = vmatpush3.msra.mxu0 %v2361_v18  ;;  %v896_v7 = vld [vmem:[%s2738_s13 + $0x28] sm:$0xff] }
  0x54   : > { %652 = vrot.lane.b32.xlu1 %v2891_v21, %s2625_s30  ;;  %658 = vrot.lane.b32.xlu0 %v2894_v22, %s2625_s30  ;;  %v997_v24 = vsel %vm589_vm3, %v995_v19, %v996_v20  ;;  %v926_v47 = vrot.slane %v910_v38, 7 }
  0x56   : > { %v3023_v52 = vsel %vm529_vm1, 0.0, %v926_v47  ;;  %v950_v54 = vsel %vm529_vm1, %v926_v47, 0.0 }
  0x57   : > { %v980_v58 = vrot.slane %v3023_v52, 1  ;;  %v981_v59 = vrot.slane %v950_v54, 1  ;;  %v1002_v6 = vrot.slane %v950_v54, 2 }
  0x58   : > { %656 = vrot.lane.b32.xlu1 %v2902_v25, %s2625_s30  ;;  %670 = vrot.lane.b32.xlu0 %v2797_v35, %s2626_s14 }
  0x5c   : > { %660 = vrot.lane.b32.xlu1 %v2913_v30, %s2625_s30  ;;  %674 = vrot.lane.b32.xlu0 %v2803_v41, %s2626_s14 }
  0x60   : > { %672 = vrot.lane.b32.xlu1 %v2793_v33, %s2626_s14  ;;  %678 = vrot.lane.b32.xlu0 %v2823_v51, %s2626_s14 }
  0x64   : > { %676 = vrot.lane.b32.xlu1 %v2807_v43, %s2626_s14  ;;  %682 = vrot.lane.b32.xlu0 %v2839_v60, %s2626_s14 }
  0x68   : > { %680 = vrot.lane.b32.xlu1 %v2831_v56, %s2626_s14  ;;  %694 = vrot.lane.b32.xlu0 %v2814_v46, %s2627_s17  ;;  %v2957_v46 = vsel %vm529_vm1, 0.0, %v923_v50  ;;  %v979_v50 = vsel %vm564_vm2, %v977_v42, %v978_v44  ;;  %v912_v42 = vmul.f32 %v2906_v29, %v897_v31  ;;  %v898_v31 = vld [vmem:[%s2738_s13 + $0x38] sm:$0xff] }
  0x69   : > { %v971_v62 = vrot.slane %v2957_v46, 1  ;;  %v992_v12 = vrot.slane %v2957_v46, 2 }
  0x6a   : > { %v928_v47 = vrot.slane %v912_v42, 7  ;;  %v890_v42 = vld [vmem:[%s4046_s3 + $0x20] sm:$0xf] }
  0x6b   : > { %v973_v5 = vsel %vm564_vm2, %v971_v62, %v972_v0  ;;  %v994_v15 = vsel %vm589_vm3, %v992_v12, %v993_v13  ;;  %v998_v62 = vrot.slane %v2999_v32, 2  ;;  %v999_v0 = vrot.slane %v949_v34, 2  ;;  %2478 = vmatprep.subr.msk.mxu1 %vm1288_vm4, %v890_v42 }
  0x6c   : > { %684 = vrot.lane.b32.xlu1 %v2948_v48, %s2626_s14  ;;  %1018 = vrot.lane.b32.xlu0 %v970_v49, %s2624_s6  ;;  %v911_v12 = vmul.f32 %v2906_v29, %v896_v7 }
  0x6d   : > { %v1000_v4 = vsel %vm589_vm3, %v998_v62, %v999_v0  ;;  %2479 = vmatpush3.msk.msra.mxu1 %vm1288_vm4, %v890_v42 }
  0x6e   : > { %v927_v13 = vrot.slane %v911_v12, 7 }
  0x70   : > { %696 = vrot.lane.b32.xlu1 %v2811_v45, %s2627_s17  ;;  %1060 = vrot.lane.b32.xlu0 %v2929_v37, %s2626_s14  ;;  %v3054_v19 = vsel %vm529_vm1, 0.0, %v927_v13  ;;  %v951_v23 = vsel %vm529_vm1, %v927_v13, 0.0 }
  0x71   : > { %v984_v26 = vrot.slane %v951_v23, 1 }
  0x74   : > { %1039 = vrot.lane.b32.xlu1 %v991_v61, %s2625_s30  ;;  %1084 = vrot.lane.b32.xlu0 %v970_v49, %s2627_s17  ;;  %v2360_v49 = vld [vmem:[%s4046_s3 + $0x30] sm:$0xff] }
  0x75   : > { %2462 = vmatprep.subr.mxu0 %v2360_v49 }
  0x76   : > { %2463 = vmatpush3.msra.mxu0 %v2360_v49  ;;  %v1005_v49 = vrot.slane %v951_v23, 2 }
  0x77   : > { %2464 = vmatprep.subr.mxu0 %v2359_v55 }
  0x78   : > { %1062 = vrot.lane.b32.xlu1 %v2957_v46, %s2626_s14  ;;  %1086 = vrot.lane.b32.xlu0 %v973_v5, %s2627_s17 }
  0x79   : > { %2465 = vmatpush3.msra.mxu0 %v2359_v55  ;;  %v3094_v55 = vsel %vm529_vm1, 0.0, %v928_v47 }
  0x7a   : > { %4077 = vst [vmem:[#allocation13_spill] sm:$0xff] %v3094_v55  ;;  %v1007_v13 = vrot.slane %v3094_v55, 2 }
  0x7c   : > { %1020 = vrot.lane.b32.xlu1 %v973_v5, %s2624_s6  ;;  %1022 = vrot.lane.b32.xlu0 %v976_v11, %s2624_s6 }
  0x80   : > { %1108 = vrot.lane.b32.xlu1 %v991_v61, %s2628_s15  ;;  %1110 = vrot.lane.b32.xlu0 %v994_v15, %s2628_s15  ;;  %v982_v61 = vsel %vm564_vm2, %v980_v58, %v981_v59  ;;  %v952_v58 = vsel %vm529_vm1, %v928_v47, 0.0  ;;  %v913_v47 = vmul.f32 %v2906_v29, %v898_v31 }
  0x81   : > { %v987_v62 = vrot.slane %v952_v58, 1  ;;  %v1008_v23 = vrot.slane %v952_v58, 2  ;;  %v889_v58 = vld [vmem:[%s4046_s3 + $0x18] sm:$0xff] }
  0x82   : > { %v929_v29 = vrot.slane %v913_v47, 7  ;;  %2480 = vmatprep.subr.mxu1 %v889_v58  ;;  %v886_v47 = vld [vmem:[%s4046_s3] sm:$0xff] }
  0x83   : > { %2481 = vmatpush3.msra.mxu1 %v889_v58 }
  0x84   : > { %1041 = vrot.lane.b32.xlu1 %v994_v15, %s2625_s30  ;;  %1043 = vrot.lane.b32.xlu0 %v997_v24, %s2625_s30 }
  0x88   : > { %1132 = vrot.lane.b32.xlu1 %v2957_v46, %s2629_s22  ;;  %1134 = vrot.lane.b32.xlu0 %v2967_v2, %s2629_s22 }
  0x8c   : > { %1064 = vrot.lane.b32.xlu1 %v2967_v2, %s2626_s14  ;;  %1066 = vrot.lane.b32.xlu0 %v2999_v32, %s2626_s14 }
  0x90   : > { %1153 = vrot.lane.b32.xlu1 %v973_v5, %s2630_s21  ;;  %1155 = vrot.lane.b32.xlu0 %v976_v11, %s2630_s21  ;;  %v1001_v5 = vrot.slane %v3023_v52, 2 }
  0x94   : > { %1088 = vrot.lane.b32.xlu1 %v976_v11, %s2627_s17  ;;  %1024 = vrot.lane.b32.xlu0 %v979_v50, %s2624_s6  ;;  %v1003_v11 = vsel %vm589_vm3, %v1001_v5, %v1002_v6 }
  0x98   : > { %1174 = vrot.lane.b32.xlu1 %v994_v15, %s2631_s16  ;;  %1112 = vrot.lane.b32.xlu0 %v997_v24, %s2628_s15 }
  0x9c   : > { %1090 = vrot.lane.b32.xlu1 %v979_v50, %s2627_s17  ;;  %1026 = vrot.lane.b32.xlu0 %v982_v61, %s2624_s6 }
  0xa0   : > { %1176 = vrot.lane.b32.xlu1 %v997_v24, %s2631_s16  ;;  %1114 = vrot.lane.b32.xlu0 %v1000_v4, %s2628_s15  ;;  %v983_v24 = vrot.slane %v3054_v19, 1 }
  0xa2   : > { %v985_v34 = vsel %vm564_vm2, %v983_v24, %v984_v26 }
  0xa4   : > { %1045 = vrot.lane.b32.xlu1 %v1000_v4, %s2625_s30  ;;  %1047 = vrot.lane.b32.xlu0 %v1003_v11, %s2625_s30 }
  0xa8   : > { %v3047_v15 = vpop.permute.xlu0 %622  ;;  %1136 = vrot.lane.b32.xlu1 %v2999_v32, %s2629_s22  ;;  %1138 = vrot.lane.b32.xlu0 %v3023_v52, %s2629_s22 }
  0xac   : > { %1068 = vrot.lane.b32.xlu1 %v3023_v52, %s2626_s14  ;;  %1070 = vrot.lane.b32.xlu0 %v3054_v19, %s2626_s14  ;;  %v3060_v20 = vpop.permute.xlu0 %646 }
  0xb0   : > { %1157 = vrot.lane.b32.xlu1 %v979_v50, %s2630_s21  ;;  %1159 = vrot.lane.b32.xlu0 %v982_v61, %s2630_s21 }
  0xb2   : > { %v3066_v27 = vpop.permute.xlu1 %626  ;;  %v3068_v28 = vpop.permute.xlu0 %624 }
  0xb4   : > { %1092 = vrot.lane.b32.xlu1 %v982_v61, %s2627_s17  ;;  %718 = vrot.lane.b32.xlu0 %v2878_v16, %s2628_s15  ;;  %v1004_v16 = vrot.slane %v3054_v19, 2  ;;  %v986_v61 = vrot.slane %v3094_v55, 1 }
  0xb6   : > { %v3075_v38 = vpop.permute.xlu1 %628  ;;  %v3077_v39 = vpop.permute.xlu0 %630  ;;  %v3101_v59 = vsel %vm589_vm3, %v1004_v16, %v1005_v49  ;;  %v988_v5 = vsel %vm564_vm2, %v986_v61, %v987_v62  ;;  %v888_v61 = vld [vmem:[%s4046_s3 + $0x10] sm:$0xff] }
  0xb7   : > { %4072 = vst [vmem:[#allocation8_spill] sm:$0xff] %v3075_v38  ;;  %4073 = vst [vmem:[#allocation9_spill] sm:$0xff] %v3077_v39  ;;  %2482 = vmatprep.subr.mxu1 %v888_v61 }
  0xb8   : > { %1178 = vrot.lane.b32.xlu1 %v1000_v4, %s2631_s16  ;;  %1094 = vrot.lane.b32.xlu0 %v985_v34, %s2627_s17 }
  0xb9   : > { %2483 = vmatpush3.msra.mxu1 %v888_v61 }
  0xba   : > { %v3082_v44 = vpop.permute.xlu1 %632  ;;  %v3084_v18 = vpop.permute.xlu0 %634 }
  0xbb   : > { %4074 = vst [vmem:[#allocation10_spill] sm:$0xff] %v3082_v44  ;;  %4075 = vst [vmem:[#allocation11_spill] sm:$0xff] %v3084_v18  ;;  %v953_v18 = vsel %vm529_vm1, %v929_v29, 0.0 }
  0xbc   : > { %1028 = vrot.lane.b32.xlu1 %v985_v34, %s2624_s6  ;;  %1180 = vrot.lane.b32.xlu0 %v1003_v11, %s2631_s16 }
  0xbe   : > { %v3089_v50 = vpop.permute.xlu1 %636  ;;  %v3091_v54 = vpop.permute.xlu0 %650 }
  0xbf   : > { %4076 = vst [vmem:[#allocation12_spill] sm:$0xff] %v3089_v50 }
  0xc0   : > { %1116 = vrot.lane.b32.xlu1 %v1003_v11, %s2628_s15  ;;  %742 = vrot.lane.b32.xlu0 %v2793_v33, %s2629_s22 }
  0xc2   : > { %v3104_v0 = vpop.permute.xlu1 %648  ;;  %v3106_v4 = vpop.permute.xlu0 %654 }
  0xc3   : > { %4078 = vst [vmem:[#allocation14_spill] sm:$0xff] %v3106_v4 }
  0xc4   : > { %720 = vrot.lane.b32.xlu1 %v2865_v10, %s2628_s15  ;;  %1049 = vrot.lane.b32.xlu0 %v3101_v59, %s2625_s30 }
  0xc6   : > { %v3113_v6 = vpop.permute.xlu1 %652  ;;  %v3115_v7 = vpop.permute.xlu0 %658 }
  0xc7   : > { %4079 = vst [vmem:[#allocation15_spill] sm:$0xff] %v3113_v6  ;;  %4080 = vst [vmem:[#allocation16_spill] sm:$0xff] %v3115_v7 }
  0xc8   : > { %1030 = vrot.lane.b32.xlu1 %v988_v5, %s2624_s6  ;;  %1140 = vrot.lane.b32.xlu0 %v3054_v19, %s2629_s22 }
  0xca   : > { %v3120_v11 = vpop.permute.xlu1 %656  ;;  %v3122_v12 = vpop.permute.xlu0 %670 }
  0xcb   : > { %4081 = vst [vmem:[#allocation17_spill] sm:$0xff] %v3120_v11 }
  0xcc   : > { %1118 = vrot.lane.b32.xlu1 %v3101_v59, %s2628_s15  ;;  %766 = vrot.lane.b32.xlu0 %v2811_v45, %s2630_s21  ;;  %v3142_v45 = vsel %vm589_vm3, %v1007_v13, %v1008_v23  ;;  %v945_v23 = vsel %vm529_vm1, 0.0, %v929_v29 }
  0xce   : > { %v3129_v24 = vpop.permute.xlu1 %660  ;;  %v3131_v26 = vpop.permute.xlu0 %674 }
  0xcf   : > { %4082 = vst [vmem:[#allocation18_spill] sm:$0xff] %v3129_v24  ;;  %v1013_v24 = vrot.slane %v953_v18, 1 }
  0xd0   : > { %744 = vrot.lane.b32.xlu1 %v2803_v41, %s2629_s22  ;;  %1072 = vrot.lane.b32.xlu0 %v3094_v55, %s2626_s14  ;;  %v1530_v41 = vld [vmem:[%s2753_s27 + $0x8] sm:$0xff] }
  0xd2   : > { %v3146_v16 = vpop.permute.xlu1 %672  ;;  %v3148_v49 = vpop.permute.xlu0 %678 }
  0xd3   : > { %4083 = vst [vmem:[#allocation19_spill] sm:$0xff] %v3148_v49 }
  0xd4   : > { %1051 = vrot.lane.b32.xlu1 %v3142_v45, %s2625_s30  ;;  %1161 = vrot.lane.b32.xlu0 %v985_v34, %s2630_s21  ;;  %v887_v34 = vld [vmem:[%s4046_s3 + $0x8] sm:$0xff] }
  0xd5   : > { %2484 = vmatprep.subr.mxu1 %v887_v34 }
  0xd6   : > { %v3162_v62 = vpop.permute.xlu1 %676  ;;  %v3164_v13 = vpop.permute.xlu0 %682  ;;  %2485 = vmatpush3.msra.mxu1 %v887_v34 }
  0xd7   : > { %4084 = vst [vmem:[#allocation20_spill] sm:$0xff] %v3162_v62  ;;  %4085 = vst [vmem:[#allocation21_spill] sm:$0xff] %v3164_v13  ;;  %2486 = vmatprep.subr.mxu1 %v886_v47  ;;  %v1529_v13 = vld [vmem:[%s2753_s27] sm:$0xff] }
  0xd8   : > { %1142 = vrot.lane.b32.xlu1 %v3094_v55, %s2629_s22  ;;  %768 = vrot.lane.b32.xlu0 %v2827_v53, %s2630_s21 }
  0xd9   : > { %2487 = vmatpush3.msra.mxu1 %v886_v47 }
  0xda   : > { %v3178_v31 = vpop.permute.xlu1 %680  ;;  %v3180_v42 = vpop.permute.xlu0 %694 }
  0xdb   : > { %4087 = vst [vmem:[#allocation22_spill] sm:$0xff] %v3178_v31 }
  0xdc   : > { %698 = vrot.lane.b32.xlu1 %v2827_v53, %s2627_s17  ;;  %1074 = vrot.lane.b32.xlu0 %v945_v23, %s2626_s14  ;;  %v3202_v53 = vstv %s1543_s19 }
  0xde   : > { %v3190_v58 = vpop.permute.xlu1 %684  ;;  %v3192_v61 = vpop.permute.xlu0 %1018 }
  0xdf   : > { %4088 = vst [vmem:[#allocation23_spill] sm:$0xff] %v3190_v58  ;;  %v1012_v58 = vrot.slane %v945_v23, 1 }
  0xe0   : > { %790 = vrot.lane.b32.xlu1 %v2865_v10, %s2631_s16  ;;  %1163 = vrot.lane.b32.xlu0 %v988_v5, %s2630_s21  ;;  %v1545_v10 = vmul.f32 %v3202_v53, %v1529_v13  ;;  %v1015_v13 = vrot.slane %v945_v23, 2 }
  0xe1   : > { %v1014_v29 = vsel %vm564_vm2, %v1012_v58, %v1013_v24 }
  0xe2   : > { %v3197_v40 = vpop.permute.xlu1 %696  ;;  %v3199_v34 = vpop.permute.xlu0 %1060  ;;  %v1561_v31 = vrot.slane %v1545_v10, 7 }
  0xe4   : > { %1096 = vrot.lane.b32.xlu1 %v988_v5, %s2627_s17  ;;  %700 = vrot.lane.b32.xlu0 %v2834_v57, %s2627_s17  ;;  %v3229_v49 = vsel %vm529_vm1, 0.0, %v1561_v31  ;;  %v1585_v4 = vsel %vm529_vm1, %v1561_v31, 0.0 }
  0xe5   : > { %v1607_v24 = vrot.slane %v3229_v49, 1 }
  0xe6   : > { %v3207_v7 = vpop.permute.xlu1 %1039  ;;  %v1085_v47 = vpop.permute.xlu0 %1084 }
  0xe8   : > { %1182 = vrot.lane.b32.xlu1 %v3101_v59, %s2631_s16  ;;  %792 = vrot.lane.b32.xlu0 %v2891_v21, %s2631_s16  ;;  %v1016_v59 = vrot.slane %v953_v18, 2  ;;  %v1608_v18 = vrot.slane %v1585_v4, 1 }
  0xea   : > { %v3215_v50 = vpop.permute.xlu1 %1062  ;;  %v3217_v5 = vpop.permute.xlu0 %1086  ;;  %v3244_v31 = vsel %vm564_vm2, %v1607_v24, %v1608_v18  ;;  %v1628_v18 = vrot.slane %v3229_v49, 2 }
  0xec   : > { %722 = vrot.lane.b32.xlu1 %v2891_v21, %s2628_s15  ;;  %1120 = vrot.lane.b32.xlu0 %v3142_v45, %s2628_s15  ;;  %v3236_v21 = vsel %vm589_vm3, %v1015_v13, %v1016_v59 }
  0xee   : > { %v3224_v11 = vpop.permute.xlu1 %1020  ;;  %v3226_v44 = vpop.permute.xlu0 %1022 }
  0xf0   : > { %1098 = vrot.lane.b32.xlu1 %v1014_v29, %s2627_s17  ;;  %724 = vrot.lane.b32.xlu0 %v2881_v17, %s2628_s15 }
  0xf2   : > { %v1109_v58 = vpop.permute.xlu1 %1108  ;;  %v1111_v10 = vpop.permute.xlu0 %1110 }
  0xf4   : > { %1184 = vrot.lane.b32.xlu1 %v3142_v45, %s2631_s16  ;;  %1122 = vrot.lane.b32.xlu0 %v3236_v21, %s2628_s15 }
  0xf6   : > { %v3246_v39 = vpop.permute.xlu1 %1041  ;;  %v3248_v55 = vpop.permute.xlu0 %1043 }
  0xf8   : > { %746 = vrot.lane.b32.xlu1 %v2807_v43, %s2629_s22  ;;  %1657 = vrot.lane.b32.xlu0 %v3244_v31, %s2624_s6  ;;  %v1629_v43 = vrot.slane %v1585_v4, 2 }
  0xfa   : > { %v1133_v13 = vpop.permute.xlu1 %1132  ;;  %v1135_v59 = vpop.permute.xlu0 %1134  ;;  %v1630_v4 = vsel %vm589_vm3, %v1628_v18, %v1629_v43 }
  0xfc   : > { %1144 = vrot.lane.b32.xlu1 %v945_v23, %s2629_s22  ;;  %756 = vrot.lane.b32.xlu0 %v2761_v3, %s2629_s22  ;;  %v815_v23 = vsel %vm814_vm5, %v2761_v3, %v3047_v15  ;;  %v1546_v3 = vmul.f32 %v3202_v53, %v1530_v41 }
  0xfe   : > { %v3257_v45 = vpop.permute.xlu1 %1064  ;;  %v3259_v24 = vpop.permute.xlu0 %1066 }
 0x100   : > { %748 = vrot.lane.b32.xlu1 %v2823_v51, %s2629_s22  ;;  %1165 = vrot.lane.b32.xlu0 %v1014_v29, %s2630_s21  ;;  %v3275_v29 = vsel %vm823_vm6, %v815_v23, %v3060_v20  ;;  %v1195_v20 = vsel %vm814_vm5, %v2929_v37, %v3192_v61 }
 0x101   : > { %4089 = vst [vmem:[#allocation24_spill] sm:$0xff] %v3275_v29  ;;  %v1209_v15 = vsel %vm832_vm7, %v3275_v29, %v3199_v34  ;;  %v1562_v34 = vrot.slane %v1546_v3, 7 }
 0x102   : > { %v1154_v62 = vpop.permute.xlu1 %1153  ;;  %v1156_v6 = vpop.permute.xlu0 %1155  ;;  %v1217_v38 = vsel %vm841_vm9, %v1209_v15, %v1085_v47  ;;  %v1202_v15 = vsel %vm823_vm6, %v1195_v20, %v3207_v7 }
 0x103   : > { %v1225_v43 = vsel %vm850_vm8, %v1217_v38, %v1109_v58  ;;  %v1210_v38 = vsel %vm832_vm7, %v1202_v15, %v3215_v50  ;;  %v1586_v20 = vsel %vm529_vm1, %v1562_v34, 0.0 }
 0x104   : > { %770 = vrot.lane.b32.xlu1 %v2834_v57, %s2630_s21  ;;  %1699 = vrot.lane.b32.xlu0 %v3229_v49, %s2626_s14  ;;  %v1233_v41 = vsel %vm859_vm10, %v1225_v43, %v1133_v13  ;;  %v1218_v7 = vsel %vm841_vm9, %v1210_v38, %v3217_v5  ;;  %v1611_v5 = vrot.slane %v1586_v20, 1  ;;  %v1632_v38 = vrot.slane %v1586_v20, 2 }
 0x105   : > { %v1241_v18 = vsel %vm868_vm11, %v1233_v41, %v1154_v62  ;;  %v3307_v62 = vsel %vm529_vm1, 0.0, %v1562_v34  ;;  %v1226_v13 = vsel %vm850_vm8, %v1218_v7, %v1111_v10 }
 0x106   : > { %v3282_v51 = vpop.permute.xlu1 %1088  ;;  %v3284_v57 = vpop.permute.xlu0 %1024 }
 0x108   : > { %1678 = vrot.lane.b32.xlu1 %v1630_v4, %s2625_s30  ;;  %772 = vrot.lane.b32.xlu0 %v2847_v63, %s2630_s21 }
 0x10a   : > { %v1175_v23 = vpop.permute.xlu1 %1174  ;;  %v1113_v47 = vpop.permute.xlu0 %1112 }
 0x10b   : > { %v1249_v37 = vsel %vm877_vm12, %v1241_v18, %v1175_v23 }
 0x10c   : > { %702 = vrot.lane.b32.xlu1 %v2847_v63, %s2627_s17  ;;  %794 = vrot.lane.b32.xlu0 %v2881_v17, %s2631_s16  ;;  %v1234_v63 = vsel %vm859_vm10, %v1226_v13, %v1135_v59  ;;  %v1531_v59 = vld [vmem:[%s2753_s27 + $0x10] sm:$0xff] }
 0x10d   : > { %2466 = vmatprep.mubr.msk.f32.mxu0 %vm1263_vm13, %v1249_v37  ;;  %v1242_v17 = vsel %vm868_vm11, %v1234_v63, %v1156_v6  ;;  %v1547_v18 = vmul.f32 %v3202_v53, %v1531_v59  ;;  %v1631_v37 = vrot.slane %v3307_v62, 2 }
 0x10e   : > { %v1091_v61 = vpop.permute.xlu1 %1090  ;;  %v3309_v58 = vpop.permute.xlu0 %1026 }
 0x110   : > { %780 = vrot.lane.b32.xlu1 %v2767_v9, %s2630_s21  ;;  %1701 = vrot.lane.b32.xlu0 %v3307_v62, %s2626_s14  ;;  %v1610_v9 = vrot.slane %v3307_v62, 1 }
 0x112   : > { %v1177_v50 = vpop.permute.xlu1 %1176  ;;  %v1115_v3 = vpop.permute.xlu0 %1114 }
 0x113   : > { %v1250_v43 = vsel %vm877_vm12, %v1242_v17, %v1177_v50  ;;  %v1196_v17 = vsel %vm814_vm5, %v2957_v46, %v3224_v11 }
 0x114   : > { %1186 = vrot.lane.b32.xlu1 %v3236_v21, %s2631_s16  ;;  %704 = vrot.lane.b32.xlu0 %v2851_v1, %s2627_s17  ;;  %v3338_v21 = vsel %vm564_vm2, %v1610_v9, %v1611_v5 }
 0x115   : > { %2467 = vmatmul.mubr.msk.f32.vlgmr.msra.gmra.mxu0 %vm1263_vm13, %v1250_v43  ;;  %v1197_v43 = vsel %vm814_vm5, %v2967_v2, %v3226_v44 }
 0x116   : > { %v3328_v10 = vpop.permute.xlu1 %1045  ;;  %v3330_v6 = vpop.permute.xlu0 %1047  ;;  %v1204_v2 = vsel %vm823_vm6, %v1197_v43, %v3248_v55 }
 0x117   : > { %v1212_v59 = vsel %vm832_vm7, %v1204_v2, %v3259_v24 }
 0x118   : > { %1723 = vrot.lane.b32.xlu1 %v3244_v31, %s2627_s17  ;;  %796 = vrot.lane.b32.xlu0 %v2902_v25, %s2631_s16  ;;  %v1563_v31 = vrot.slane %v1547_v18, 7 }
 0x11a   : > { %v1137_v41 = vpop.permute.xlu1 %1136  ;;  %v1139_v34 = vpop.permute.xlu0 %1138  ;;  %v1587_v63 = vsel %vm529_vm1, %v1563_v31, 0.0 }
 0x11b   : > { %v1614_v20 = vrot.slane %v1587_v63, 1 }
 0x11c   : > { %726 = vrot.lane.b32.xlu1 %v2902_v25, %s2628_s15  ;;  %1659 = vrot.lane.b32.xlu0 %v3338_v21, %s2624_s6  ;;  %v3354_v25 = vsel %vm529_vm1, 0.0, %v1563_v31  ;;  %v1220_v31 = vsel %vm841_vm9, %v1212_v59, %v1091_v61 }
 0x11d   : > { %4090 = vst [vmem:[#allocation25_spill] sm:$0xff] %v3354_v25  ;;  %v1613_v50 = vrot.slane %v3354_v25, 1 }
 0x11e   : > { %v3345_v23 = vpop.permute.xlu1 %1068  ;;  %v3347_v15 = vpop.permute.xlu0 %1070 }
 0x120   : > { %804 = vrot.lane.b32.xlu1 %v2776_v14, %s2631_s16  ;;  %1747 = vrot.lane.b32.xlu0 %v1630_v4, %s2628_s15  ;;  %v1203_v14 = vsel %vm823_vm6, %v1196_v17, %v3246_v39  ;;  %v3367_v4 = vsel %vm589_vm3, %v1631_v37, %v1632_v38  ;;  %v1228_v38 = vsel %vm850_vm8, %v1220_v31, %v1115_v3  ;;  %v1634_v3 = vrot.slane %v3354_v25, 2 }
 0x121   : > { %v1211_v46 = vsel %vm832_vm7, %v1203_v14, %v3257_v45  ;;  %v3390_v45 = vsel %vm564_vm2, %v1613_v50, %v1614_v20  ;;  %v1236_v55 = vsel %vm859_vm10, %v1228_v38, %v1139_v34  ;;  %v1635_v34 = vrot.slane %v1587_v63, 2 }
 0x122   : > { %v1158_v7 = vpop.permute.xlu1 %1157  ;;  %v1160_v13 = vpop.permute.xlu0 %1159  ;;  %v1219_v39 = vsel %vm841_vm9, %v1211_v46, %v3282_v51 }
 0x123   : > { %v1227_v5 = vsel %vm850_vm8, %v1219_v39, %v1113_v47  ;;  %v1244_v24 = vsel %vm868_vm11, %v1236_v55, %v1160_v13  ;;  %v1532_v13 = vld [vmem:[%s2753_s27 + $0x18] sm:$0xff]  ;;  %v3426_v50 = vsel %vm589_vm3, %v1634_v3, %v1635_v34 }
 0x124   : > { %1725 = vrot.lane.b32.xlu1 %v3338_v21, %s2627_s17  ;;  %750 = vrot.lane.b32.xlu0 %v2831_v56, %s2629_s22  ;;  %v1235_v44 = vsel %vm859_vm10, %v1227_v5, %v1137_v41  ;;  %v3444_v5 = vld [vmem:[%s4046_s3 + $0x70] sm:$0xf]  ;;  %v3492_v55 = vld [vmem:[%s4046_s3 + $0x58] sm:$0xff] }
 0x125   : > { %v1243_v51 = vsel %vm868_vm11, %v1235_v44, %v1158_v7  ;;  %2500 = vmatprep.subr.msk.mxu0 %vm1288_vm4, %v3444_v5  ;;  %2522 = vmatprep.subr.msk.mxu1 %vm1288_vm4, %v3444_v5 }
 0x126   : > { %v3375_v11 = vpop.permute.xlu1 %1092  ;;  %v3377_v9 = vpop.permute.xlu0 %718  ;;  %2501 = vmatpush3.msk.msra.mxu0 %vm1288_vm4, %v3444_v5 }
 0x128   : > { %728 = vrot.lane.b32.xlu1 %v2894_v22, %s2628_s15  ;;  %1680 = vrot.lane.b32.xlu0 %v3367_v4, %s2625_s30 }
 0x12a   : > { %v1179_v47 = vpop.permute.xlu1 %1178  ;;  %v3395_v18 = vpop.permute.xlu0 %1094 }
 0x12b   : > { %v1251_v37 = vsel %vm877_vm12, %v1243_v51, %v1179_v47  ;;  %v3473_v47 = vld [vmem:[%s4046_s3 + $0x68] sm:$0xff] }
 0x12c   : > { %1661 = vrot.lane.b32.xlu1 %v3390_v45, %s2624_s6  ;;  %1771 = vrot.lane.b32.xlu0 %v3307_v62, %s2629_s22 }
 0x12d   : > { %2469 = vmatprep.mubr.msk.f32.mxu0 %vm1263_vm13, %v1251_v37  ;;  %2502 = vmatprep.subr.mxu0 %v3473_v47 }
 0x12e   : > { %v3407_v41 = vpop.permute.xlu1 %1028  ;;  %v1181_v61 = vpop.permute.xlu0 %1180  ;;  %2503 = vmatpush3.msra.mxu0 %v3473_v47 }
 0x12f   : > { %v1252_v7 = vsel %vm877_vm12, %v1244_v24, %v1181_v61 }
 0x130   : > { %1749 = vrot.lane.b32.xlu1 %v3367_v4, %s2628_s15  ;;  %774 = vrot.lane.b32.xlu0 %v2851_v1, %s2630_s21  ;;  %v1548_v1 = vmul.f32 %v3202_v53, %v1532_v13 }
 0x131   : > { %2470 = vmatmul.mubr.msk.f32.gmra.mxu0 %vm1263_vm13, %v1252_v7 }
 0x132   : > { %v3416_v17 = vpop.permute.xlu1 %1116  ;;  %v3418_v14 = vpop.permute.xlu0 %742  ;;  %v1564_v63 = vrot.slane %v1548_v1, 7 }
 0x134   : > { %752 = vrot.lane.b32.xlu1 %v2839_v60, %s2629_s22  ;;  %1703 = vrot.lane.b32.xlu0 %v3354_v25, %s2626_s14  ;;  %v3451_v2 = vsel %vm529_vm1, 0.0, %v1564_v63  ;;  %v1588_v3 = vsel %vm529_vm1, %v1564_v63, 0.0 }
 0x135   : > { %v1616_v34 = vrot.slane %v3451_v2, 1  ;;  %v1617_v13 = vrot.slane %v1588_v3, 1 }
 0x136   : > { %v3429_v20 = vpop.permute.xlu1 %720  ;;  %v3431_v43 = vpop.permute.xlu0 %1049 }
 0x138   : > { %1682 = vrot.lane.b32.xlu1 %v3426_v50, %s2625_s30  ;;  %1792 = vrot.lane.b32.xlu0 %v3338_v21, %s2630_s21  ;;  %v4091_v21 = vrot.slane %v2926_v36, 7  ;;  %v616_v36 = vrot.slane %v2948_v48, 1 }
 0x13a   : > { %v3437_v46 = vpop.permute.xlu1 %1030  ;;  %v3439_v39 = vpop.permute.xlu0 %1140  ;;  %v3460_v44 = vsel %vm529_vm1, %v4091_v21, 0.0  ;;  %v1533_v21 = vld [vmem:[%s2753_s27 + $0x20] sm:$0xff] }
 0x13b   : > { %v617_v31 = vrot.slane %v3460_v44, 1  ;;  %v1549_v56 = vmul.f32 %v3202_v53, %v1533_v21 }
 0x13c   : > { %1773 = vrot.lane.b32.xlu1 %v3354_v25, %s2629_s22  ;;  %776 = vrot.lane.b32.xlu0 %v2862_v8, %s2630_s21 }
 0x13d   : > { %v3499_v24 = vsel %vm564_vm2, %v616_v36, %v617_v31  ;;  %v833_v36 = vsel %vm832_vm7, %v3275_v29, %v3122_v12  ;;  %v1565_v21 = vrot.slane %v1549_v56, 7  ;;  %v1637_v56 = vrot.slane %v3451_v2, 2 }
 0x13e   : > { %v3462_v59 = vpop.permute.xlu1 %1118  ;;  %v767_v51 = vpop.permute.xlu0 %766  ;;  %v842_v60 = vsel %vm841_vm9, %v833_v36, %v3180_v42  ;;  %v619_v42 = vrot.slane %v2948_v48, 2 }
 0x140   : > { %706 = vrot.lane.b32.xlu1 %v2862_v8, %s2627_s17  ;;  %1705 = vrot.lane.b32.xlu0 %v3451_v2, %s2626_s14  ;;  %v3486_v8 = vld [vmem:[%s4046_s3 + $0x60] sm:$0xff] }
 0x141   : > { %2504 = vmatprep.subr.mxu0 %v3486_v8 }
 0x142   : > { %v3478_v37 = vpop.permute.xlu1 %744  ;;  %v3480_v38 = vpop.permute.xlu0 %1072  ;;  %2505 = vmatpush3.msra.mxu0 %v3486_v8 }
 0x143   : > { %2506 = vmatprep.subr.mxu0 %v3492_v55 }
 0x144   : > { %798 = vrot.lane.b32.xlu1 %v2894_v22, %s2631_s16  ;;  %1794 = vrot.lane.b32.xlu0 %v3390_v45, %s2630_s21  ;;  %v3509_v22 = vld [vmem:[%s4046_s3 + $0x50] sm:$0xff] }
 0x145   : > { %2507 = vmatpush3.msra.mxu0 %v3492_v55 }
 0x146   : > { %v3502_v61 = vpop.permute.xlu1 %1051  ;;  %v1162_v7 = vpop.permute.xlu0 %1161  ;;  %2508 = vmatprep.subr.mxu0 %v3509_v22 }
 0x147   : > { %2509 = vmatpush3.msra.mxu0 %v3509_v22 }
 0x148   : > { %1727 = vrot.lane.b32.xlu1 %v3390_v45, %s2627_s17  ;;  %708 = vrot.lane.b32.xlu0 %v3499_v24, %s2627_s17  ;;  %v3527_v45 = vsel %vm564_vm2, %v1616_v34, %v1617_v13 }
 0x14a   : > { %v3518_v1 = vpop.permute.xlu1 %1142  ;;  %v769_v63 = vpop.permute.xlu0 %768 }
 0x14c   : > { %1813 = vrot.lane.b32.xlu1 %v3367_v4, %s2631_s16  ;;  %800 = vrot.lane.b32.xlu0 %v2913_v30, %s2631_s16  ;;  %v851_v4 = vsel %vm850_vm8, %v842_v60, %v3377_v9  ;;  %v620_v60 = vrot.slane %v3460_v44, 2  ;;  %v1198_v9 = vsel %vm814_vm5, %v2999_v32, %v3284_v57 }
 0x14d   : > { %v860_v12 = vsel %vm859_vm10, %v851_v4, %v3418_v14  ;;  %v1638_v14 = vrot.slane %v1588_v3, 2  ;;  %v3578_v3 = vsel %vm529_vm1, 0.0, %v1565_v21 }
 0x14e   : > { %v3532_v31 = vpop.permute.xlu1 %698  ;;  %v3534_v25 = vpop.permute.xlu0 %1074  ;;  %v869_v34 = vsel %vm868_vm11, %v860_v12, %v767_v51  ;;  %v1205_v51 = vsel %vm823_vm6, %v1198_v9, %v3328_v10 }
 0x14f   : > { %v1213_v32 = vsel %vm832_vm7, %v1205_v51, %v3345_v23 }
 0x150   : > { %730 = vrot.lane.b32.xlu1 %v2913_v30, %s2628_s15  ;;  %1729 = vrot.lane.b32.xlu0 %v3527_v45, %s2627_s17  ;;  %v816_v30 = vsel %vm814_vm5, %v2797_v35, %v3068_v28  ;;  %v1221_v4 = vsel %vm841_vm9, %v1213_v32, %v3375_v11 }
 0x151   : > { %v825_v44 = vsel %vm823_vm6, %v816_v30, %v3104_v0  ;;  %v1589_v0 = vsel %vm529_vm1, %v1565_v21, 0.0  ;;  %v1229_v23 = vsel %vm850_vm8, %v1221_v4, %v3416_v17  ;;  %v1619_v17 = vrot.slane %v3578_v3, 1 }
 0x152   : > { %v791_v13 = vpop.permute.xlu1 %790  ;;  %v3548_v29 = vpop.permute.xlu0 %1163  ;;  %v834_v35 = vsel %vm832_vm7, %v825_v44, %v3146_v16  ;;  %v621_v16 = vsel %vm589_vm3, %v619_v42, %v620_v60  ;;  %v1534_v44 = vld [vmem:[%s2753_s27 + $0x28] sm:$0xff] }
 0x153   : > { %v878_v36 = vsel %vm877_vm12, %v869_v34, %v791_v13  ;;  %v843_v10 = vsel %vm841_vm9, %v834_v35, %v3197_v40  ;;  %v3595_v34 = vsel %vm589_vm3, %v1637_v56, %v1638_v14  ;;  %v1237_v40 = vsel %vm859_vm10, %v1229_v23, %v3439_v39 }
 0x154   : > { %1663 = vrot.lane.b32.xlu1 %v3527_v45, %s2624_s6  ;;  %1815 = vrot.lane.b32.xlu0 %v3426_v50, %s2631_s16  ;;  %v852_v12 = vsel %vm850_vm8, %v843_v10, %v3429_v20  ;;  %v1620_v13 = vrot.slane %v1589_v0, 1  ;;  %v1245_v20 = vsel %vm868_vm11, %v1237_v40, %v1162_v7  ;;  %v1641_v7 = vrot.slane %v1589_v0, 2  ;;  %v1535_v10 = vld [vmem:[%s2753_s27 + $0x30] sm:$0xff] }
 0x155   : > { %2488 = vmatprep.mubr.msk.f32.mxu1 %vm1263_vm13, %v878_v36  ;;  %v861_v11 = vsel %vm859_vm10, %v852_v12, %v3478_v37  ;;  %v1640_v37 = vrot.slane %v3578_v3, 2  ;;  %v1551_v12 = vmul.f32 %v3202_v53, %v1535_v10 }
 0x156   : > { %v3573_v28 = vpop.permute.xlu1 %1096  ;;  %v3575_v57 = vpop.permute.xlu0 %700  ;;  %v870_v21 = vsel %vm868_vm11, %v861_v11, %v769_v63  ;;  %v1621_v39 = vsel %vm564_vm2, %v1619_v17, %v1620_v13  ;;  %v1199_v63 = vsel %vm814_vm5, %v3023_v52, %v3309_v58  ;;  %v817_v13 = vsel %vm814_vm5, %v2793_v33, %v3066_v27 }
 0x157   : > { %v1206_v9 = vsel %vm823_vm6, %v1199_v63, %v3330_v6  ;;  %v3629_v56 = vsel %vm589_vm3, %v1640_v37, %v1641_v7  ;;  %v1567_v17 = vrot.slane %v1551_v12, 7 }
 0x158   : > { %1751 = vrot.lane.b32.xlu1 %v3426_v50, %s2628_s15  ;;  %754 = vrot.lane.b32.xlu0 %v2948_v48, %s2629_s22  ;;  %v1214_v52 = vsel %vm832_vm7, %v1206_v9, %v3347_v15 }
 0x159   : > { %v1222_v14 = vsel %vm841_vm9, %v1214_v52, %v3395_v18  ;;  %v3706_v33 = vsel %vm529_vm1, 0.0, %v1567_v17  ;;  %v1591_v27 = vsel %vm529_vm1, %v1567_v17, 0.0 }
 0x15a   : > { %v1183_v50 = vpop.permute.xlu1 %1182  ;;  %v793_v42 = vpop.permute.xlu0 %792  ;;  %v1230_v6 = vsel %vm850_vm8, %v1222_v14, %v3462_v59  ;;  %v1625_v7 = vrot.slane %v3706_v33, 1  ;;  %v1200_v14 = vsel %vm814_vm5, %v3054_v19, %v3407_v41 }
 0x15b   : > { %v1253_v48 = vsel %vm877_vm12, %v1245_v20, %v1183_v50  ;;  %v879_v36 = vsel %vm877_vm12, %v870_v21, %v793_v42  ;;  %v1238_v15 = vsel %vm859_vm10, %v1230_v6, %v3518_v1  ;;  %v826_v20 = vsel %vm823_vm6, %v817_v13, %v3091_v54 }
 0x15c   : > { %732 = vrot.lane.b32.xlu1 %v621_v16, %s2628_s15  ;;  %1684 = vrot.lane.b32.xlu0 %v3595_v34, %s2625_s30  ;;  %v1246_v18 = vsel %vm868_vm11, %v1238_v15, %v3548_v29  ;;  %v835_v50 = vsel %vm832_vm7, %v826_v20, %v3131_v26 }
 0x15d   : > { %2472 = vmatprep.mubr.msk.f32.mxu0 %vm1263_vm13, %v1253_v48  ;;  %2489 = vmatmul.mubr.msk.f32.vlgmr.msra.gmra.mxu1 %vm1263_vm13, %v879_v36 }
 0x15e   : > { %v3616_v60 = vpop.permute.xlu1 %722  ;;  %v3618_v30 = vpop.permute.xlu0 %1120  ;;  %2527 = vmatpush3.msk.msra.mxu1 %vm1288_vm4, %v3444_v5 }
 0x15f   : > { %2523 = vmatprep.subr.mxu1 %v3473_v47 }
 0x160   : > { %1665 = vrot.lane.b32.xlu1 %v1621_v39, %s2624_s6  ;;  %1775 = vrot.lane.b32.xlu0 %v3451_v2, %s2629_s22 }
 0x161   : > { %2528 = vmatpush3.msra.mxu1 %v3473_v47 }
 0x162   : > { %v3634_v58 = vpop.permute.xlu1 %1098  ;;  %v3636_v5 = vpop.permute.xlu0 %724  ;;  %2524 = vmatprep.subr.mxu1 %v3486_v8 }
 0x163   : > { %2529 = vmatpush3.msra.mxu1 %v3486_v8  ;;  %v1550_v8 = vmul.f32 %v3202_v53, %v1534_v44  ;;  %v1207_v44 = vsel %vm823_vm6, %v1200_v14, %v3431_v43 }
 0x164   : > { %1753 = vrot.lane.b32.xlu1 %v3595_v34, %s2628_s15  ;;  %1686 = vrot.lane.b32.xlu0 %v3629_v56, %s2625_s30  ;;  %v1215_v15 = vsel %vm832_vm7, %v1207_v44, %v3480_v38  ;;  %v4094_v38 = vld [vmem:[#allocation15_spill] sm:$0xff] }
 0x165   : > { %2525 = vmatprep.subr.mxu1 %v3492_v55  ;;  %v1566_v35 = vrot.slane %v1550_v8, 7  ;;  %v1223_v41 = vsel %vm841_vm9, %v1215_v15, %v3573_v28  ;;  %v1647_v28 = vrot.slane %v1591_v27, 2 }
 0x166   : > { %v1185_v47 = vpop.permute.xlu1 %1184  ;;  %v3654_v51 = vpop.permute.xlu0 %1122  ;;  %2530 = vmatpush3.msra.mxu1 %v3492_v55  ;;  %v1231_v43 = vsel %vm850_vm8, %v1223_v41, %v3618_v30 }
 0x167   : > { %v1254_v59 = vsel %vm877_vm12, %v1246_v18, %v1185_v47  ;;  %2526 = vmatprep.subr.mxu1 %v3509_v22  ;;  %v1590_v0 = vsel %vm529_vm1, %v1566_v35, 0.0  ;;  %v4093_v47 = vld [vmem:[#allocation3_spill] sm:$0xff] }
 0x168   : > { %778 = vrot.lane.b32.xlu1 %v3499_v24, %s2630_s21  ;;  %1777 = vrot.lane.b32.xlu0 %v3578_v3, %s2629_s22  ;;  %v3672_v24 = vsel %vm529_vm1, 0.0, %v1566_v35  ;;  %v1623_v4 = vrot.slane %v1590_v0, 1  ;;  %v1644_v21 = vrot.slane %v1590_v0, 2  ;;  %v4095_v35 = vld [vmem:[#allocation20_spill] sm:$0xff] }
 0x169   : > { %2473 = vmatmul.mubr.msk.f32.gmra.mxu0 %vm1263_vm13, %v1254_v59  ;;  %2531 = vmatpush3.msra.mxu1 %v3509_v22  ;;  %v1622_v22 = vrot.slane %v3672_v24, 1 }
 0x16a   : > { %v747_v29 = vpop.permute.xlu1 %746  ;;  %v1658_v1 = vpop.permute.xlu0 %1657 }
 0x16b   : > { %v3688_v40 = vsel %vm564_vm2, %v1622_v22, %v1623_v4  ;;  %v1834_v42 = vsel %vm814_vm5, %v3229_v49, %v1658_v1  ;;  %v1646_v1 = vrot.slane %v3706_v33, 2  ;;  %v1536_v4 = vld [vmem:[%s2753_s27 + $0x38] sm:$0xff] }
 0x16c   : > { %1707 = vrot.lane.b32.xlu1 %v3578_v3, %s2626_s14  ;;  %802 = vrot.lane.b32.xlu0 %v621_v16, %s2631_s16 }
 0x16d   : > { %v1648_v17 = vsel %vm589_vm3, %v1646_v1, %v1647_v28 }
 0x16e   : > { %v1145_v55 = vpop.permute.xlu1 %1144  ;;  %v3669_v32 = vpop.permute.xlu0 %756 }
 0x170   : > { %1796 = vrot.lane.b32.xlu1 %v3527_v45, %s2630_s21  ;;  %1731 = vrot.lane.b32.xlu0 %v1621_v39, %s2627_s17 }
 0x172   : > { %v3680_v23 = vpop.permute.xlu1 %748  ;;  %v1166_v16 = vpop.permute.xlu0 %1165 }
 0x174   : > { %1709 = vrot.lane.b32.xlu1 %v3672_v24, %s2626_s14  ;;  %1817 = vrot.lane.b32.xlu0 %v3595_v34, %s2631_s16  ;;  %v1643_v34 = vrot.slane %v3672_v24, 2 }
 0x176   : > { %v771_v45 = vpop.permute.xlu1 %770  ;;  %v3690_v11 = vpop.permute.xlu0 %1699  ;;  %v3722_v49 = vsel %vm589_vm3, %v1643_v34, %v1644_v21  ;;  %v4096_v21 = vld [vmem:[#allocation13_spill] sm:$0xff] }
 0x178   : > { %1798 = vrot.lane.b32.xlu1 %v1621_v39, %s2630_s21  ;;  %1733 = vrot.lane.b32.xlu0 %v3688_v40, %s2627_s17  ;;  %v844_v39 = vsel %vm841_vm9, %v835_v50, %v3532_v31  ;;  %v1626_v31 = vrot.slane %v1591_v27, 1  ;;  %v1201_v50 = vsel %vm814_vm5, %v4096_v21, %v3437_v46 }
 0x179   : > { %v853_v37 = vsel %vm850_vm8, %v844_v39, %v3616_v60 }
 0x17a   : > { %v1679_v48 = vpop.permute.xlu1 %1678  ;;  %v773_v36 = vpop.permute.xlu0 %772  ;;  %v862_v26 = vsel %vm859_vm10, %v853_v37, %v747_v29  ;;  %v1627_v6 = vsel %vm564_vm2, %v1625_v7, %v1626_v31  ;;  %v1239_v29 = vsel %vm859_vm10, %v1231_v43, %v1145_v55 }
 0x17b   : > { %v3712_v54 = vsel %vm823_vm6, %v1834_v42, %v1679_v48  ;;  %v871_v63 = vsel %vm868_vm11, %v862_v26, %v771_v45  ;;  %v1247_v10 = vsel %vm868_vm11, %v1239_v29, %v1166_v16 }
 0x17c   : > { %1667 = vrot.lane.b32.xlu1 %v3688_v40, %s2624_s6  ;;  %1819 = vrot.lane.b32.xlu0 %v3629_v56, %s2631_s16 }
 0x17e   : > { %v3726_v9 = vpop.permute.xlu1 %702  ;;  %v795_v52 = vpop.permute.xlu0 %794 }
 0x17f   : > { %v880_v60 = vsel %vm877_vm12, %v871_v63, %v795_v52 }
 0x180   : > { %1755 = vrot.lane.b32.xlu1 %v3629_v56, %s2628_s15  ;;  %1688 = vrot.lane.b32.xlu0 %v3722_v49, %s2625_s30  ;;  %v4092_v56 = vld [vmem:[#allocation8_spill] sm:$0xff] }
 0x181   : > { %2491 = vmatprep.mubr.msk.f32.mxu1 %vm1263_vm13, %v880_v60  ;;  %v818_v8 = vsel %vm814_vm5, %v4093_v47, %v4092_v56 }
 0x182   : > { %v3742_v18 = vpop.permute.xlu1 %780  ;;  %v3744_v19 = vpop.permute.xlu0 %1701  ;;  %v827_v59 = vsel %vm823_vm6, %v818_v8, %v4094_v38 }
 0x183   : > { %v836_v0 = vsel %vm832_vm7, %v827_v59, %v4095_v35  ;;  %v4097_v35 = vld [vmem:[#allocation9_spill] sm:$0xff] }
 0x184   : > { %1669 = vrot.lane.b32.xlu1 %v1627_v6, %s2624_s6  ;;  %1779 = vrot.lane.b32.xlu0 %v3672_v24, %s2629_s22  ;;  %v845_v12 = vsel %vm841_vm9, %v836_v0, %v3575_v57  ;;  %v1552_v57 = vmul.f32 %v3202_v53, %v1536_v4  ;;  %v4098_v0 = vld [vmem:[#allocation4_spill] sm:$0xff] }
 0x185   : > { %v854_v55 = vsel %vm850_vm8, %v845_v12, %v3636_v5  ;;  %v4100_v12 = vld [vmem:[#allocation19_spill] sm:$0xff] }
 0x186   : > { %v1187_v22 = vpop.permute.xlu1 %1186  ;;  %v3763_v30 = vpop.permute.xlu0 %704  ;;  %v863_v16 = vsel %vm859_vm10, %v854_v55, %v3680_v23  ;;  %v1208_v23 = vsel %vm823_vm6, %v1201_v50, %v3502_v61  ;;  %v1568_v53 = vrot.slane %v1552_v57, 7 }
 0x187   : > { %v1255_v45 = vsel %vm877_vm12, %v1247_v10, %v1187_v22  ;;  %v872_v13 = vsel %vm868_vm11, %v863_v16, %v773_v36  ;;  %v1216_v42 = vsel %vm832_vm7, %v1208_v23, %v3534_v25  ;;  %v819_v10 = vsel %vm814_vm5, %v4098_v0, %v4097_v35  ;;  %v4099_v22 = vld [vmem:[#allocation14_spill] sm:$0xff] }
 0x188   : > { %1757 = vrot.lane.b32.xlu1 %v3722_v49, %s2628_s15  ;;  %1711 = vrot.lane.b32.xlu0 %v3706_v33, %s2626_s14  ;;  %v1224_v27 = vsel %vm841_vm9, %v1216_v42, %v3634_v58  ;;  %v1592_v58 = vsel %vm529_vm1, %v1568_v53, 0.0  ;;  %v828_v4 = vsel %vm823_vm6, %v819_v10, %v4099_v22  ;;  %v4101_v23 = vld [vmem:[#allocation10_spill] sm:$0xff] }
 0x189   : > { %2475 = vmatprep.mubr.msk.f32.mxu0 %vm1263_vm13, %v1255_v45  ;;  %v1232_v46 = vsel %vm850_vm8, %v1224_v27, %v3654_v51  ;;  %v1652_v31 = vrot.slane %v1592_v58, 1  ;;  %v1655_v63 = vrot.slane %v1592_v58, 2  ;;  %v837_v45 = vsel %vm832_vm7, %v828_v4, %v4100_v12  ;;  %v4106_v4 = vld [vmem:[#allocation12_spill] sm:$0xff]  ;;  %v4108_v12 = vld [vmem:[#allocation18_spill] sm:$0xff] }
 0x18a   : > { %v3781_v20 = vpop.permute.xlu1 %1723  ;;  %v797_v5 = vpop.permute.xlu0 %796  ;;  %v1240_v61 = vsel %vm859_vm10, %v1232_v46, %v3669_v32  ;;  %v4105_v46 = vld [vmem:[#allocation24_spill] sm:$0xff] }
 0x18b   : > { %v881_v34 = vsel %vm877_vm12, %v872_v13, %v797_v5  ;;  %v1248_v25 = vsel %vm868_vm11, %v1240_v61, %v3742_v18  ;;  %v1848_v61 = vsel %vm832_vm7, %v4105_v46, %v3690_v11 }
 0x18c   : > { %1690 = vrot.lane.b32.xlu1 %v1648_v17, %s2625_s30  ;;  %1800 = vrot.lane.b32.xlu0 %v3688_v40, %s2630_s21  ;;  %v1584_v40 = vsel %vm529_vm1, 0.0, %v1568_v53  ;;  %v4102_v53 = vld [vmem:[#allocation5_spill] sm:$0xff] }
 0x18d   : > { %2492 = vmatmul.mubr.msk.f32.gmra.mxu1 %vm1263_vm13, %v881_v34  ;;  %v1651_v26 = vrot.slane %v1584_v40, 1  ;;  %v1654_v7 = vrot.slane %v1584_v40, 2  ;;  %v820_v42 = vsel %vm814_vm5, %v4102_v53, %v4101_v23  ;;  %v4111_v23 = vld [vmem:[#allocation6_spill] sm:$0xff] }
 0x18e   : > { %v727_v48 = vpop.permute.xlu1 %726  ;;  %v1660_v36 = vpop.permute.xlu0 %1659 }
 0x18f   : > { %v1653_v14 = vsel %vm564_vm2, %v1651_v26, %v1652_v31  ;;  %v1656_v44 = vsel %vm589_vm3, %v1654_v7, %v1655_v63 }
 0x190   : > { %1781 = vrot.lane.b32.xlu1 %v3706_v33, %s2629_s22  ;;  %1735 = vrot.lane.b32.xlu0 %v1627_v6, %s2627_s17 }
 0x192   : > { %v3807_v39 = vpop.permute.xlu1 %804  ;;  %v1748_v37 = vpop.permute.xlu0 %1747 }
 0x193   : > { %v1256_v51 = vsel %vm877_vm12, %v1248_v25, %v3807_v39 }
 0x194   : > { %1713 = vrot.lane.b32.xlu1 %v1584_v40, %s2626_s14  ;;  %1821 = vrot.lane.b32.xlu0 %v3722_v49, %s2631_s16  ;;  %v1835_v49 = vsel %vm814_vm5, %v3307_v62, %v1660_v36  ;;  %v4103_v36 = vld [vmem:[#allocation17_spill] sm:$0xff] }
 0x195   : > { %2476 = vmatmul.mubr.msk.f32.gmra.mxu0 %vm1263_vm13, %v1256_v51  ;;  %v829_v27 = vsel %vm823_vm6, %v820_v42, %v4103_v36  ;;  %v1856_v51 = vsel %vm841_vm9, %v1848_v61, %v3781_v20  ;;  %v1849_v20 = vsel %vm832_vm7, %v3712_v54, %v3744_v19  ;;  %v4112_v42 = vld [vmem:[#allocation16_spill] sm:$0xff] }
 0x196   : > { %v3816_v52 = vpop.permute.xlu1 %1725  ;;  %v751_v60 = vpop.permute.xlu0 %750  ;;  %v1864_v26 = vsel %vm850_vm8, %v1856_v51, %v1748_v37 }
 0x198   : > { %1802 = vrot.lane.b32.xlu1 %v1627_v6, %s2630_s21  ;;  %1759 = vrot.lane.b32.xlu0 %v1648_v17, %s2628_s15 }
 0x19a   : > { %v729_v15 = vpop.permute.xlu1 %728  ;;  %v1681_v41 = vpop.permute.xlu0 %1680 }
 0x19b   : > { %v3825_v56 = vsel %vm823_vm6, %v1835_v49, %v1681_v41  ;;  %v1857_v41 = vsel %vm841_vm9, %v1849_v20, %v3816_v52 }
 0x19c   : > { %1737 = vrot.lane.b32.xlu1 %v1653_v14, %s2627_s17  ;;  %1761 = vrot.lane.b32.xlu0 %v1656_v44, %s2628_s15 }
 0x19e   : > { %v3829_v47 = vpop.permute.xlu1 %1661  ;;  %v1772_v6 = vpop.permute.xlu0 %1771 }
 0x19f   : > { %v1872_v31 = vsel %vm859_vm10, %v1864_v26, %v1772_v6 }
 0x1a0   : > { %1823 = vrot.lane.b32.xlu1 %v1648_v17, %s2631_s16  ;;  %1804 = vrot.lane.b32.xlu0 %v1653_v14, %s2630_s21  ;;  %v846_v17 = vsel %vm841_vm9, %v837_v45, %v3726_v9  ;;  %v4104_v9 = vld [vmem:[#allocation22_spill] sm:$0xff] }
 0x1a1   : > { %v855_v57 = vsel %vm850_vm8, %v846_v17, %v727_v48  ;;  %v838_v48 = vsel %vm832_vm7, %v829_v27, %v4104_v9  ;;  %v4109_v17 = vld [vmem:[#allocation23_spill] sm:$0xff]  ;;  %v4113_v27 = vld [vmem:[#allocation21_spill] sm:$0xff] }
 0x1a2   : > { %v1750_v8 = vpop.permute.xlu1 %1749  ;;  %v775_v43 = vpop.permute.xlu0 %774  ;;  %v864_v13 = vsel %vm859_vm10, %v855_v57, %v751_v60  ;;  %v847_v58 = vsel %vm841_vm9, %v838_v48, %v3763_v30 }
 0x1a3   : > { %v873_v5 = vsel %vm868_vm11, %v864_v13, %v775_v43  ;;  %v856_v7 = vsel %vm850_vm8, %v847_v58, %v729_v15  ;;  %v1865_v6 = vsel %vm850_vm8, %v1857_v41, %v1750_v8  ;;  %v4107_v8 = vld [vmem:[#allocation7_spill] sm:$0xff] }
 0x1a4   : > { %1783 = vrot.lane.b32.xlu1 %v1584_v40, %s2629_s22 }
 0x1a6   : > { %v753_v62 = vpop.permute.xlu1 %752  ;;  %v3834_v38 = vpop.permute.xlu0 %1703 }
 0x1a7   : > { %v865_v63 = vsel %vm859_vm10, %v856_v7, %v753_v62 }
 0x1a8   : > { %1825 = vrot.lane.b32.xlu1 %v1656_v44, %s2631_s16 }
 0x1aa   : > { %v3837_v59 = vpop.permute.xlu1 %1682  ;;  %v1793_v29 = vpop.permute.xlu0 %1792 }
 0x1ab   : > { %v1880_v60 = vsel %vm868_vm11, %v1872_v31, %v1793_v29 }
 0x1ae   : > { %v1774_v1 = vpop.permute.xlu1 %1773  ;;  %v777_v28 = vpop.permute.xlu0 %776 }
 0x1af   : > { %v874_v11 = vsel %vm868_vm11, %v865_v63, %v777_v28  ;;  %v1873_v43 = vsel %vm859_vm10, %v1865_v6, %v1774_v1  ;;  %v822_v1 = vsel %vm814_vm5, %v4107_v8, %v4106_v4 }
 0x1b0   : > { %v831_v45 = vsel %vm823_vm6, %v822_v1, %v4108_v12 }
 0x1b1   : > { %v840_v57 = vsel %vm832_vm7, %v831_v45, %v4109_v17 }
 0x1b2   : > { %v707_v55 = vpop.permute.xlu1 %706  ;;  %v3846_v16 = vpop.permute.xlu0 %1705 }
 0x1b6   : > { %v799_v34 = vpop.permute.xlu1 %798  ;;  %v1795_v21 = vpop.permute.xlu0 %1794 }
 0x1b7   : > { %v882_v50 = vsel %vm877_vm12, %v873_v5, %v799_v34  ;;  %v1881_v62 = vsel %vm868_vm11, %v1873_v43, %v1795_v21 }
 0x1b8   : > { %2494 = vmatprep.mubr.msk.f32.mxu1 %vm1263_vm13, %v882_v50  ;;  %v4110_v50 = vld [vmem:[#allocation11_spill] sm:$0xff] }
 0x1b9   : > { %v821_v53 = vsel %vm814_vm5, %v4111_v23, %v4110_v50 }
 0x1ba   : > { %v1728_v40 = vpop.permute.xlu1 %1727  ;;  %v709_v25 = vpop.permute.xlu0 %708  ;;  %v830_v36 = vsel %vm823_vm6, %v821_v53, %v4112_v42 }
 0x1bb   : > { %v849_v13 = vsel %vm841_vm9, %v840_v57, %v709_v25  ;;  %v839_v9 = vsel %vm832_vm7, %v830_v36, %v4113_v27 }
 0x1bc   : > { %v848_v25 = vsel %vm841_vm9, %v839_v9, %v707_v55  ;;  %v1850_v55 = vsel %vm832_vm7, %v3825_v56, %v3834_v38 }
 0x1be   : > { %v1814_v14 = vpop.permute.xlu1 %1813  ;;  %v801_v44 = vpop.permute.xlu0 %800 }
 0x1bf   : > { %v1888_v49 = vsel %vm877_vm12, %v1880_v60, %v1814_v14  ;;  %v883_v30 = vsel %vm877_vm12, %v874_v11, %v801_v44 }
 0x1c0   : > { %2495 = vmatmul.mubr.msk.f32.gmra.mxu1 %vm1263_vm13, %v883_v30  ;;  %2510 = vmatprep.mubr.msk.f32.mxu0 %vm1263_vm13, %v1888_v49  ;;  %v1858_v49 = vsel %vm841_vm9, %v1850_v55, %v1728_v40 }
 0x1c2   : > { %v731_v37 = vpop.permute.xlu1 %730  ;;  %v1730_v15 = vpop.permute.xlu0 %1729 }
 0x1c3   : > { %v857_v58 = vsel %vm850_vm8, %v848_v25, %v731_v37 }
 0x1c6   : > { %v3887_v29 = vpop.permute.xlu1 %1663  ;;  %v1816_v28 = vpop.permute.xlu0 %1815 }
 0x1c7   : > { %v1889_v35 = vsel %vm877_vm12, %v1881_v62, %v1816_v28  ;;  %v4114_v62 = vld [vmem:[#allocation25_spill] sm:$0xff] }
 0x1c8   : > { %2511 = vmatmul.mubr.msk.f32.vlgmr.msra.gmra.mxu0 %vm1263_vm13, %v1889_v35  ;;  %v1836_v28 = vsel %vm814_vm5, %v4114_v62, %v3829_v47 }
 0x1c9   : > { %v1843_v56 = vsel %vm823_vm6, %v1836_v28, %v3837_v59 }
 0x1ca   : > { %v1752_v0 = vpop.permute.xlu1 %1751  ;;  %v755_v54 = vpop.permute.xlu0 %754  ;;  %v1851_v38 = vsel %vm832_vm7, %v1843_v56, %v3846_v16 }
 0x1cb   : > { %v866_v51 = vsel %vm859_vm10, %v857_v58, %v755_v54  ;;  %v1866_v30 = vsel %vm850_vm8, %v1858_v49, %v1752_v0  ;;  %v1859_v0 = vsel %vm841_vm9, %v1851_v38, %v1730_v15 }
 0x1ce   : > { %v733_v19 = vpop.permute.xlu1 %732  ;;  %v1685_v10 = vpop.permute.xlu0 %1684 }
 0x1cf   : > { %v858_v21 = vsel %vm850_vm8, %v849_v13, %v733_v19  ;;  %v1837_v13 = vsel %vm814_vm5, %v3451_v2, %v3887_v29 }
 0x1d0   : > { %v867_v48 = vsel %vm859_vm10, %v858_v21, %v3669_v32 }
 0x1d1   : > { %v876_v26 = vsel %vm868_vm11, %v867_v48, %v3742_v18 }
 0x1d2   : > { %v3891_v22 = vpop.permute.xlu1 %1665  ;;  %v1776_v52 = vpop.permute.xlu0 %1775  ;;  %v885_v11 = vsel %vm877_vm12, %v876_v26, %v3807_v39 }
 0x1d3   : > { %v1874_v20 = vsel %vm859_vm10, %v1866_v30, %v1776_v52 }
 0x1d6   : > { %v1754_v5 = vpop.permute.xlu1 %1753  ;;  %v3901_v34 = vpop.permute.xlu0 %1686 }
 0x1d7   : > { %v1867_v54 = vsel %vm850_vm8, %v1859_v0, %v1754_v5  ;;  %v1844_v5 = vsel %vm823_vm6, %v1837_v13, %v1685_v10  ;;  %v1838_v10 = vsel %vm814_vm5, %v3578_v3, %v3891_v22 }
 0x1da   : > { %v779_v46 = vpop.permute.xlu1 %778  ;;  %v1778_v61 = vpop.permute.xlu0 %1777 }
 0x1db   : > { %v875_v7 = vsel %vm868_vm11, %v866_v51, %v779_v46  ;;  %v1875_v19 = vsel %vm859_vm10, %v1867_v54, %v1778_v61  ;;  %v1845_v61 = vsel %vm823_vm6, %v1838_v10, %v3901_v34 }
 0x1de   : > { %v1708_v31 = vpop.permute.xlu1 %1707  ;;  %v803_v63 = vpop.permute.xlu0 %802 }
 0x1df   : > { %v884_v60 = vsel %vm877_vm12, %v875_v7, %v803_v63  ;;  %v1852_v21 = vsel %vm832_vm7, %v1844_v5, %v1708_v31 }
 0x1e0   : > { %2497 = vmatprep.mubr.msk.f32.mxu1 %vm1263_vm13, %v884_v60 }
 0x1e1   : > { %2498 = vmatmul.mubr.msk.f32.gmra.mxu1 %vm1263_vm13, %v885_v11 }
 0x1e2   : > { %v1797_v14 = vpop.permute.xlu1 %1796  ;;  %v1732_v44 = vpop.permute.xlu0 %1731 }
 0x1e3   : > { %v1882_v37 = vsel %vm868_vm11, %v1874_v20, %v1797_v14  ;;  %v1860_v53 = vsel %vm841_vm9, %v1852_v21, %v1732_v44 }
 0x1e6   : > { %v1710_v41 = vpop.permute.xlu1 %1709  ;;  %v1818_v6 = vpop.permute.xlu0 %1817 }
 0x1e7   : > { %v1890_v43 = vsel %vm877_vm12, %v1882_v37, %v1818_v6  ;;  %v1853_v58 = vsel %vm832_vm7, %v1845_v61, %v1710_v41 }
 0x1e8   : > { %2513 = vmatprep.mubr.msk.f32.mxu0 %vm1263_vm13, %v1890_v43 }
 0x1ea   : > { %v1799_v40 = vpop.permute.xlu1 %1798  ;;  %v1734_v35 = vpop.permute.xlu0 %1733 }
 0x1eb   : > { %v1883_v52 = vsel %vm868_vm11, %v1875_v19, %v1799_v40  ;;  %v1861_v7 = vsel %vm841_vm9, %v1853_v58, %v1734_v35 }
 0x1ee   : > { %v1668_v4 = vpop.permute.xlu1 %1667  ;;  %v1820_v47 = vpop.permute.xlu0 %1819 }
 0x1ef   : > { %v1891_v8 = vsel %vm877_vm12, %v1883_v52, %v1820_v47  ;;  %v1839_v34 = vsel %vm814_vm5, %v3672_v24, %v1668_v4 }
 0x1f0   : > { %2514 = vmatmul.mubr.msk.f32.gmra.mxu0 %vm1263_vm13, %v1891_v8 }
 0x1f2   : > { %v1756_v59 = vpop.permute.xlu1 %1755  ;;  %v1689_v1 = vpop.permute.xlu0 %1688 }
 0x1f3   : > { %v1868_v42 = vsel %vm850_vm8, %v1860_v53, %v1756_v59  ;;  %v1846_v55 = vsel %vm823_vm6, %v1839_v34, %v1689_v1 }
 0x1f6   : > { %v1670_v12 = vpop.permute.xlu1 %1669  ;;  %v1780_v16 = vpop.permute.xlu0 %1779 }
 0x1f7   : > { %v1876_v36 = vsel %vm859_vm10, %v1868_v42, %v1780_v16  ;;  %v1840_v25 = vsel %vm814_vm5, %v3706_v33, %v1670_v12 }
 0x1fa   : > { %v1758_v45 = vpop.permute.xlu1 %1757  ;;  %v1712_v17 = vpop.permute.xlu0 %1711 }
 0x1fb   : > { %v1869_v63 = vsel %vm850_vm8, %v1861_v7, %v1758_v45  ;;  %v1854_v49 = vsel %vm832_vm7, %v1846_v55, %v1712_v17 }
 0x1fe   : > { %v1691_v57 = vpop.permute.xlu1 %1690  ;;  %v1801_v15 = vpop.permute.xlu0 %1800 }
 0x1ff   : > { %v1884_v27 = vsel %vm868_vm11, %v1876_v36, %v1801_v15  ;;  %v1847_v51 = vsel %vm823_vm6, %v1840_v25, %v1691_v57 }
 0x202   : > { %v1782_v50 = vpop.permute.xlu1 %1781  ;;  %v1736_v23 = vpop.permute.xlu0 %1735 }
 0x203   : > { %v1877_v22 = vsel %vm859_vm10, %v1869_v63, %v1782_v50  ;;  %v1862_v30 = vsel %vm841_vm9, %v1854_v49, %v1736_v23 }
 0x206   : > { %v1714_v9 = vpop.permute.xlu1 %1713  ;;  %v1822_v48 = vpop.permute.xlu0 %1821 }
 0x207   : > { %v1892_v46 = vsel %vm877_vm12, %v1884_v27, %v1822_v48  ;;  %v1855_v31 = vsel %vm832_vm7, %v1847_v51, %v1714_v9 }
 0x208   : > { %2516 = vmatprep.mubr.msk.f32.mxu1 %vm1263_vm13, %v1892_v46 }
 0x20a   : > { %v1803_v2 = vpop.permute.xlu1 %1802  ;;  %v1760_v29 = vpop.permute.xlu0 %1759 }
 0x20b   : > { %v1885_v33 = vsel %vm868_vm11, %v1877_v22, %v1803_v2  ;;  %v1870_v20 = vsel %vm850_vm8, %v1862_v30, %v1760_v29 }
 0x20e   : > { %v1738_v26 = vpop.permute.xlu1 %1737  ;;  %v1762_v3 = vpop.permute.xlu0 %1761 }
 0x20f   : > { %v1863_v60 = vsel %vm841_vm9, %v1855_v31, %v1738_v26 }
 0x210   : > { %v1871_v14 = vsel %vm850_vm8, %v1863_v60, %v1762_v3 }
 0x211   : > { %v1879_v24 = vsel %vm859_vm10, %v1871_v14, %v3669_v32  ;;  %v2468_v32 = vpop.f32.mrf.mxu0 }
 0x212   : > { %v1824_v11 = vpop.permute.xlu1 %1823  ;;  %v1805_v6 = vpop.permute.xlu0 %1804  ;;  %v1887_v43 = vsel %vm868_vm11, %v1879_v24, %v3742_v18 }
 0x213   : > { %v1893_v44 = vsel %vm877_vm12, %v1885_v33, %v1824_v11  ;;  %v1895_v38 = vsel %vm877_vm12, %v1887_v43, %v3807_v39  ;;  %v1358_v40 = vpop.f32.mrf.mxu0 }
 0x214   : > { %2517 = vmatmul.mubr.msk.f32.vlgmr.msra.gmra.mxu1 %vm1263_vm13, %v1893_v44 }
 0x215   : > { %v2471_v35 = vpop.f32.mrf.mxu0 }
 0x216   : > { %v1784_v37 = vpop.permute.xlu1 %1783 }
 0x217   : > { %v1878_v41 = vsel %vm859_vm10, %v1870_v20, %v1784_v37  ;;  %v1368_v0 = vpop.f32.mrf.mxu0 }
 0x218   : > { %v1886_v62 = vsel %vm868_vm11, %v1878_v41, %v1805_v6 }
 0x21a   : > { %v1826_v28 = vpop.permute.xlu1 %1825 }
 0x21b   : > { %v1894_v56 = vsel %vm877_vm12, %v1886_v62, %v1826_v28 }
 0x21c   : > { %2519 = vmatprep.mubr.msk.f32.mxu1 %vm1263_vm13, %v1894_v56 }
 0x21d   : > { %2520 = vmatmul.mubr.msk.f32.gmra.mxu1 %vm1263_vm13, %v1895_v38  ;;  %v2490_v19 = vpop.f32.mrf.mxu1 }
 0x21e   : > { %v1496_v8 = vadd.f32 %v2490_v19, %v2468_v32 }
 0x21f   : > { %v1490_v4 = vpop.f32.mrf.mxu1 }
 0x220   : > { %v1491_v1 = vadd.f32 %v1490_v4, %v1358_v40 }
 0x229   : > { %v2474_v54 = vpop.f32.mrf.mxu0 }
 0x22b   : > { %v1378_v18 = vpop.f32.mrf.mxu0 }
 0x24d   : > { %v2493_v23 = vpop.f32.mrf.mxu1 }
 0x24e   : > { %v1506_v42 = vadd.f32 %v2493_v23, %v2471_v35 }
 0x24f   : > { %v1500_v53 = vpop.f32.mrf.mxu1 }
 0x250   : > { %v1501_v27 = vadd.f32 %v1500_v53, %v1368_v0 }
 0x255   : > { %v2477_v52 = vpop.f32.mrf.mxu0 }
 0x257   : > { %v1388_v47 = vpop.f32.mrf.mxu0 }
 0x280   : > { %v2496_v2 = vpop.f32.mrf.mxu1 }
 0x281   : > { %v1516_v51 = vadd.f32 %v2496_v2, %v2474_v54 }
 0x282   : > { %v1510_v29 = vpop.f32.mrf.mxu1 }
 0x283   : > { %v1511_v63 = vadd.f32 %v1510_v29, %v1378_v18 }
 0x288   : > { %v2512_v59 = vpop.f32.mrf.mxu0 }
 0x289   : > { %v2035_v12 = vadd.f32 %v2512_v59, %v1496_v8 }
 0x28a   : > { %v1995_v16 = vpop.f32.mrf.mxu0 }
 0x28b   : > { %2043 = vst.msk [vmem:[%s2748_s10 + $0x8] sm:$0xff] %vm823_vm6, %v2035_v12  ;;  %v2077_v39 = vmul.f32 %v2035_v12, %v2035_v12  ;;  %v2034_v45 = vadd.f32 %v1995_v16, %v1491_v1  ;;  %v2052_v17 = vsel %vm823_vm6, %v2035_v12, 0.0 }
 0x28d   : > { %2042 = vst.msk [vmem:[%s2748_s10] sm:$0xff] %vm823_vm6, %v2034_v45  ;;  %v2051_v57 = vsel %vm823_vm6, %v2034_v45, 0.0  ;;  %v2076_v15 = vmul.f32 %v2034_v45, %v2034_v45  ;;  %v2085_v5 = vsel %vm823_vm6, %v2077_v39, 0.0 }
 0x28e   : > { %v2053_v13 = vadd.f32 %v2052_v17, %v2051_v57 }
 0x28f   : > { %v2084_v21 = vsel %vm823_vm6, %v2076_v15, 0.0 }
 0x290   : > { %v2086_v50 = vadd.f32 %v2085_v5, %v2084_v21 }
 0x2a1   : > { %v2499_v10 = vpop.f32.mrf.mxu1 }
 0x2a2   : > { %v1526_v37 = vadd.f32 %v2499_v10, %v2477_v52 }
 0x2a3   : > { %v1520_v58 = vpop.f32.mrf.mxu1 }
 0x2a4   : > { %v1521_v43 = vadd.f32 %v1520_v58, %v1388_v47 }
 0x2b0   : > { %v2515_v36 = vpop.f32.mrf.mxu0 }
 0x2b1   : > { %v2037_v9 = vadd.f32 %v2515_v36, %v1506_v42  ;;  %v2075_v42 = vld [vmem:[%s2730_s20] sm:$0x1] }
 0x2b2   : > { %v2005_v48 = vpop.f32.mrf.mxu0 }
 0x2b3   : > { %2045 = vst.msk [vmem:[%s2748_s10 + $0x18] sm:$0xff] %vm823_vm6, %v2037_v9  ;;  %v2036_v46 = vadd.f32 %v2005_v48, %v1501_v27  ;;  %v2079_v60 = vmul.f32 %v2037_v9, %v2037_v9  ;;  %v2056_v33 = vsel %vm823_vm6, %v2037_v9, 0.0 }
 0x2b5   : > { %2044 = vst.msk [vmem:[%s2748_s10 + $0x10] sm:$0xff] %vm823_vm6, %v2036_v46  ;;  %v2078_v61 = vmul.f32 %v2036_v46, %v2036_v46  ;;  %v2054_v25 = vsel %vm823_vm6, %v2036_v46, 0.0  ;;  %v2089_v14 = vsel %vm823_vm6, %v2079_v60, 0.0 }
 0x2b6   : > { %v2055_v7 = vadd.f32 %v2054_v25, %v2053_v13 }
 0x2b7   : > { %v2087_v26 = vsel %vm823_vm6, %v2078_v61, 0.0 }
 0x2b8   : > { %v2088_v22 = vadd.f32 %v2087_v26, %v2086_v50  ;;  %v2057_v55 = vadd.f32 %v2056_v33, %v2055_v7  ;;  %v2050_v50 = vld [vmem:[%s2716_s11] sm:$0x1] }
 0x2ba   : > { %v2090_v20 = vadd.f32 %v2089_v14, %v2088_v22 }
 0x2d4   : > { %v2518_v31 = vpop.f32.mrf.mxu1 }
 0x2d5   : > { %v2039_v3 = vadd.f32 %v2518_v31, %v1516_v51 }
 0x2d6   : > { %v2015_v34 = vpop.f32.mrf.mxu1 }
 0x2d7   : > { %2047 = vst.msk [vmem:[%s2748_s10 + $0x28] sm:$0xff] %vm823_vm6, %v2039_v3  ;;  %v2038_v11 = vadd.f32 %v2015_v34, %v1511_v63  ;;  %v2081_v62 = vmul.f32 %v2039_v3, %v2039_v3  ;;  %v2060_v38 = vsel %vm823_vm6, %v2039_v3, 0.0 }
 0x2d9   : > { %2046 = vst.msk [vmem:[%s2748_s10 + $0x20] sm:$0xff] %vm823_vm6, %v2038_v11  ;;  %v2058_v44 = vsel %vm823_vm6, %v2038_v11, 0.0  ;;  %v2080_v49 = vmul.f32 %v2038_v11, %v2038_v11  ;;  %v2093_v35 = vsel %vm823_vm6, %v2081_v62, 0.0 }
 0x2da   : > { %v2059_v30 = vadd.f32 %v2058_v44, %v2057_v55 }
 0x2db   : > { %v2091_v24 = vsel %vm823_vm6, %v2080_v49, 0.0 }
 0x2dc   : > { %v2092_v41 = vadd.f32 %v2091_v24, %v2090_v20  ;;  %v2061_v40 = vadd.f32 %v2060_v38, %v2059_v30 }
 0x2dd   : > { %v2521_v6 = vpop.f32.mrf.mxu1 }
 0x2de   : > { %v2041_v28 = vadd.f32 %v2521_v6, %v1526_v37  ;;  %v2094_v52 = vadd.f32 %v2093_v35, %v2092_v41 }
 0x2df   : > { %v2025_v56 = vpop.f32.mrf.mxu1 }
 0x2e0   : > { %2049 = vst.msk [vmem:[%s2748_s10 + $0x38] sm:$0xff] %vm823_vm6, %v2041_v28  ;;  %v2040_v32 = vadd.f32 %v2025_v56, %v1521_v43  ;;  %v2083_v0 = vmul.f32 %v2041_v28, %v2041_v28  ;;  %v2064_v4 = vsel %vm823_vm6, %v2041_v28, 0.0 }
 0x2e2   : > { %2048 = vst.msk [vmem:[%s2748_s10 + $0x30] sm:$0xff] %vm823_vm6, %v2040_v32  ;;  %v2062_v54 = vsel %vm823_vm6, %v2040_v32, 0.0  ;;  %v2082_v18 = vmul.f32 %v2040_v32, %v2040_v32  ;;  %v2097_v1 = vsel %vm823_vm6, %v2083_v0, 0.0 }
 0x2e3   : > { %v2063_v19 = vadd.f32 %v2062_v54, %v2061_v40 }
 0x2e4   : > { %v2095_v47 = vsel %vm823_vm6, %v2082_v18, 0.0 }
 0x2e5   : > { %v2065_v8 = vadd.f32 %v2064_v4, %v2063_v19  ;;  %v2096_v59 = vadd.f32 %v2095_v47, %v2094_v52 }
 0x2e7   : > { %v2066_v12 = vrot.slane %v2065_v8, 4  ;;  %v2098_v16 = vadd.f32 %v2097_v1, %v2096_v59 }
 0x2e9   : > { %v2067_v39 = vadd.f32 %v2066_v12, %v2065_v8  ;;  %v2099_v45 = vrot.slane %v2098_v16, 4 }
 0x2eb   : > { %v2068_v17 = vrot.slane %v2067_v39, 2  ;;  %v2100_v57 = vadd.f32 %v2099_v45, %v2098_v16 }
 0x2ed   : > { %v2069_v15 = vadd.f32 %v2068_v17, %v2067_v39  ;;  %v2101_v13 = vrot.slane %v2100_v57, 2 }
 0x2ef   : > { %v2070_v5 = vrot.slane %v2069_v15, 1  ;;  %v2102_v21 = vadd.f32 %v2101_v13, %v2100_v57 }
 0x2f1   : > { %v2071_v23 = vadd.f32 %v2070_v5, %v2069_v15  ;;  %v2103_v53 = vrot.slane %v2102_v21, 1 }
 0x2f3   : > { %v2072_v36 = vadd.f32 %v2071_v23, %v2050_v50  ;;  %v2104_v27 = vadd.f32 %v2103_v53, %v2102_v21 }
 0x2f5   : > { %2074 = vst.msk [vmem:[%s2716_s11] sm:$0x1] %vm2073_vm14, %v2072_v36  ;;  %v2105_v9 = vadd.f32 %v2104_v27, %v2075_v42 }
 0x2f7   : > { %2106 = vst.msk [vmem:[%s2730_s20] sm:$0x1] %vm2073_vm14, %v2105_v9 }
 0x2f8 PF: > { %s17_s25 = sadd.s32 1, %s2620_s25   ;;  %s4115_s10 = sld [smem:[#allocation2_spill]] }
 0x2f9   : > { %p14_p11 = scmp.ge.s32.totalorder %s17_s25, 18   ;;  %s4116_s21 = smov %s2612_s23 }
 0x2fa   : > { %s4117_s22 = smov %s2616_s24  ;;  %s4118_s23 = smov %s4121_s26 }
 0x2fb   :  { %16 = sbr.rel (!%p14_p11) target bundleno = 4 (0x4), region = 102 }
 0x2fe   : > { %s4119_s24 = smov %s4115_s10 }

// kernel: double_conv_forward.4
= control target key start
LH: loop header
LB: loop body
LE: loop exit
PB: predicated region body
PF: predicated region fallthrough
CT: control target
= control target key end

     0   :  { %s2872_s27 = smov 0   ;;  %s2874_s28 = smov 0   ;;  %s4380_s0 = inlined_call_operand.vmem [shape: f32[2,8,8,8,8], index: 0, kind: input, shape index: {}, may-alias: {0,1,2}]   ;;  %s4381_s1 = inlined_call_operand.vmem [shape: f32[2,8,8,8,8], index: 1, kind: input, shape index: {}, may-alias: {0,1,2}]   ;;  %s4382_s2 = inlined_call_operand.vmem [shape: f32[2,8,8,8,8], index: 2, kind: input, shape index: {}, may-alias: {0,1,2}]   ;;  %s4383_s3 = inlined_call_operand.vmem [shape: f32[3,72,8], index: 3, kind: input, shape index: {}]   ;;  %s4384_s4 = inlined_call_operand.vmem [shape: f32[1,8], index: 4, kind: input, shape index: {}]   ;;  %s4385_s5 = inlined_call_operand.vmem [shape: f32[1,8], index: 5, kind: input, shape index: {}]   ;;  %s4386_s6 = inlined_call_operand.vmem [shape: f32[2,8,8,8,8], index: 6, kind: output, shape index: {0}]   ;;  %s4387_s7 = inlined_call_operand.vmem [shape: f32[2,1,8], index: 7, kind: output, shape index: {1}]   ;;  %s4388_s8 = inlined_call_operand.vmem [shape: f32[2,1,8], index: 8, kind: output, shape index: {2}]  }
   0x1   :  { %4395 = sst [smem:[#allocation24_spill]] %s4380_s0  ;;  %s2876_s29 = smov 0  }
   0x2   :  { %4396 = sst [smem:[#allocation25_spill]] %s4387_s7  ;;  %s2878_s30 = smov 0  }
   0x3   :  { %4397 = sst [smem:[#allocation26_spill]] %s4388_s8  ;;  %s2880_s9 = smov 0  }
   0x4 LB: > { %4398 = sst [smem:[#allocation2_spill]] %s2811_s30  ;;  %s28_s10 = sadd.s32 1, %s2807_s29  ;;  %s2815_s9 = sphi %s2880_s9, %s19_s9   ;;  %s2811_s30 = sphi %s2878_s30, %s4448_s30   ;;  %s2807_s29 = sphi %s2876_s29, %s4450_s29   ;;  %s2803_s28 = sphi %s2874_s28, %s4446_s28   ;;  %s2799_s27 = sphi %s2872_s27, %s4449_s27  }
   0x5   : > { %s31_s11 = sadd.s32 1, %s2811_s30  ;;  %p29_p0 = scmp.ge.s32.totalorder %s28_s10, 8 }
   0x6   : > { %p2470_p1 = scmp.ge.s32.totalorder %s2815_s9, 1  ;;  %p375_p2 = scmp.lt.s32.totalorder %s2815_s9, 17 }
   0x7   : > { %s4452_s10 = smov (%p29_p0, %s28_s10), 0  ;;  %s4454_s11 = smov (!%p29_p0, %s31_s11), %s2811_s30 }
   0x8   : > { %4399 = sst [smem:[#allocation3_spill]] %s4452_s10  ;;  %p376_p3 = pnand %p2470_p1, %p375_p2 }
   0x9   : > { %p33_p4 = scmp.ge.s32.totalorder %s4454_s11, 2 }
   0xa   : > { %379 = sbr.rel (%p376_p3) target bundleno = 762 (0x2fa), region = 44 }
   0xb   : > { %s4456_s11 = smov (%p33_p4, %s4454_s11), 0 }
   0xc   : > { %4400 = sst [smem:[#allocation4_spill]] %s4456_s11 }
   0xf   : > { %s2905_s12 = sadd.s32 4294967295, %s2799_s27  ;;  %p460_p5 = scmp.lt.s32.totalorder %s2803_s28, 1 }
  0x10   : > { %p456_p6 = scmp.gt.s32.totalorder %s2905_s12, 0  ;;  %p2471_p7 = scmp.lt.s32.totalorder %s2905_s12, 7 }
  0x11   : > { %s4458_s28 = smov (!%p460_p5, %s2803_s28), 1  ;;  %p474_p8 = scmp.gt.s32.totalorder %s2799_s27, 0 }
  0x12   : > { %s457_s13 = scalar_select %p456_p6, %s2905_s12, 0 }
  0x13   : > { %s2910_s14 = sshll.u32 %s4458_s28, 6  ;;  %p2479_p10 = scmp.lt.s32.totalorder %s2799_s27, 7 }
  0x14   : > { %s4460_s13 = smov (!%p2471_p7, %s457_s13), 7  ;;  %s2916_s16 = sadd.s32 1, %s2799_s27 }
  0x15   : > { %s475_s15 = scalar_select %p474_p8, %s2799_s27, 0 }
  0x16   : > { %p462_p9 = scmp.lt.s32.totalorder %s4460_s13, 7  ;;  %s4401_s7 = sld [smem:[#allocation25_spill]] }
  0x17   : > { %s4464_s15 = smov (!%p2479_p10, %s475_s15), 7  ;;  %p492_p11 = scmp.gt.s32.totalorder %s2916_s16, 0 }
  0x18   : > { %s4462_s13 = smov (!%p462_p9, %s4460_s13), 7  ;;  %p480_p12 = scmp.lt.s32.totalorder %s4464_s15, 7 }
  0x19   : > { %s2476_s20 = sshll.u32 %s4462_s13, 3  ;;  %s4402_s0 = sld [smem:[#allocation24_spill]] }
  0x1a   : > { %s466_s21 = sadd.s32 %s2910_s14, %s2476_s20  ;;  %s4403_s8 = sld [smem:[#allocation26_spill]] }
  0x1b   : > { %s2478_s22 = sshll.u32 %s466_s21, 3  ;;  %s4466_s15 = smov (!%p480_p12, %s4464_s15), 7 }
  0x1c   : > { %s2921_s19 = scalar_lea.vmem %s4401_s7, %s4458_s28  ;;  %s2484_s11 = sshll.u32 %s4466_s15, 3 }
  0x1d   : > { %s493_s7 = scalar_select %p492_p11, %s2916_s16, 0 }
  0x1e   : > { %p2487_p13 = scmp.lt.s32.totalorder %s2916_s16, 7  ;;  %s484_s13 = sadd.s32 %s2484_s11, %s2910_s14 }
  0x1f   : > { %s2930_s25 = scalar_lea.vmem %s4402_s0, %s2478_s22  ;;  %s2486_s20 = sshll.u32 %s484_s13, 3 }
  0x20   : > { %s2935_s18 = scalar_lea.vmem %s4403_s8, %s4458_s28  ;;  %s2943_s21 = scalar_lea.vmem %s4381_s1, %s2486_s20 }
  0x21   : > { %s4468_s7 = smov (!%p2487_p13, %s493_s7), 7  ;;  %p2498_p1 = scmp.ne.s32.totalorder %s2799_s27, 0 }
  0x22   : > { %s513_s22 = scalar_select %p2479_p10, %s2799_s27, 7 }
  0x23   : > { %p498_p0 = scmp.lt.s32.totalorder %s4468_s7, 7 }
  0x24   : > { %s2495_s23 = sshll.u32 %s513_s22, 3 }
  0x25   : > { %s4470_s7 = smov (!%p498_p0, %s4468_s7), 7  ;;  %s516_s28 = sadd.s32 %s2495_s23, %s2910_s14 }
  0x26   : > { %s2492_s24 = sshll.u32 %s4470_s7, 3  ;;  %s2497_s26 = sshll.u32 %s516_s28, 3 }
  0x27   : > { %s502_s17 = sadd.s32 %s2492_s24, %s2910_s14  ;;  %s2953_s11 = scalar_lea.vmem %s4386_s6, %s2497_s26 }
  0x28   : > { %s2494_s13 = sshll.u32 %s502_s17, 3  ;;  %528 = sbr.rel (%p2498_p1) target bundleno = 47 (0x2f), region = 48 }
  0x29   : > { %s2958_s10 = scalar_lea.vmem %s4382_s2, %s2494_s13 }
  0x2d   : > { %vm529_vm0 = vcmask 57344   ;;  %v2817_v0 = vmov 0.0  }
  0x2e   : > { %530 = vst.msk [vmem:[%s2921_s19] sm:$0x1] %vm529_vm0, %v2817_v0  ;;  %531 = vst.msk [vmem:[%s2935_s18] sm:$0x1] %vm529_vm0, %v2817_v0 }
  0x2f PF: > { %vm621_vm1 = vcmask 1040384   ;;  %vm656_vm2 = vcmask 1046528   ;;  %v2818_v1 = vmov 0.0   ;;  %v533_v3 = vld [vmem:[%s2930_s25 + $0x8] sm:$0xff]  ;;  %v2967_v4 = vld [vmem:[%s4384_s4] ss:$0 sm:$0xff] }
  0x30   : > { %v603_v2 = vrot.slane %v2818_v1, 7  ;;  %v2972_v5 = vld [vmem:[%s4385_s5] ss:$0 sm:$0xff]  ;;  %vm681_vm3 = vcmask 1045504   ;;  %v548_v6 = vmul.f32 %v2967_v4, %v533_v3  ;;  %p579_p2 = scmp.ge.s32.totalorder %s2905_s12, 0  ;;  %p580_p3 = scmp.lt.s32.totalorder %s2905_s12, 8 }
  0x31   : > { %v532_v7 = vld [vmem:[%s2930_s25] sm:$0xff]  ;;  %v534_v8 = vld [vmem:[%s2930_s25 + $0x10] sm:$0xff]  ;;  %v535_v9 = vld [vmem:[%s2930_s25 + $0x18] sm:$0xff]  ;;  %s2819_s12 = smov 8   ;;  %s2820_s28 = smov 16   ;;  %vm906_vm4 = vcmask 64512  }
  0x32   : > { %v2981_v10 = vsel %vm621_vm1, 0.0, %v603_v2  ;;  %v631_v11 = vsel %vm621_vm1, %v603_v2, 0.0  ;;  %v547_v12 = vmul.f32 %v2967_v4, %v532_v7  ;;  %v549_v13 = vmul.f32 %v2967_v4, %v534_v8  ;;  %v536_v14 = vld [vmem:[%s2930_s25 + $0x20] sm:$0xff]  ;;  %v537_v15 = vld [vmem:[%s2930_s25 + $0x28] sm:$0xff]  ;;  %p2994_p4 = pnand %p580_p3, %p579_p2  ;;  %v538_v24 = vld [vmem:[%s2930_s25 + $0x30] sm:$0xff]  ;;  %p1019_p5 = scmp.ge.s32.totalorder %s2799_s27, 0 }
  0x33   : > { %v657_v16 = vrot.slane %v2981_v10, 1  ;;  %v658_v17 = vrot.slane %v631_v11, 1  ;;  %v682_v18 = vrot.slane %v2981_v10, 2  ;;  %v683_v19 = vrot.slane %v631_v11, 2  ;;  %p1020_p6 = scmp.lt.s32.totalorder %s2799_s27, 8  ;;  %s2822_s17 = smov 32  }
  0x34   : > { %v563_v20 = vadd.f32 %v2972_v5, %v548_v6  ;;  %v562_v21 = vadd.f32 %v2972_v5, %v547_v12  ;;  %v564_v22 = vadd.f32 %v2972_v5, %v549_v13  ;;  %v550_v23 = vmul.f32 %v2967_v4, %v535_v9  ;;  %s2501_s22 = scalar_select %p2994_p4, 0, 1 }
  0x35   : > { %v3004_v25 = vsel %vm656_vm2, %v657_v16, %v658_v17  ;;  %v551_v26 = vmul.f32 %v2967_v4, %v536_v14  ;;  %v552_v27 = vmul.f32 %v2967_v4, %v537_v15  ;;  %v3014_v32 = vsel %vm681_vm3, %v682_v18, %v683_v19  ;;  %p3108_p7 = pnand %p1020_p6, %p1019_p5  ;;  %s2823_s30 = smov 40  }
  0x36   : > { %714 = vrot.lane.b32.xlu0 %v3004_v25, %s2819_s12  ;;  %v571_v28 = vmax.f32 %v563_v20, 0.0  ;;  %v570_v29 = vmax.f32 %v562_v21, 0.0  ;;  %v572_v30 = vmax.f32 %v564_v22, 0.0  ;;  %v565_v31 = vadd.f32 %v2972_v5, %v550_v23  ;;  %s584_s23 = scvt.s32.f32 %s2501_s22  ;;  %s2824_s15 = smov 48  }
  0x37   : > { %v566_v33 = vadd.f32 %v2972_v5, %v551_v26  ;;  %v567_v34 = vadd.f32 %v2972_v5, %v552_v27  ;;  %v553_v35 = vmul.f32 %v2967_v4, %v538_v24  ;;  %s2502_s24 = scalar_select %p3108_p7, 0, 1  ;;  %vm915_vm5 = vcmask 130048  }
  0x38   : > { %v573_v36 = vmax.f32 %v565_v31, 0.0  ;;  %v3019_v37 = vstv %s584_s23  ;;  %s2825_s22 = smov 56   ;;  %s2826_s23 = smov 64   ;;  %vm924_vm6 = vcmask 195584   ;;  %vm933_vm7 = vcmask 261120  }
  0x39   : > { %v574_v38 = vmax.f32 %v566_v33, 0.0  ;;  %v575_v39 = vmax.f32 %v567_v34, 0.0  ;;  %v568_v40 = vadd.f32 %v2972_v5, %v553_v35  ;;  %v587_v41 = vmul.f32 %v3019_v37, %v571_v28  ;;  %s1024_s26 = scvt.s32.f32 %s2502_s24  ;;  %p1679_p8 = scmp.ge.s32.totalorder %s2916_s16, 0 }
  0x3a   : > { %738 = vrot.lane.b32.xlu0 %v3014_v32, %s2820_s28  ;;  %v586_v42 = vmul.f32 %v3019_v37, %v570_v29  ;;  %v588_v43 = vmul.f32 %v3019_v37, %v572_v30  ;;  %v589_v44 = vmul.f32 %v3019_v37, %v573_v36  ;;  %p1680_p9 = scmp.lt.s32.totalorder %s2916_s16, 8  ;;  %vm942_vm8 = vcmask 326656  }
  0x3b   : > { %v590_v45 = vmul.f32 %v3019_v37, %v574_v38  ;;  %v591_v46 = vmul.f32 %v3019_v37, %v575_v39  ;;  %v576_v47 = vmax.f32 %v568_v40, 0.0  ;;  %v605_v48 = vrot.slane %v587_v41, 7  ;;  %v987_v40 = vld [vmem:[%s2943_s21] sm:$0xff] }
  0x3c   : > { %v604_v49 = vrot.slane %v586_v42, 7  ;;  %v606_v50 = vrot.slane %v588_v43, 7  ;;  %v607_v51 = vrot.slane %v589_v44, 7  ;;  %p3455_p10 = pnand %p1680_p9, %p1679_p8  ;;  %vm951_vm9 = vcmask 392192  }
  0x3d   : > { %v608_v52 = vrot.slane %v590_v45, 7  ;;  %v609_v53 = vrot.slane %v591_v46, 7  ;;  %v592_v54 = vmul.f32 %v3019_v37, %v576_v47  ;;  %v3032_v55 = vsel %vm621_vm1, 0.0, %v605_v48 }
  0x3e   : > { %v633_v56 = vsel %vm621_vm1, %v605_v48, 0.0  ;;  %v3036_v57 = vsel %vm621_vm1, 0.0, %v604_v49  ;;  %v632_v58 = vsel %vm621_vm1, %v604_v49, 0.0  ;;  %v663_v59 = vrot.slane %v3032_v55, 1  ;;  %s2528_s16 = scalar_select %p3455_p10, 0, 1 }
  0x3f   : > { %v664_v60 = vrot.slane %v633_v56, 1  ;;  %v660_v61 = vrot.slane %v3036_v57, 1  ;;  %v661_v62 = vrot.slane %v632_v58, 1  ;;  %v3042_v63 = vsel %vm621_vm1, 0.0, %v606_v50 }
  0x40   : > { %4405 = vst [vmem:[#allocation5_spill] sm:$0xff] %v3042_v63  ;;  %v634_v0 = vsel %vm621_vm1, %v606_v50, 0.0  ;;  %v3046_v1 = vsel %vm621_vm1, 0.0, %v607_v51  ;;  %v635_v2 = vsel %vm621_vm1, %v607_v51, 0.0  ;;  %v666_v7 = vrot.slane %v3042_v63, 1  ;;  %s1684_s27 = scvt.s32.f32 %s2528_s16 }
  0x41   : > { %4406 = vst [vmem:[#allocation6_spill] sm:$0xff] %v3046_v1  ;;  %v3050_v3 = vsel %vm656_vm2, %v663_v59, %v664_v60  ;;  %v3053_v6 = vsel %vm656_vm2, %v660_v61, %v661_v62  ;;  %v667_v8 = vrot.slane %v634_v0, 1  ;;  %v669_v9 = vrot.slane %v3046_v1, 1 }
  0x42   : > { %718 = vrot.lane.b32.xlu1 %v3050_v3, %s2819_s12  ;;  %716 = vrot.lane.b32.xlu0 %v3053_v6, %s2819_s12  ;;  %v670_v11 = vrot.slane %v635_v2, 1  ;;  %v3062_v12 = vsel %vm621_vm1, 0.0, %v608_v52  ;;  %v636_v13 = vsel %vm621_vm1, %v608_v52, 0.0  ;;  %v3070_v17 = vsel %vm621_vm1, 0.0, %v609_v53  ;;  %v539_v52 = vld [vmem:[%s2930_s25 + $0x38] sm:$0xff]  ;;  %s2821_s25 = smov 24  }
  0x43   : > { %v3066_v14 = vsel %vm656_vm2, %v666_v7, %v667_v8  ;;  %v672_v15 = vrot.slane %v3062_v12, 1  ;;  %v673_v16 = vrot.slane %v636_v13, 1  ;;  %v637_v19 = vsel %vm621_vm1, %v609_v53, 0.0  ;;  %v988_v7 = vld [vmem:[%s2943_s21 + $0x8] sm:$0xff] }
  0x44   : > { %v3073_v18 = vsel %vm656_vm2, %v669_v9, %v670_v11  ;;  %v675_v20 = vrot.slane %v3070_v17, 1  ;;  %v610_v21 = vrot.slane %v592_v54, 7  ;;  %v676_v22 = vrot.slane %v637_v19, 1 }
  0x45   : > { %v3082_v23 = vsel %vm656_vm2, %v672_v15, %v673_v16  ;;  %v688_v27 = vrot.slane %v3032_v55, 2  ;;  %v689_v31 = vrot.slane %v633_v56, 2  ;;  %v685_v33 = vrot.slane %v3036_v57, 2 }
  0x46   : > { %720 = vrot.lane.b32.xlu1 %v3066_v14, %s2819_s12  ;;  %722 = vrot.lane.b32.xlu0 %v3073_v18, %s2819_s12  ;;  %v3085_v24 = vsel %vm621_vm1, 0.0, %v610_v21  ;;  %v638_v26 = vsel %vm621_vm1, %v610_v21, 0.0  ;;  %v3090_v28 = vsel %vm656_vm2, %v675_v20, %v676_v22  ;;  %v686_v34 = vrot.slane %v632_v58, 2 }
  0x47   : > { %v678_v29 = vrot.slane %v3085_v24, 1  ;;  %v679_v30 = vrot.slane %v638_v26, 1  ;;  %v3104_v36 = vsel %vm681_vm3, %v688_v27, %v689_v31  ;;  %v694_v38 = vrot.slane %v3046_v1, 2 }
  0x48   : > { %v695_v39 = vrot.slane %v635_v2, 2  ;;  %v3117_v41 = vsel %vm681_vm3, %v685_v33, %v686_v34  ;;  %v691_v42 = vrot.slane %v3042_v63, 2  ;;  %v692_v44 = vrot.slane %v634_v0, 2 }
  0x49   : > { %v3101_v35 = vsel %vm656_vm2, %v678_v29, %v679_v30  ;;  %v700_v45 = vrot.slane %v3070_v17, 2  ;;  %v701_v46 = vrot.slane %v637_v19, 2  ;;  %v995_v47 = vmul.f32 %v2967_v4, %v987_v40 }
  0x4a   : > { %724 = vrot.lane.b32.xlu1 %v3082_v23, %s2819_s12  ;;  %726 = vrot.lane.b32.xlu0 %v3090_v28, %s2819_s12  ;;  %v3121_v43 = vsel %vm681_vm3, %v694_v38, %v695_v39  ;;  %v3132_v48 = vsel %vm681_vm3, %v691_v42, %v692_v44  ;;  %v697_v50 = vrot.slane %v3062_v12, 2  ;;  %v698_v51 = vrot.slane %v636_v13, 2  ;;  %v989_v13 = vld [vmem:[%s2943_s21 + $0x10] sm:$0xff] }
  0x4b   : > { %v3135_v49 = vsel %vm681_vm3, %v700_v45, %v701_v46  ;;  %v1003_v53 = vadd.f32 %v2972_v5, %v995_v47  ;;  %v703_v56 = vrot.slane %v3085_v24, 2  ;;  %v704_v58 = vrot.slane %v638_v26, 2 }
  0x4c   : > { %v3145_v54 = vsel %vm681_vm3, %v697_v50, %v698_v51  ;;  %v554_v59 = vmul.f32 %v2967_v4, %v539_v52  ;;  %v3149_v61 = vstv %s1024_s26  ;;  %v996_v11 = vmul.f32 %v2967_v4, %v988_v7 }
  0x4d   : > { %v1011_v60 = vmax.f32 %v1003_v53, 0.0  ;;  %v3156_v62 = vsel %vm681_vm3, %v703_v56, %v704_v58  ;;  %v997_v21 = vmul.f32 %v2967_v4, %v989_v13  ;;  %v990_v53 = vld [vmem:[%s2943_s21 + $0x18] sm:$0xff]  ;;  %v991_v13 = vld [vmem:[%s2943_s21 + $0x20] sm:$0xff]  ;;  %vm960_vm10 = vcmask 457728  }
  0x4e   : > { %728 = vrot.lane.b32.xlu1 %v3101_v35, %s2819_s12  ;;  %742 = vrot.lane.b32.xlu0 %v3104_v36, %s2820_s28  ;;  %v569_v0 = vadd.f32 %v2972_v5, %v554_v59  ;;  %v1004_v20 = vadd.f32 %v2972_v5, %v996_v11  ;;  %v2511_v59 = vld [vmem:[%s4383_s3 + $0x88] sm:$0xff]  ;;  %v2509_v11 = vld [vmem:[%s4383_s3 + $0x78] sm:$0xff]  ;;  %vm969_vm11 = vcmask 523264   ;;  %vm1387_vm12 = vcmask 588800  }
  0x4f   : > { %v1026_v2 = vmul.f32 %v3149_v61, %v1011_v60  ;;  %v1005_v29 = vadd.f32 %v2972_v5, %v997_v21  ;;  %2617 = vmatprep.subr.mxu0 %v2511_v59  ;;  %v998_v60 = vmul.f32 %v2967_v4, %v990_v53  ;;  %vm2215_vm13 = vcmask 57344  }
  0x50   : > { %v577_v8 = vmax.f32 %v569_v0, 0.0  ;;  %v1012_v27 = vmax.f32 %v1004_v20, 0.0  ;;  %v2510_v0 = vld [vmem:[%s4383_s3 + $0x80] sm:$0xff]  ;;  %2618 = vmatpush3.msra.mxu0 %v2511_v59 }
  0x51   : > { %v1042_v9 = vrot.slane %v1026_v2, 7  ;;  %v1013_v34 = vmax.f32 %v1005_v29, 0.0  ;;  %2619 = vmatprep.subr.mxu0 %v2510_v0  ;;  %v1006_v21 = vadd.f32 %v2972_v5, %v998_v60 }
  0x52   : > { %740 = vrot.lane.b32.xlu1 %v3117_v41, %s2820_s28  ;;  %746 = vrot.lane.b32.xlu0 %v3121_v43, %s2820_s28  ;;  %v3172_v15 = vmul.f32 %v3019_v37, %v577_v8  ;;  %v1027_v33 = vmul.f32 %v3149_v61, %v1012_v27 }
  0x53   : > { %v3175_v16 = vsel %vm621_vm1, 0.0, %v1042_v9  ;;  %v1066_v19 = vsel %vm621_vm1, %v1042_v9, 0.0  ;;  %v1028_v40 = vmul.f32 %v3149_v61, %v1013_v34  ;;  %2620 = vmatpush3.msra.mxu0 %v2510_v0  ;;  %v2506_v34 = vld [vmem:[%s4383_s3 + $0x60] sm:$0xff] }
  0x54   : > { %v4390_v22 = vrot.slane %v3172_v15, 7  ;;  %v1088_v37 = vrot.slane %v3175_v16, 1  ;;  %v1089_v26 = vrot.slane %v1066_v19, 1  ;;  %v1109_v38 = vrot.slane %v3175_v16, 2  ;;  %2621 = vmatprep.subr.mxu0 %v2509_v11 }
  0x55   : > { %v1110_v39 = vrot.slane %v1066_v19, 2  ;;  %v1044_v46 = vrot.slane %v1028_v40, 7  ;;  %v2508_v19 = vld [vmem:[%s4383_s3 + $0x70] sm:$0xff]  ;;  %2622 = vmatpush3.msra.mxu0 %v2509_v11 }
  0x56   : > { %744 = vrot.lane.b32.xlu1 %v3132_v48, %s2820_s28  ;;  %750 = vrot.lane.b32.xlu0 %v3135_v49, %s2820_s28  ;;  %v3194_v30 = vsel %vm621_vm1, 0.0, %v4390_v22  ;;  %v1090_v31 = vsel %vm656_vm2, %v1088_v37, %v1089_v26  ;;  %v999_v37 = vmul.f32 %v2967_v4, %v991_v13  ;;  %v2507_v26 = vld [vmem:[%s4383_s3 + $0x68] sm:$0xff] }
  0x57   : > { %v1111_v42 = vsel %vm681_vm3, %v1109_v38, %v1110_v39  ;;  %v3218_v56 = vsel %vm621_vm1, 0.0, %v1044_v46  ;;  %v1068_v58 = vsel %vm621_vm1, %v1044_v46, 0.0  ;;  %2623 = vmatprep.subr.mxu0 %v2508_v19  ;;  %v2505_v38 = vld [vmem:[%s4383_s3 + $0x58] sm:$0xff] }
  0x58   : > { %v1094_v8 = vrot.slane %v3218_v56, 1  ;;  %v1095_v9 = vrot.slane %v1068_v58, 1  ;;  %v1115_v27 = vrot.slane %v3218_v56, 2  ;;  %v1116_v29 = vrot.slane %v1068_v58, 2  ;;  %2624 = vmatpush3.msra.mxu0 %v2508_v19  ;;  %v992_v19 = vld [vmem:[%s2943_s21 + $0x28] sm:$0xff] }
  0x59   : > { %2625 = vmatprep.subr.mxu0 %v2507_v26 }
  0x5a   : > { %748 = vrot.lane.b32.xlu1 %v3145_v54, %s2820_s28  ;;  %762 = vrot.lane.b32.xlu0 %v3036_v57, %s2821_s25  ;;  %v1096_v20 = vsel %vm656_vm2, %v1094_v8, %v1095_v9  ;;  %v1117_v39 = vsel %vm681_vm3, %v1115_v27, %v1116_v29 }
  0x5b   : > { %2626 = vmatpush3.msra.mxu0 %v2507_v26 }
  0x5c   : > { %2627 = vmatprep.subr.mxu0 %v2506_v34 }
  0x5d   : > { %2628 = vmatpush3.msra.mxu0 %v2506_v34  ;;  %v993_v34 = vld [vmem:[%s2943_s21 + $0x30] sm:$0xff] }
  0x5e   : > { %752 = vrot.lane.b32.xlu1 %v3156_v62, %s2820_s28  ;;  %766 = vrot.lane.b32.xlu0 %v3042_v63, %s2821_s25 }
  0x5f   : > { %2629 = vmatprep.subr.mxu0 %v2505_v38 }
  0x60   : > { %2630 = vmatpush3.msra.mxu0 %v2505_v38 }
  0x62   : > { %764 = vrot.lane.b32.xlu1 %v3032_v55, %s2821_s25  ;;  %770 = vrot.lane.b32.xlu0 %v3062_v12, %s2821_s25 }
  0x66   : > { %768 = vrot.lane.b32.xlu1 %v3046_v1, %s2821_s25  ;;  %774 = vrot.lane.b32.xlu0 %v3085_v24, %s2821_s25 }
  0x6a   : > { %772 = vrot.lane.b32.xlu1 %v3070_v17, %s2821_s25  ;;  %786 = vrot.lane.b32.xlu0 %v3053_v6, %s2822_s17  ;;  %v1043_v6 = vrot.slane %v1027_v33, 7  ;;  %v1007_v33 = vadd.f32 %v2972_v5, %v999_v37 }
  0x6c   : > { %v3209_v44 = vsel %vm621_vm1, 0.0, %v1043_v6  ;;  %v1067_v45 = vsel %vm621_vm1, %v1043_v6, 0.0  ;;  %v1015_v40 = vmax.f32 %v1007_v33, 0.0 }
  0x6d   : > { %v1091_v47 = vrot.slane %v3209_v44, 1  ;;  %v1092_v50 = vrot.slane %v1067_v45, 1  ;;  %v1112_v51 = vrot.slane %v3209_v44, 2  ;;  %v1113_v52 = vrot.slane %v1067_v45, 2 }
  0x6e   : > { %776 = vrot.lane.b32.xlu1 %v3194_v30, %s2821_s25  ;;  %1138 = vrot.lane.b32.xlu0 %v1090_v31, %s2819_s12  ;;  %v1030_v46 = vmul.f32 %v3149_v61, %v1015_v40 }
  0x6f   : > { %v1093_v2 = vsel %vm656_vm2, %v1091_v47, %v1092_v50  ;;  %v1114_v7 = vsel %vm681_vm3, %v1112_v51, %v1113_v52  ;;  %v2503_v47 = vld [vmem:[%s4383_s3 + $0x48] sm:$0xff] }
  0x70   : > { %v1046_v52 = vrot.slane %v1030_v46, 7 }
  0x72   : > { %788 = vrot.lane.b32.xlu1 %v3050_v3, %s2822_s17  ;;  %1180 = vrot.lane.b32.xlu0 %v3175_v16, %s2821_s25  ;;  %v3286_v59 = vsel %vm621_vm1, 0.0, %v1046_v52  ;;  %v1070_v60 = vsel %vm621_vm1, %v1046_v52, 0.0 }
  0x73   : > { %v1101_v8 = vrot.slane %v1070_v60, 1  ;;  %v1122_v37 = vrot.slane %v1070_v60, 2 }
  0x76   : > { %1159 = vrot.lane.b32.xlu1 %v1111_v42, %s2820_s28  ;;  %1204 = vrot.lane.b32.xlu0 %v1090_v31, %s2822_s17  ;;  %v1014_v31 = vmax.f32 %v1006_v21, 0.0  ;;  %v1121_v21 = vrot.slane %v3286_v59, 2 }
  0x78   : > { %v1029_v6 = vmul.f32 %v3149_v61, %v1014_v31  ;;  %v1123_v26 = vsel %vm681_vm3, %v1121_v21, %v1122_v37  ;;  %v984_v21 = vld [vmem:[%s4383_s3 + $0x30] sm:$0xff] }
  0x7a   : > { %1182 = vrot.lane.b32.xlu1 %v3209_v44, %s2821_s25  ;;  %1228 = vrot.lane.b32.xlu0 %v1111_v42, %s2823_s30  ;;  %v2504_v42 = vld [vmem:[%s4383_s3 + $0x50] sm:$0xff]  ;;  %v1045_v45 = vrot.slane %v1029_v6, 7  ;;  %v1001_v6 = vmul.f32 %v2967_v4, %v993_v34 }
  0x7b   : > { %2631 = vmatprep.subr.mxu0 %v2504_v42 }
  0x7c   : > { %2632 = vmatpush3.msra.mxu0 %v2504_v42  ;;  %v3277_v50 = vsel %vm621_vm1, 0.0, %v1045_v45  ;;  %v1069_v51 = vsel %vm621_vm1, %v1045_v45, 0.0 }
  0x7d   : > { %2633 = vmatprep.subr.mxu0 %v2503_v47  ;;  %v1097_v53 = vrot.slane %v3277_v50, 1  ;;  %v1098_v58 = vrot.slane %v1069_v51, 1  ;;  %v1118_v11 = vrot.slane %v3277_v50, 2  ;;  %v1119_v13 = vrot.slane %v1069_v51, 2 }
  0x7e   : > { %1206 = vrot.lane.b32.xlu1 %v1093_v2, %s2822_s17  ;;  %1230 = vrot.lane.b32.xlu0 %v1114_v7, %s2823_s30 }
  0x7f   : > { %2634 = vmatpush3.msra.mxu0 %v2503_v47  ;;  %v1099_v0 = vsel %vm656_vm2, %v1097_v53, %v1098_v58 }
  0x82   : > { %1140 = vrot.lane.b32.xlu1 %v1093_v2, %s2819_s12  ;;  %1142 = vrot.lane.b32.xlu0 %v1096_v20, %s2819_s12 }
  0x86   : > { %1252 = vrot.lane.b32.xlu1 %v3209_v44, %s2824_s15  ;;  %1254 = vrot.lane.b32.xlu0 %v3218_v56, %s2824_s15 }
  0x8a   : > { %1161 = vrot.lane.b32.xlu1 %v1114_v7, %s2820_s28  ;;  %1163 = vrot.lane.b32.xlu0 %v1117_v39, %s2820_s28 }
  0x8e   : > { %1273 = vrot.lane.b32.xlu1 %v1093_v2, %s2825_s22  ;;  %1275 = vrot.lane.b32.xlu0 %v1096_v20, %s2825_s22  ;;  %v1100_v2 = vrot.slane %v3286_v59, 1 }
  0x90   : > { %v1102_v9 = vsel %vm656_vm2, %v1100_v2, %v1101_v8 }
  0x92   : > { %1184 = vrot.lane.b32.xlu1 %v3218_v56, %s2821_s25  ;;  %1186 = vrot.lane.b32.xlu0 %v3277_v50, %s2821_s25 }
  0x96   : > { %1294 = vrot.lane.b32.xlu1 %v1114_v7, %s2826_s23  ;;  %1296 = vrot.lane.b32.xlu0 %v1117_v39, %s2826_s23  ;;  %v1120_v7 = vsel %vm681_vm3, %v1118_v11, %v1119_v13 }
  0x9a   : > { %1208 = vrot.lane.b32.xlu1 %v1096_v20, %s2822_s17  ;;  %1210 = vrot.lane.b32.xlu0 %v1099_v0, %s2822_s17  ;;  %v1000_v20 = vmul.f32 %v2967_v4, %v992_v19 }
  0x9c   : > { %v1008_v27 = vadd.f32 %v2972_v5, %v1000_v20 }
  0x9e   : > { %1144 = vrot.lane.b32.xlu1 %v1099_v0, %s2819_s12  ;;  %1146 = vrot.lane.b32.xlu0 %v1102_v9, %s2819_s12  ;;  %v1016_v29 = vmax.f32 %v1008_v27, 0.0 }
  0xa0   : > { %v1031_v33 = vmul.f32 %v3149_v61, %v1016_v29 }
  0xa2   : > { %1232 = vrot.lane.b32.xlu1 %v1117_v39, %s2823_s30  ;;  %1234 = vrot.lane.b32.xlu0 %v1120_v7, %s2823_s30  ;;  %v1047_v39 = vrot.slane %v1031_v33, 7 }
  0xa4   : > { %v3327_v40 = vsel %vm621_vm1, 0.0, %v1047_v39  ;;  %v1071_v46 = vsel %vm621_vm1, %v1047_v39, 0.0  ;;  %v983_v39 = vld [vmem:[%s4383_s3 + $0x28] sm:$0xff] }
  0xa5   : > { %v1103_v47 = vrot.slane %v3327_v40, 1  ;;  %v1104_v51 = vrot.slane %v1071_v46, 1  ;;  %v1124_v37 = vrot.slane %v3327_v40, 2  ;;  %v1125_v20 = vrot.slane %v1071_v46, 2 }
  0xa6   : > { %1165 = vrot.lane.b32.xlu1 %v1120_v7, %s2820_s28  ;;  %1167 = vrot.lane.b32.xlu0 %v1123_v26, %s2820_s28 }
  0xa7   : > { %v3347_v60 = vsel %vm656_vm2, %v1103_v47, %v1104_v51 }
  0xa8   : > { %v3309_v31 = vpop.permute.xlu0 %714 }
  0xaa   : > { %1256 = vrot.lane.b32.xlu1 %v3277_v50, %s2824_s15  ;;  %1258 = vrot.lane.b32.xlu0 %v3286_v59, %s2824_s15 }
  0xac   : > { %v3321_v38 = vpop.permute.xlu0 %738 }
  0xae   : > { %1188 = vrot.lane.b32.xlu1 %v3286_v59, %s2821_s25  ;;  %810 = vrot.lane.b32.xlu0 %v3117_v41, %s2823_s30  ;;  %v1009_v41 = vadd.f32 %v2972_v5, %v1001_v6  ;;  %v3390_v6 = vsel %vm681_vm3, %v1124_v37, %v1125_v20 }
  0xb0   : > { %v1017_v58 = vmax.f32 %v1009_v41, 0.0 }
  0xb2   : > { %1277 = vrot.lane.b32.xlu1 %v1099_v0, %s2825_s22  ;;  %1212 = vrot.lane.b32.xlu0 %v1102_v9, %s2822_s17  ;;  %v1032_v8 = vmul.f32 %v3149_v61, %v1017_v58 }
  0xb4   : > { %v3329_v42 = vpop.permute.xlu1 %718  ;;  %v3331_v45 = vpop.permute.xlu0 %716  ;;  %v1048_v19 = vrot.slane %v1032_v8, 7 }
  0xb6   : > { %1190 = vrot.lane.b32.xlu1 %v3327_v40, %s2821_s25  ;;  %1298 = vrot.lane.b32.xlu0 %v1120_v7, %s2826_s23  ;;  %v985_v7 = vld [vmem:[%s4383_s3 + $0x38] sm:$0xff]  ;;  %v3380_v33 = vsel %vm621_vm1, 0.0, %v1048_v19  ;;  %v1072_v34 = vsel %vm621_vm1, %v1048_v19, 0.0 }
  0xb7   : > { %4414 = vst [vmem:[#allocation13_spill] sm:$0xff] %v3380_v33  ;;  %v1106_v46 = vrot.slane %v3380_v33, 1  ;;  %v1107_v41 = vrot.slane %v1072_v34, 1  ;;  %v994_v19 = vld [vmem:[%s2943_s21 + $0x38] sm:$0xff] }
  0xb8   : > { %v3339_v52 = vpop.permute.xlu1 %720  ;;  %v3341_v53 = vpop.permute.xlu0 %722 }
  0xb9   : > { %4408 = vst [vmem:[#allocation7_spill] sm:$0xff] %v3339_v52  ;;  %4409 = vst [vmem:[#allocation8_spill] sm:$0xff] %v3341_v53  ;;  %v3408_v58 = vsel %vm656_vm2, %v1106_v46, %v1107_v41  ;;  %v978_v46 = vld [vmem:[%s4383_s3] sm:$0xff]  ;;  %v1127_v41 = vrot.slane %v3380_v33, 2 }
  0xba   : > { %1279 = vrot.lane.b32.xlu1 %v1102_v9, %s2825_s22  ;;  %834 = vrot.lane.b32.xlu0 %v3032_v55, %s2824_s15  ;;  %v986_v9 = vld [vmem:[%s4383_s3 + $0x40] sm:$0xff] }
  0xbb   : > { %2647 = vmatprep.subr.mxu1 %v986_v9 }
  0xbc   : > { %v3349_v0 = vpop.permute.xlu1 %724  ;;  %v3351_v2 = vpop.permute.xlu0 %726  ;;  %2648 = vmatpush3.msra.mxu1 %v986_v9 }
  0xbd   : > { %4410 = vst [vmem:[#allocation9_spill] sm:$0xff] %v3349_v0  ;;  %4411 = vst [vmem:[#allocation10_spill] sm:$0xff] %v3351_v2  ;;  %2649 = vmatprep.subr.mxu1 %v985_v7 }
  0xbe   : > { %812 = vrot.lane.b32.xlu1 %v3104_v36, %s2823_s30  ;;  %1214 = vrot.lane.b32.xlu0 %v3347_v60, %s2822_s17 }
  0xbf   : > { %2650 = vmatpush3.msra.mxu1 %v985_v7  ;;  %v980_v7 = vld [vmem:[%s4383_s3 + $0x10] sm:$0xff] }
  0xc0   : > { %v3361_v11 = vpop.permute.xlu1 %728  ;;  %v3363_v13 = vpop.permute.xlu0 %742  ;;  %2651 = vmatprep.subr.mxu1 %v984_v21 }
  0xc1   : > { %4412 = vst [vmem:[#allocation11_spill] sm:$0xff] %v3361_v11  ;;  %2652 = vmatpush3.msra.mxu1 %v984_v21  ;;  %v1002_v21 = vmul.f32 %v2967_v4, %v994_v19 }
  0xc2   : > { %1148 = vrot.lane.b32.xlu1 %v3347_v60, %s2819_s12  ;;  %1300 = vrot.lane.b32.xlu0 %v1123_v26, %s2826_s23 }
  0xc3   : > { %2653 = vmatprep.subr.mxu1 %v983_v39 }
  0xc4   : > { %v3375_v27 = vpop.permute.xlu1 %740  ;;  %v3377_v29 = vpop.permute.xlu0 %746  ;;  %2654 = vmatpush3.msra.mxu1 %v983_v39  ;;  %v979_v39 = vld [vmem:[%s4383_s3 + $0x8] sm:$0xff] }
  0xc5   : > { %4413 = vst [vmem:[#allocation12_spill] sm:$0xff] %v3377_v29 }
  0xc6   : > { %1236 = vrot.lane.b32.xlu1 %v1123_v26, %s2823_s30  ;;  %858 = vrot.lane.b32.xlu0 %v3050_v3, %s2825_s22  ;;  %v982_v26 = vld [vmem:[%s4383_s3 + $0x20] sm:$0xff]  ;;  %v981_v3 = vld [vmem:[%s4383_s3 + $0x18] sm:$0xff] }
  0xc7   : > { %2655 = vmatprep.subr.mxu1 %v982_v26 }
  0xc8   : > { %v3393_v47 = vpop.permute.xlu1 %744  ;;  %v3395_v51 = vpop.permute.xlu0 %750  ;;  %2656 = vmatpush3.msra.mxu1 %v982_v26  ;;  %v1128_v26 = vrot.slane %v1072_v34, 2 }
  0xc9   : > { %4415 = vst [vmem:[#allocation14_spill] sm:$0xff] %v3393_v47  ;;  %4416 = vst [vmem:[#allocation15_spill] sm:$0xff] %v3395_v51  ;;  %2657 = vmatprep.subr.mxu1 %v981_v3  ;;  %v1646_v51 = vld [vmem:[%s2958_s10] sm:$0xff] }
  0xca   : > { %836 = vrot.lane.b32.xlu1 %v3042_v63, %s2824_s15  ;;  %1169 = vrot.lane.b32.xlu0 %v3390_v6, %s2820_s28  ;;  %v1647_v63 = vld [vmem:[%s2958_s10 + $0x8] sm:$0xff] }
  0xcb   : > { %2658 = vmatpush3.msra.mxu1 %v981_v3  ;;  %v1010_v3 = vadd.f32 %v2972_v5, %v1002_v21 }
  0xcc   : > { %v3410_v8 = vpop.permute.xlu1 %748  ;;  %v3412_v9 = vpop.permute.xlu0 %762  ;;  %2659 = vmatprep.subr.mxu1 %v980_v7 }
  0xcd   : > { %4417 = vst [vmem:[#allocation16_spill] sm:$0xff] %v3410_v8  ;;  %2660 = vmatpush3.msra.mxu1 %v980_v7  ;;  %v1018_v34 = vmax.f32 %v1010_v3, 0.0 }
  0xce   : > { %1150 = vrot.lane.b32.xlu1 %v3408_v58, %s2819_s12  ;;  %1260 = vrot.lane.b32.xlu0 %v3327_v40, %s2824_s15 }
  0xcf   : > { %2661 = vmatprep.subr.mxu1 %v979_v39 }
  0xd0   : > { %v3423_v37 = vpop.permute.xlu1 %752  ;;  %v3425_v20 = vpop.permute.xlu0 %766  ;;  %2662 = vmatpush3.msra.mxu1 %v979_v39  ;;  %v1033_v39 = vmul.f32 %v3149_v61, %v1018_v34 }
  0xd1   : > { %4418 = vst [vmem:[#allocation17_spill] sm:$0xff] %v3423_v37  ;;  %2663 = vmatprep.subr.mxu1 %v978_v46 }
  0xd2   : > { %1238 = vrot.lane.b32.xlu1 %v3390_v6, %s2823_s30  ;;  %882 = vrot.lane.b32.xlu0 %v3104_v36, %s2826_s23  ;;  %v1129_v36 = vsel %vm681_vm3, %v1127_v41, %v1128_v26  ;;  %v1654_v26 = vmul.f32 %v2967_v4, %v1646_v51  ;;  %v1049_v3 = vrot.slane %v1033_v39, 7  ;;  %v3486_v39 = vstv %s1684_s27 }
  0xd3   : > { %2664 = vmatpush3.msra.mxu1 %v978_v46 }
  0xd4   : > { %v3439_v19 = vpop.permute.xlu1 %764  ;;  %v3441_v7 = vpop.permute.xlu0 %770  ;;  %v1662_v61 = vadd.f32 %v2972_v5, %v1654_v26  ;;  %v1065_v51 = vsel %vm621_vm1, 0.0, %v1049_v3 }
  0xd5   : > { %4419 = vst [vmem:[#allocation18_spill] sm:$0xff] %v3441_v7 }
  0xd6   : > { %860 = vrot.lane.b32.xlu1 %v3066_v14, %s2825_s22  ;;  %1192 = vrot.lane.b32.xlu0 %v3380_v33, %s2821_s25  ;;  %v1670_v37 = vmax.f32 %v1662_v61, 0.0  ;;  %v1132_v61 = vrot.slane %v1065_v51, 1 }
  0xd8   : > { %v3450_v21 = vpop.permute.xlu1 %768  ;;  %v3452_v22 = vpop.permute.xlu0 %774  ;;  %v1686_v11 = vmul.f32 %v3486_v39, %v1670_v37 }
  0xd9   : > { %4420 = vst [vmem:[#allocation19_spill] sm:$0xff] %v3450_v21  ;;  %4421 = vst [vmem:[#allocation20_spill] sm:$0xff] %v3452_v22 }
  0xda   : > { %1171 = vrot.lane.b32.xlu1 %v1129_v36, %s2820_s28  ;;  %1281 = vrot.lane.b32.xlu0 %v3347_v60, %s2825_s22  ;;  %v1702_v7 = vrot.slane %v1686_v11, 7 }
  0xdc   : > { %v3463_v41 = vpop.permute.xlu1 %772  ;;  %v3465_v46 = vpop.permute.xlu0 %786  ;;  %v3504_v53 = vsel %vm621_vm1, 0.0, %v1702_v7 }
  0xdd   : > { %4423 = vst [vmem:[#allocation21_spill] sm:$0xff] %v3463_v41 }
  0xde   : > { %1262 = vrot.lane.b32.xlu1 %v3380_v33, %s2824_s15  ;;  %884 = vrot.lane.b32.xlu0 %v3132_v48, %s2826_s23 }
  0xe0   : > { %v3474_v22 = vpop.permute.xlu1 %776  ;;  %v1139_v60 = vpop.permute.xlu0 %1138 }
  0xe1   : > { %4424 = vst [vmem:[#allocation22_spill] sm:$0xff] %v3474_v22 }
  0xe2   : > { %790 = vrot.lane.b32.xlu1 %v3066_v14, %s2822_s17  ;;  %1216 = vrot.lane.b32.xlu0 %v3408_v58, %s2822_s17  ;;  %v1073_v14 = vsel %vm621_vm1, %v1049_v3, 0.0  ;;  %v1135_v3 = vrot.slane %v1065_v51, 2 }
  0xe3   : > { %v1133_v41 = vrot.slane %v1073_v14, 1  ;;  %v1136_v37 = vrot.slane %v1073_v14, 2 }
  0xe4   : > { %v3482_v34 = vpop.permute.xlu1 %788  ;;  %v3484_v2 = vpop.permute.xlu0 %1180 }
  0xe5   : > { %v3511_v11 = vsel %vm681_vm3, %v1135_v3, %v1136_v37  ;;  %v1655_v3 = vmul.f32 %v2967_v4, %v1647_v63 }
  0xe6   : > { %1194 = vrot.lane.b32.xlu1 %v1065_v51, %s2821_s25  ;;  %1302 = vrot.lane.b32.xlu0 %v3390_v6, %s2826_s23  ;;  %v1134_v6 = vsel %vm656_vm2, %v1132_v61, %v1133_v41  ;;  %v1748_v41 = vrot.slane %v3504_v53, 1 }
  0xe8   : > { %v1160_v26 = vpop.permute.xlu1 %1159  ;;  %v3491_v22 = vpop.permute.xlu0 %1204 }
  0xea   : > { %1283 = vrot.lane.b32.xlu1 %v3408_v58, %s2825_s22  ;;  %814 = vrot.lane.b32.xlu0 %v3132_v48, %s2823_s30  ;;  %v1726_v48 = vsel %vm621_vm1, %v1702_v7, 0.0 }
  0xeb   : > { %v1749_v61 = vrot.slane %v1726_v48, 1 }
  0xec   : > { %v1183_v8 = vpop.permute.xlu1 %1182  ;;  %v1229_v0 = vpop.permute.xlu0 %1228 }
  0xed   : > { %v3522_v7 = vsel %vm656_vm2, %v1748_v41, %v1749_v61  ;;  %v1315_v41 = vsel %vm906_vm4, %v3175_v16, %v1139_v60  ;;  %v1663_v61 = vadd.f32 %v2972_v5, %v1655_v3  ;;  %v1769_v5 = vrot.slane %v3504_v53, 2 }
  0xee   : > { %792 = vrot.lane.b32.xlu1 %v3073_v18, %s2822_s17  ;;  %1240 = vrot.lane.b32.xlu0 %v1129_v36, %s2823_s30  ;;  %v1322_v52 = vsel %vm915_vm5, %v1315_v41, %v1160_v26  ;;  %v1770_v60 = vrot.slane %v1726_v48, 2 }
  0xef   : > { %v1330_v16 = vsel %vm924_vm6, %v1322_v52, %v1183_v8 }
  0xf0   : > { %v1207_v29 = vpop.permute.xlu1 %1206  ;;  %v1231_v58 = vpop.permute.xlu0 %1230  ;;  %v1771_v48 = vsel %vm681_vm3, %v1769_v5, %v1770_v60  ;;  %v3599_v60 = vld [vmem:[%s4384_s4] ss:$0 sm:$0xff] }
  0xf2   : > { %1218 = vrot.lane.b32.xlu1 %v1134_v6, %s2822_s17  ;;  %816 = vrot.lane.b32.xlu0 %v3121_v43, %s2823_s30 }
  0xf4   : > { %v3514_v14 = vpop.permute.xlu1 %1140  ;;  %v3516_v33 = vpop.permute.xlu0 %1142 }
  0xf6   : > { %1304 = vrot.lane.b32.xlu1 %v1129_v36, %s2826_s23  ;;  %1242 = vrot.lane.b32.xlu0 %v3511_v11, %s2823_s30 }
  0xf8   : > { %v1253_v21 = vpop.permute.xlu1 %1252  ;;  %v1255_v47 = vpop.permute.xlu0 %1254 }
  0xfa   : > { %838 = vrot.lane.b32.xlu1 %v3046_v1, %s2824_s15  ;;  %1798 = vrot.lane.b32.xlu0 %v3522_v7, %s2819_s12  ;;  %v907_v1 = vsel %vm906_vm4, %v2981_v10, %v3309_v31  ;;  %v1338_v31 = vsel %vm933_vm7, %v1330_v16, %v1207_v29 }
  0xfc   : > { %v3530_v37 = vpop.permute.xlu1 %1161  ;;  %v3532_v36 = vpop.permute.xlu0 %1163 }
  0xfe   : > { %1264 = vrot.lane.b32.xlu1 %v1065_v51, %s2824_s15  ;;  %848 = vrot.lane.b32.xlu0 %v2981_v10, %s2824_s15  ;;  %v3551_v10 = vsel %vm915_vm5, %v907_v1, %v3321_v38  ;;  %v1671_v51 = vmax.f32 %v1663_v61, 0.0  ;;  %v1346_v38 = vsel %vm942_vm8, %v1338_v31, %v1231_v58 }
  0xff   : > { %v1329_v52 = vsel %vm924_vm6, %v3551_v10, %v3484_v2  ;;  %v1354_v29 = vsel %vm951_vm9, %v1346_v38, %v1255_v47 }
 0x100   : > { %v1274_v4 = vpop.permute.xlu1 %1273  ;;  %v1276_v63 = vpop.permute.xlu0 %1275 }
 0x101   : > { %v1362_v58 = vsel %vm960_vm10, %v1354_v29, %v1276_v63  ;;  %v1648_v63 = vld [vmem:[%s2958_s10 + $0x10] sm:$0xff] }
 0x102   : > { %840 = vrot.lane.b32.xlu1 %v3062_v12, %s2824_s15  ;;  %1285 = vrot.lane.b32.xlu0 %v1134_v6, %s2825_s22  ;;  %v1337_v6 = vsel %vm933_vm7, %v1329_v52, %v3491_v22  ;;  %v1687_v22 = vmul.f32 %v3486_v39, %v1671_v51  ;;  %v1656_v51 = vmul.f32 %v3599_v60, %v1648_v63 }
 0x103   : > { %v1345_v1 = vsel %vm942_vm8, %v1337_v6, %v1229_v0  ;;  %v3612_v6 = vld [vmem:[%s4385_s5] ss:$0 sm:$0xff] }
 0x104   : > { %v3557_v8 = vpop.permute.xlu1 %1184  ;;  %v3559_v26 = vpop.permute.xlu0 %1186  ;;  %v1353_v2 = vsel %vm951_vm9, %v1345_v1, %v1253_v21  ;;  %v1703_v47 = vrot.slane %v1687_v22, 7  ;;  %v1664_v1 = vadd.f32 %v3612_v6, %v1656_v51 }
 0x105   : > { %v1361_v0 = vsel %vm960_vm10, %v1353_v2, %v1274_v4 }
 0x106   : > { %862 = vrot.lane.b32.xlu1 %v3073_v18, %s2825_s22  ;;  %1840 = vrot.lane.b32.xlu0 %v3504_v53, %s2821_s25  ;;  %v3590_v16 = vsel %vm621_vm1, 0.0, %v1703_v47  ;;  %v1727_v52 = vsel %vm621_vm1, %v1703_v47, 0.0  ;;  %v1672_v22 = vmax.f32 %v1664_v1, 0.0 }
 0x107   : > { %v1752_v38 = vrot.slane %v1727_v52, 1  ;;  %v1772_v47 = vrot.slane %v3590_v16, 2  ;;  %v1773_v63 = vrot.slane %v1727_v52, 2 }
 0x108   : > { %v1295_v3 = vpop.permute.xlu1 %1294  ;;  %v1297_v41 = vpop.permute.xlu0 %1296 }
 0x109   : > { %v1370_v18 = vsel %vm969_vm11, %v1362_v58, %v1297_v41  ;;  %v1369_v61 = vsel %vm969_vm11, %v1361_v0, %v1295_v3  ;;  %v1688_v3 = vmul.f32 %v3486_v39, %v1672_v22 }
 0x10a   : > { %1819 = vrot.lane.b32.xlu1 %v1771_v48, %s2820_s28  ;;  %864 = vrot.lane.b32.xlu0 %v3082_v23, %s2825_s22 }
 0x10b   : > { %2635 = vmatprep.mubr.msk.f32.mxu0 %vm1387_vm12, %v1369_v61  ;;  %v1316_v61 = vsel %vm906_vm4, %v3209_v44, %v3514_v14 }
 0x10c   : > { %2636 = vmatmul.mubr.msk.f32.vlgmr.msra.gmra.mxu0 %vm1387_vm12, %v1370_v18  ;;  %v1209_v21 = vpop.permute.xlu1 %1208  ;;  %v3582_v4 = vpop.permute.xlu0 %1210 }
 0x10e   : > { %794 = vrot.lane.b32.xlu1 %v3082_v23, %s2822_s17  ;;  %886 = vrot.lane.b32.xlu0 %v3121_v43, %s2826_s23 }
 0x110   : > { %v3592_v5 = vpop.permute.xlu1 %1144  ;;  %v3594_v31 = vpop.permute.xlu0 %1146 }
 0x112   : > { %872 = vrot.lane.b32.xlu1 %v3004_v25, %s2825_s22  ;;  %1842 = vrot.lane.b32.xlu0 %v3590_v16, %s2821_s25  ;;  %v1751_v25 = vrot.slane %v3590_v16, 1 }
 0x114   : > { %v1233_v23 = vpop.permute.xlu1 %1232  ;;  %v3606_v43 = vpop.permute.xlu0 %1234  ;;  %v3629_v0 = vsel %vm656_vm2, %v1751_v25, %v1752_v38 }
 0x116   : > { %1306 = vrot.lane.b32.xlu1 %v3511_v11, %s2826_s23  ;;  %796 = vrot.lane.b32.xlu0 %v3090_v28, %s2822_s17 }
 0x118   : > { %v3620_v2 = vpop.permute.xlu1 %1165  ;;  %v3622_v29 = vpop.permute.xlu0 %1167 }
 0x11a   : > { %1864 = vrot.lane.b32.xlu1 %v3522_v7, %s2822_s17  ;;  %888 = vrot.lane.b32.xlu0 %v3145_v54, %s2826_s23  ;;  %v1704_v7 = vrot.slane %v1688_v3, 7 }
 0x11c   : > { %v1257_v11 = vpop.permute.xlu1 %1256  ;;  %v1259_v58 = vpop.permute.xlu0 %1258  ;;  %v3654_v44 = vsel %vm621_vm1, 0.0, %v1704_v7 }
 0x11d   : > { %4425 = vst [vmem:[#allocation23_spill] sm:$0xff] %v3654_v44  ;;  %v1754_v52 = vrot.slane %v3654_v44, 1 }
 0x11e   : > { %818 = vrot.lane.b32.xlu1 %v3145_v54, %s2823_s30  ;;  %1800 = vrot.lane.b32.xlu0 %v3629_v0, %s2819_s12  ;;  %v1323_v54 = vsel %vm915_vm5, %v1316_v61, %v3530_v37 }
 0x11f   : > { %v1331_v51 = vsel %vm924_vm6, %v1323_v54, %v3557_v8  ;;  %v3665_v8 = vsel %vm681_vm3, %v1772_v47, %v1773_v63  ;;  %v1317_v54 = vsel %vm906_vm4, %v3218_v56, %v3516_v33 }
 0x120   : > { %v3636_v41 = vpop.permute.xlu1 %1188  ;;  %v3638_v18 = vpop.permute.xlu0 %810  ;;  %v1339_v14 = vsel %vm933_vm7, %v1331_v51, %v1209_v21  ;;  %v1324_v51 = vsel %vm915_vm5, %v1317_v54, %v3532_v36 }
 0x122   : > { %896 = vrot.lane.b32.xlu1 %v3014_v32, %s2826_s23  ;;  %1888 = vrot.lane.b32.xlu0 %v1771_v48, %s2823_s30  ;;  %v1728_v32 = vsel %vm621_vm1, %v1704_v7, 0.0  ;;  %v1347_v48 = vsel %vm942_vm8, %v1339_v14, %v1233_v23  ;;  %v1649_v23 = vld [vmem:[%s2958_s10 + $0x18] sm:$0xff]  ;;  %v1332_v14 = vsel %vm924_vm6, %v1324_v51, %v3559_v26  ;;  %v1775_v26 = vrot.slane %v3654_v44, 2 }
 0x123   : > { %v1355_v37 = vsel %vm951_vm9, %v1347_v48, %v1257_v11  ;;  %v1755_v38 = vrot.slane %v1728_v32, 1  ;;  %v1657_v61 = vmul.f32 %v3599_v60, %v1649_v23  ;;  %v1340_v56 = vsel %vm933_vm7, %v1332_v14, %v3582_v4 }
 0x124   : > { %v1278_v1 = vpop.permute.xlu1 %1277  ;;  %v3651_v25 = vpop.permute.xlu0 %1212  ;;  %v1348_v33 = vsel %vm942_vm8, %v1340_v56, %v3606_v43  ;;  %v3715_v43 = vld [vmem:[%s4383_s3 + $0xd0] sm:$0xff]  ;;  %v4426_v56 = vrot.slane %v3172_v15, 7 }
 0x125   : > { %v1363_v22 = vsel %vm960_vm10, %v1355_v37, %v1278_v1  ;;  %v3679_v11 = vsel %vm656_vm2, %v1754_v52, %v1755_v38  ;;  %v1665_v1 = vadd.f32 %v3612_v6, %v1657_v61  ;;  %v1356_v36 = vsel %vm951_vm9, %v1348_v33, %v1259_v58  ;;  %2677 = vmatprep.subr.mxu0 %v3715_v43  ;;  %v3738_v61 = vld [vmem:[%s4383_s3 + $0xc8] sm:$0xff] }
 0x126   : > { %1866 = vrot.lane.b32.xlu1 %v3629_v0, %s2822_s17  ;;  %842 = vrot.lane.b32.xlu0 %v3070_v17, %s2824_s15  ;;  %v1776_v52 = vrot.slane %v1728_v32, 2  ;;  %v3768_v33 = vsel %vm621_vm1, %v4426_v56, 0.0 }
 0x127   : > { %v1673_v38 = vmax.f32 %v1665_v1, 0.0  ;;  %2678 = vmatpush3.msra.mxu0 %v3715_v43  ;;  %2707 = vmatprep.subr.mxu1 %v3715_v43  ;;  %v3749_v1 = vld [vmem:[%s4383_s3 + $0xc0] sm:$0xff] }
 0x128   : > { %v3669_v3 = vpop.permute.xlu1 %1190  ;;  %v1299_v21 = vpop.permute.xlu0 %1298  ;;  %2679 = vmatprep.subr.mxu0 %v3738_v61 }
 0x129   : > { %v1371_v7 = vsel %vm969_vm11, %v1363_v22, %v1299_v21  ;;  %v1689_v58 = vmul.f32 %v3486_v39, %v1673_v38  ;;  %2680 = vmatpush3.msra.mxu0 %v3738_v61  ;;  %v3781_v38 = vld [vmem:[%s4383_s3 + $0xb0] sm:$0xff] }
 0x12a   : > { %820 = vrot.lane.b32.xlu1 %v3135_v49, %s2823_s30  ;;  %1821 = vrot.lane.b32.xlu0 %v3665_v8, %s2820_s28 }
 0x12b   : > { %2638 = vmatprep.mubr.msk.f32.mxu0 %vm1387_vm12, %v1371_v7  ;;  %v1705_v54 = vrot.slane %v1689_v58, 7  ;;  %2681 = vmatprep.subr.mxu0 %v3749_v1  ;;  %v709_v58 = vrot.slane %v3768_v33, 1 }
 0x12c   : > { %v1280_v47 = vpop.permute.xlu1 %1279  ;;  %v835_v63 = vpop.permute.xlu0 %834  ;;  %2682 = vmatpush3.msra.mxu0 %v3749_v1 }
 0x12d   : > { %v1364_v22 = vsel %vm960_vm10, %v1356_v36, %v1280_v47  ;;  %v3762_v14 = vsel %vm621_vm1, 0.0, %v1705_v54  ;;  %v925_v36 = vsel %vm924_vm6, %v3551_v10, %v3412_v9 }
 0x12e   : > { %1802 = vrot.lane.b32.xlu1 %v3679_v11, %s2819_s12  ;;  %1912 = vrot.lane.b32.xlu0 %v3590_v16, %s2824_s15  ;;  %v934_v15 = vsel %vm933_vm7, %v925_v36, %v3465_v46 }
 0x12f   : > { %v943_v9 = vsel %vm942_vm8, %v934_v15, %v3638_v18 }
 0x130   : > { %v3694_v48 = vpop.permute.xlu1 %812  ;;  %v3696_v37 = vpop.permute.xlu0 %1214  ;;  %v952_v46 = vsel %vm951_vm9, %v943_v9, %v835_v63  ;;  %v3812_v63 = vld [vmem:[%s4383_s3 + $0xa0] sm:$0xff] }
 0x132   : > { %1890 = vrot.lane.b32.xlu1 %v3665_v8, %s2823_s30  ;;  %866 = vrot.lane.b32.xlu0 %v3090_v28, %s2825_s22  ;;  %v3723_v28 = vsel %vm681_vm3, %v1775_v26, %v1776_v52 }
 0x134   : > { %v3709_v21 = vpop.permute.xlu1 %1148  ;;  %v1301_v4 = vpop.permute.xlu0 %1300 }
 0x135   : > { %v1372_v23 = vsel %vm969_vm11, %v1364_v22, %v1301_v4  ;;  %v1650_v22 = vld [vmem:[%s2958_s10 + $0x20] sm:$0xff]  ;;  %v3796_v4 = vld [vmem:[%s4383_s3 + $0xa8] sm:$0xff] }
 0x136   : > { %844 = vrot.lane.b32.xlu1 %v3085_v24, %s2824_s15  ;;  %1844 = vrot.lane.b32.xlu0 %v3654_v44, %s2821_s25  ;;  %v1658_v36 = vmul.f32 %v3599_v60, %v1650_v22 }
 0x137   : > { %2639 = vmatmul.mubr.msk.f32.gmra.mxu0 %vm1387_vm12, %v1372_v23  ;;  %v708_v23 = vrot.slane %v3194_v30, 1 }
 0x138   : > { %v3727_v32 = vpop.permute.xlu1 %1236  ;;  %v859_v7 = vpop.permute.xlu0 %858 }
 0x139   : > { %v961_v18 = vsel %vm960_vm10, %v952_v46, %v859_v7  ;;  %v3820_v7 = vsel %vm656_vm2, %v708_v23, %v709_v58  ;;  %v3826_v46 = vsel %vm621_vm1, %v1705_v54, 0.0  ;;  %v908_v23 = vsel %vm906_vm4, %v3036_v57, %v3331_v45  ;;  %v3846_v54 = vld [vmem:[%s4383_s3 + $0x90] sm:$0xff] }
 0x13a   : > { %1823 = vrot.lane.b32.xlu1 %v3723_v28, %s2820_s28  ;;  %1933 = vrot.lane.b32.xlu0 %v3629_v0, %s2825_s22  ;;  %v3755_v0 = vld [vmem:[%s4383_s3 + $0xb8] sm:$0xff]  ;;  %v917_v58 = vsel %vm915_vm5, %v908_v23, %v3375_v27 }
 0x13b   : > { %2683 = vmatprep.subr.mxu0 %v3755_v0  ;;  %v926_v57 = vsel %vm924_vm6, %v917_v58, %v3439_v19 }
 0x13c   : > { %v3741_v47 = vpop.permute.xlu1 %836  ;;  %v3743_v51 = vpop.permute.xlu0 %1169  ;;  %2684 = vmatpush3.msra.mxu0 %v3755_v0 }
 0x13d   : > { %2685 = vmatprep.subr.mxu0 %v3781_v38 }
 0x13e   : > { %1914 = vrot.lane.b32.xlu1 %v3654_v44, %s2824_s15  ;;  %868 = vrot.lane.b32.xlu0 %v3101_v35, %s2825_s22  ;;  %v935_v44 = vsel %vm933_vm7, %v926_v57, %v3482_v34 }
 0x13f   : > { %2686 = vmatpush3.msra.mxu0 %v3781_v38  ;;  %v944_v27 = vsel %vm942_vm8, %v935_v44, %v3694_v48  ;;  %v1318_v48 = vsel %vm906_vm4, %v3277_v50, %v3592_v5  ;;  %v711_v50 = vrot.slane %v3194_v30, 2 }
 0x140   : > { %v3773_v26 = vpop.permute.xlu1 %1150  ;;  %v3775_v52 = vpop.permute.xlu0 %1260  ;;  %2687 = vmatprep.subr.mxu0 %v3796_v4  ;;  %v953_v19 = vsel %vm951_vm9, %v944_v27, %v3741_v47  ;;  %v1325_v47 = vsel %vm915_vm5, %v1318_v48, %v3620_v2 }
 0x141   : > { %2688 = vmatpush3.msra.mxu0 %v3796_v4 }
 0x142   : > { %798 = vrot.lane.b32.xlu1 %v3101_v35, %s2822_s17  ;;  %1846 = vrot.lane.b32.xlu0 %v3762_v14, %s2821_s25 }
 0x143   : > { %2689 = vmatprep.subr.mxu0 %v3812_v63 }
 0x144   : > { %v3803_v56 = vpop.permute.xlu1 %1238  ;;  %v883_v35 = vpop.permute.xlu0 %882  ;;  %2690 = vmatpush3.msra.mxu0 %v3812_v63 }
 0x145   : > { %v970_v15 = vsel %vm969_vm11, %v961_v18, %v883_v35  ;;  %v1666_v18 = vadd.f32 %v3612_v6, %v1658_v36  ;;  %v1757_v35 = vrot.slane %v3762_v14, 1  ;;  %v1758_v36 = vrot.slane %v3826_v46, 1 }
 0x146   : > { %890 = vrot.lane.b32.xlu1 %v3135_v49, %s2826_s23  ;;  %1935 = vrot.lane.b32.xlu0 %v3679_v11, %s2825_s22  ;;  %v3833_v49 = vld [vmem:[%s4383_s3 + $0x98] sm:$0xff] }
 0x147   : > { %2665 = vmatprep.mubr.msk.f32.mxu1 %vm1387_vm12, %v970_v15  ;;  %2691 = vmatprep.subr.mxu0 %v3833_v49  ;;  %v1674_v15 = vmax.f32 %v1666_v18, 0.0  ;;  %v3870_v18 = vsel %vm656_vm2, %v1757_v35, %v1758_v36 }
 0x148   : > { %v861_v22 = vpop.permute.xlu1 %860  ;;  %v3823_v9 = vpop.permute.xlu0 %1192  ;;  %2692 = vmatpush3.msra.mxu0 %v3833_v49 }
 0x149   : > { %2693 = vmatprep.subr.mxu0 %v3846_v54  ;;  %v962_v34 = vsel %vm960_vm10, %v953_v19, %v861_v22  ;;  %v1690_v44 = vmul.f32 %v3486_v39, %v1674_v15  ;;  %v1333_v22 = vsel %vm924_vm6, %v1325_v47, %v3636_v41  ;;  %v712_v41 = vrot.slane %v3768_v33, 2 }
 0x14a   : > { %1868 = vrot.lane.b32.xlu1 %v3679_v11, %s2822_s17  ;;  %800 = vrot.lane.b32.xlu0 %v3820_v7, %s2822_s17  ;;  %v1319_v47 = vsel %vm906_vm4, %v3286_v59, %v3594_v31 }
 0x14b   : > { %2694 = vmatpush3.msra.mxu0 %v3846_v54  ;;  %v1706_v57 = vrot.slane %v1690_v44, 7  ;;  %v1326_v59 = vsel %vm915_vm5, %v1319_v47, %v3622_v29 }
 0x14c   : > { %v3855_v45 = vpop.permute.xlu1 %1171  ;;  %v1282_v11 = vpop.permute.xlu0 %1281 }
 0x14d   : > { %v3915_v19 = vsel %vm621_vm1, 0.0, %v1706_v57 }
 0x14e   : > { %1954 = vrot.lane.b32.xlu1 %v3665_v8, %s2826_s23  ;;  %892 = vrot.lane.b32.xlu0 %v3156_v62, %s2826_s23 }
 0x150   : > { %v3874_v23 = vpop.permute.xlu1 %1262  ;;  %v885_v58 = vpop.permute.xlu0 %884 }
 0x151   : > { %v971_v8 = vsel %vm969_vm11, %v962_v34, %v885_v58  ;;  %v1730_v34 = vsel %vm621_vm1, %v1706_v57, 0.0 }
 0x152   : > { %822 = vrot.lane.b32.xlu1 %v3156_v62, %s2823_s30  ;;  %1870 = vrot.lane.b32.xlu0 %v3870_v18, %s2822_s17  ;;  %v1341_v62 = vsel %vm933_vm7, %v1333_v22, %v3651_v25  ;;  %v1778_v25 = vrot.slane %v3762_v14, 2  ;;  %v1761_v58 = vrot.slane %v1730_v34, 1  ;;  %v1782_v48 = vrot.slane %v1730_v34, 2 }
 0x153   : > { %2666 = vmatmul.mubr.msk.f32.vlgmr.msra.gmra.mxu1 %vm1387_vm12, %v971_v8  ;;  %v1349_v5 = vsel %vm942_vm8, %v1341_v62, %v3727_v32  ;;  %v1781_v8 = vrot.slane %v3915_v19, 2 }
 0x154   : > { %v3890_v35 = vpop.permute.xlu1 %790  ;;  %v3892_v36 = vpop.permute.xlu0 %1216  ;;  %2716 = vmatpush3.msra.mxu1 %v3715_v43  ;;  %v1357_v2 = vsel %vm951_vm9, %v1349_v5, %v3775_v52  ;;  %v1779_v43 = vrot.slane %v3826_v46, 2  ;;  %v1651_v52 = vld [vmem:[%s2958_s10 + $0x28] sm:$0xff] }
 0x155   : > { %2708 = vmatprep.subr.mxu1 %v3738_v61  ;;  %v1365_v15 = vsel %vm960_vm10, %v1357_v2, %v1282_v11  ;;  %v1760_v11 = vrot.slane %v3915_v19, 1  ;;  %v3963_v31 = vsel %vm681_vm3, %v1781_v8, %v1782_v48  ;;  %v1652_v2 = vld [vmem:[%s2958_s10 + $0x30] sm:$0xff] }
 0x156   : > { %1804 = vrot.lane.b32.xlu1 %v3870_v18, %s2819_s12  ;;  %1956 = vrot.lane.b32.xlu0 %v3723_v28, %s2826_s23  ;;  %v3929_v46 = vsel %vm681_vm3, %v1778_v25, %v1779_v43 }
 0x157   : > { %2717 = vmatpush3.msra.mxu1 %v3738_v61  ;;  %v713_v61 = vsel %vm681_vm3, %v711_v50, %v712_v41 }
 0x158   : > { %v3912_v32 = vpop.permute.xlu1 %1194  ;;  %v1303_v27 = vpop.permute.xlu0 %1302  ;;  %2709 = vmatprep.subr.mxu1 %v3749_v1 }
 0x159   : > { %v1373_v33 = vsel %vm969_vm11, %v1365_v15, %v1303_v27  ;;  %2718 = vmatpush3.msra.mxu1 %v3749_v1 }
 0x15a   : > { %1892 = vrot.lane.b32.xlu1 %v3723_v28, %s2823_s30  ;;  %846 = vrot.lane.b32.xlu0 %v3194_v30, %s2824_s15  ;;  %v1659_v28 = vmul.f32 %v3599_v60, %v1651_v52  ;;  %v3942_v30 = vsel %vm656_vm2, %v1760_v11, %v1761_v58 }
 0x15b   : > { %2641 = vmatprep.mubr.msk.f32.mxu0 %vm1387_vm12, %v1373_v33  ;;  %2710 = vmatprep.subr.mxu1 %v3755_v0 }
 0x15c   : > { %v1284_v44 = vpop.permute.xlu1 %1283  ;;  %v3933_v1 = vpop.permute.xlu0 %814  ;;  %2719 = vmatpush3.msra.mxu1 %v3755_v0  ;;  %v1667_v57 = vadd.f32 %v3612_v6, %v1659_v28 }
 0x15d   : > { %2711 = vmatprep.subr.mxu1 %v3781_v38 }
 0x15e   : > { %824 = vrot.lane.b32.xlu1 %v713_v61, %s2823_s30  ;;  %1825 = vrot.lane.b32.xlu0 %v3929_v46, %s2820_s28  ;;  %v1675_v50 = vmax.f32 %v1667_v57, 0.0  ;;  %v909_v57 = vsel %vm906_vm4, %v3032_v55, %v3329_v42 }
 0x15f   : > { %2720 = vmatpush3.msra.mxu1 %v3781_v38  ;;  %v1334_v38 = vsel %vm924_vm6, %v1326_v59, %v3669_v3 }
 0x160   : > { %v3949_v0 = vpop.permute.xlu1 %792  ;;  %v3951_v22 = vpop.permute.xlu0 %1240  ;;  %2712 = vmatprep.subr.mxu1 %v3796_v4  ;;  %v1342_v5 = vsel %vm933_vm7, %v1334_v38, %v3696_v37  ;;  %v1691_v25 = vmul.f32 %v3486_v39, %v1675_v50  ;;  %v918_v38 = vsel %vm915_vm5, %v909_v57, %v3363_v13 }
 0x161   : > { %2721 = vmatpush3.msra.mxu1 %v3796_v4  ;;  %v1350_v29 = vsel %vm942_vm8, %v1342_v5, %v3803_v56  ;;  %v1660_v56 = vmul.f32 %v3599_v60, %v1652_v2  ;;  %v927_v50 = vsel %vm924_vm6, %v918_v38, %v3425_v20 }
 0x162   : > { %1806 = vrot.lane.b32.xlu1 %v3942_v30, %s2819_s12  ;;  %1916 = vrot.lane.b32.xlu0 %v3762_v14, %s2824_s15  ;;  %v1358_v3 = vsel %vm951_vm9, %v1350_v29, %v3874_v23  ;;  %v1707_v15 = vrot.slane %v1691_v25, 7  ;;  %v1653_v29 = vld [vmem:[%s2958_s10 + $0x38] sm:$0xff] }
 0x163   : > { %2713 = vmatprep.subr.mxu1 %v3812_v63  ;;  %v1668_v27 = vadd.f32 %v3612_v6, %v1660_v56  ;;  %v1661_v25 = vmul.f32 %v3599_v60, %v1653_v29 }
 0x164   : > { %v3968_v62 = vpop.permute.xlu1 %1218  ;;  %v3970_v4 = vpop.permute.xlu0 %816  ;;  %2722 = vmatpush3.msra.mxu1 %v3812_v63  ;;  %v1366_v63 = vsel %vm960_vm10, %v1358_v3, %v1284_v44  ;;  %v1731_v33 = vsel %vm621_vm1, %v1707_v15, 0.0  ;;  %v936_v3 = vsel %vm933_vm7, %v927_v50, %v3890_v35 }
 0x165   : > { %2714 = vmatprep.subr.mxu1 %v3833_v49  ;;  %v1676_v52 = vmax.f32 %v1668_v27, 0.0  ;;  %v1764_v58 = vrot.slane %v1731_v33, 1  ;;  %v1785_v59 = vrot.slane %v1731_v33, 2  ;;  %v945_v13 = vsel %vm942_vm8, %v936_v3, %v3933_v1 }
 0x166   : > { %1894 = vrot.lane.b32.xlu1 %v3929_v46, %s2823_s30  ;;  %1827 = vrot.lane.b32.xlu0 %v3963_v31, %s2820_s28  ;;  %v1669_v27 = vadd.f32 %v3612_v6, %v1661_v25 }
 0x167   : > { %2723 = vmatpush3.msra.mxu1 %v3833_v49  ;;  %v1692_v28 = vmul.f32 %v3486_v39, %v1676_v52 }
 0x168   : > { %v1305_v37 = vpop.permute.xlu1 %1304  ;;  %v3987_v41 = vpop.permute.xlu0 %1242  ;;  %2715 = vmatprep.subr.mxu1 %v3846_v54  ;;  %v1677_v57 = vmax.f32 %v1669_v27, 0.0 }
 0x169   : > { %v1374_v43 = vsel %vm969_vm11, %v1366_v63, %v1305_v37  ;;  %2724 = vmatpush3.msra.mxu1 %v3846_v54  ;;  %v1708_v47 = vrot.slane %v1692_v28, 7 }
 0x16a   : > { %870 = vrot.lane.b32.xlu1 %v3820_v7, %s2825_s22  ;;  %1918 = vrot.lane.b32.xlu0 %v3915_v19, %s2824_s15  ;;  %v4006_v7 = vsel %vm621_vm1, 0.0, %v1707_v15  ;;  %v1320_v15 = vsel %vm906_vm4, %v3327_v40, %v3709_v21  ;;  %v4427_v21 = vld [vmem:[#allocation7_spill] sm:$0xff] }
 0x16b   : > { %2642 = vmatmul.mubr.msk.f32.gmra.mxu0 %vm1387_vm12, %v1374_v43  ;;  %v1763_v11 = vrot.slane %v4006_v7, 1  ;;  %v4041_v42 = vsel %vm621_vm1, 0.0, %v1708_v47  ;;  %v1327_v60 = vsel %vm915_vm5, %v1320_v15, %v3743_v51 }
 0x16c   : > { %v839_v49 = vpop.permute.xlu1 %838  ;;  %v1799_v23 = vpop.permute.xlu0 %1798  ;;  %v1766_v37 = vrot.slane %v4041_v42, 1  ;;  %v1335_v33 = vsel %vm924_vm6, %v1327_v60, %v3823_v9 }
 0x16d   : > { %v4022_v8 = vsel %vm656_vm2, %v1763_v11, %v1764_v58  ;;  %v1975_v5 = vsel %vm906_vm4, %v3504_v53, %v1799_v23  ;;  %v954_v20 = vsel %vm951_vm9, %v945_v13, %v839_v49  ;;  %v1343_v51 = vsel %vm933_vm7, %v1335_v33, %v3892_v36  ;;  %v4429_v58 = vld [vmem:[#allocation14_spill] sm:$0xff]  ;;  %v4431_v13 = vld [vmem:[#allocation13_spill] sm:$0xff] }
 0x16e   : > { %1848 = vrot.lane.b32.xlu1 %v3915_v19, %s2821_s25  ;;  %894 = vrot.lane.b32.xlu0 %v713_v61, %s2826_s23  ;;  %v1351_v6 = vsel %vm942_vm8, %v1343_v51, %v3951_v22 }
 0x170   : > { %v1265_v34 = vpop.permute.xlu1 %1264  ;;  %v4003_v54 = vpop.permute.xlu0 %848 }
 0x171   : > { %v1359_v9 = vsel %vm951_vm9, %v1351_v6, %v1265_v34 }
 0x172   : > { %1937 = vrot.lane.b32.xlu1 %v3870_v18, %s2825_s22  ;;  %1872 = vrot.lane.b32.xlu0 %v3942_v30, %s2822_s17 }
 0x174   : > { %v4014_v44 = vpop.permute.xlu1 %840  ;;  %v1286_v61 = vpop.permute.xlu0 %1285 }
 0x176   : > { %1850 = vrot.lane.b32.xlu1 %v4006_v7, %s2821_s25  ;;  %1958 = vrot.lane.b32.xlu0 %v3929_v46, %s2826_s23  ;;  %v1784_v46 = vrot.slane %v4006_v7, 2 }
 0x178   : > { %v863_v18 = vpop.permute.xlu1 %862  ;;  %v4024_v48 = vpop.permute.xlu0 %1840  ;;  %v4057_v53 = vsel %vm681_vm3, %v1784_v46, %v1785_v59  ;;  %v4430_v46 = vld [vmem:[#allocation19_spill] sm:$0xff]  ;;  %v1367_v59 = vsel %vm960_vm10, %v1359_v9, %v1286_v61 }
 0x179   : > { %v963_v56 = vsel %vm960_vm10, %v954_v20, %v863_v18  ;;  %v1787_v18 = vrot.slane %v4041_v42, 2  ;;  %v1321_v20 = vsel %vm906_vm4, %v4431_v13, %v3773_v26 }
 0x17a   : > { %1939 = vrot.lane.b32.xlu1 %v3942_v30, %s2825_s22  ;;  %1874 = vrot.lane.b32.xlu0 %v4022_v8, %s2822_s17  ;;  %v1732_v30 = vsel %vm621_vm1, %v1708_v47, 0.0 }
 0x17b   : > { %v1767_v35 = vrot.slane %v1732_v30, 1  ;;  %v1788_v47 = vrot.slane %v1732_v30, 2 }
 0x17c   : > { %v1820_v2 = vpop.permute.xlu1 %1819  ;;  %v865_v55 = vpop.permute.xlu0 %864 }
 0x17d   : > { %v4048_v63 = vsel %vm915_vm5, %v1975_v5, %v1820_v2  ;;  %v1768_v49 = vsel %vm656_vm2, %v1766_v37, %v1767_v35  ;;  %v1789_v2 = vsel %vm681_vm3, %v1787_v18, %v1788_v47 }
 0x17e   : > { %1808 = vrot.lane.b32.xlu1 %v4022_v8, %s2819_s12  ;;  %1960 = vrot.lane.b32.xlu0 %v3963_v31, %s2826_s23 }
 0x180   : > { %v4063_v43 = vpop.permute.xlu1 %794  ;;  %v887_v1 = vpop.permute.xlu0 %886 }
 0x181   : > { %v972_v23 = vsel %vm969_vm11, %v963_v56, %v887_v1 }
 0x182   : > { %1896 = vrot.lane.b32.xlu1 %v3963_v31, %s2823_s30  ;;  %1829 = vrot.lane.b32.xlu0 %v4057_v53, %s2820_s28  ;;  %v4428_v31 = vld [vmem:[#allocation5_spill] sm:$0xff] }
 0x183   : > { %2668 = vmatprep.mubr.msk.f32.mxu1 %vm1387_vm12, %v972_v23  ;;  %v910_v11 = vsel %vm906_vm4, %v4428_v31, %v4427_v21 }
 0x184   : > { %v4080_v52 = vpop.permute.xlu1 %872  ;;  %v4082_v40 = vpop.permute.xlu0 %1842  ;;  %v919_v28 = vsel %vm915_vm5, %v910_v11, %v4429_v58 }
 0x185   : > { %v928_v36 = vsel %vm924_vm6, %v919_v28, %v4430_v46 }
 0x186   : > { %1810 = vrot.lane.b32.xlu1 %v1768_v49, %s2819_s12  ;;  %1920 = vrot.lane.b32.xlu0 %v4006_v7, %s2824_s15  ;;  %v937_v22 = vsel %vm933_vm7, %v928_v36, %v3949_v0  ;;  %v1693_v0 = vmul.f32 %v3486_v39, %v1677_v57 }
 0x187   : > { %v946_v34 = vsel %vm942_vm8, %v937_v22, %v3970_v4  ;;  %v4433_v22 = vld [vmem:[#allocation6_spill] sm:$0xff] }
 0x188   : > { %v1307_v38 = vpop.permute.xlu1 %1306  ;;  %v4101_v50 = vpop.permute.xlu0 %796  ;;  %v955_v61 = vsel %vm951_vm9, %v946_v34, %v4014_v44  ;;  %v1328_v44 = vsel %vm915_vm5, %v1321_v20, %v3855_v45  ;;  %v1709_v39 = vrot.slane %v1693_v0, 7  ;;  %v4434_v34 = vld [vmem:[#allocation12_spill] sm:$0xff] }
 0x189   : > { %v1375_v5 = vsel %vm969_vm11, %v1367_v59, %v1307_v38  ;;  %v964_v30 = vsel %vm960_vm10, %v955_v61, %v865_v55  ;;  %v1336_v55 = vsel %vm924_vm6, %v1328_v44, %v3912_v32  ;;  %v4432_v38 = vld [vmem:[#allocation8_spill] sm:$0xff] }
 0x18a   : > { %1898 = vrot.lane.b32.xlu1 %v4057_v53, %s2823_s30  ;;  %1852 = vrot.lane.b32.xlu0 %v4041_v42, %s2821_s25  ;;  %v1344_v25 = vsel %vm933_vm7, %v1336_v55, %v3968_v62  ;;  %v1733_v62 = vsel %vm621_vm1, %v1709_v39, 0.0 }
 0x18b   : > { %2644 = vmatprep.mubr.msk.f32.mxu0 %vm1387_vm12, %v1375_v5  ;;  %v1352_v26 = vsel %vm942_vm8, %v1344_v25, %v3987_v41  ;;  %v1793_v60 = vrot.slane %v1733_v62, 1  ;;  %v1796_v27 = vrot.slane %v1733_v62, 2  ;;  %v911_v5 = vsel %vm906_vm4, %v4433_v22, %v4432_v38  ;;  %v4436_v25 = vld [vmem:[#allocation9_spill] sm:$0xff] }
 0x18c   : > { %v4118_v29 = vpop.permute.xlu1 %1864  ;;  %v889_v4 = vpop.permute.xlu0 %888  ;;  %v1360_v45 = vsel %vm951_vm9, %v1352_v26, %v4003_v54  ;;  %v920_v61 = vsel %vm915_vm5, %v911_v5, %v4434_v34  ;;  %v912_v26 = vsel %vm906_vm4, %v3062_v12, %v4436_v25  ;;  %v4443_v25 = vld [vmem:[#allocation15_spill] sm:$0xff] }
 0x18d   : > { %v973_v3 = vsel %vm969_vm11, %v964_v30, %v889_v4  ;;  %v1368_v32 = vsel %vm960_vm10, %v1360_v45, %v4080_v52  ;;  %v4437_v45 = vld [vmem:[#allocation16_spill] sm:$0xff] }
 0x18e   : > { %1831 = vrot.lane.b32.xlu1 %v1789_v2, %s2820_s28  ;;  %1941 = vrot.lane.b32.xlu0 %v4022_v8, %s2825_s22  ;;  %v1725_v8 = vsel %vm621_vm1, 0.0, %v1709_v39 }
 0x18f   : > { %2669 = vmatmul.mubr.msk.f32.gmra.mxu1 %vm1387_vm12, %v973_v3  ;;  %v1792_v23 = vrot.slane %v1725_v8, 1  ;;  %v1795_v15 = vrot.slane %v1725_v8, 2 }
 0x190   : > { %v819_v37 = vpop.permute.xlu1 %818  ;;  %v1801_v35 = vpop.permute.xlu0 %1800 }
 0x191   : > { %v1794_v31 = vsel %vm656_vm2, %v1792_v23, %v1793_v60  ;;  %v1797_v11 = vsel %vm681_vm3, %v1795_v15, %v1796_v27 }
 0x192   : > { %1922 = vrot.lane.b32.xlu1 %v4041_v42, %s2824_s15  ;;  %1876 = vrot.lane.b32.xlu0 %v1768_v49, %s2822_s17 }
 0x194   : > { %v4144_v56 = vpop.permute.xlu1 %896  ;;  %v1889_v1 = vpop.permute.xlu0 %1888 }
 0x195   : > { %v1376_v41 = vsel %vm969_vm11, %v1368_v32, %v4144_v56  ;;  %v1989_v32 = vsel %vm924_vm6, %v3551_v10, %v4024_v48 }
 0x196   : > { %1854 = vrot.lane.b32.xlu1 %v1725_v8, %s2821_s25  ;;  %1962 = vrot.lane.b32.xlu0 %v4057_v53, %s2826_s23  ;;  %v1976_v53 = vsel %vm906_vm4, %v3590_v16, %v1801_v35  ;;  %v1997_v12 = vsel %vm933_vm7, %v1989_v32, %v4118_v29  ;;  %v1990_v29 = vsel %vm924_vm6, %v4048_v63, %v4082_v40 }
 0x197   : > { %2645 = vmatmul.mubr.msk.f32.gmra.mxu0 %vm1387_vm12, %v1376_v41  ;;  %v2005_v15 = vsel %vm942_vm8, %v1997_v12, %v1889_v1 }
 0x198   : > { %v4153_v33 = vpop.permute.xlu1 %1866  ;;  %v843_v21 = vpop.permute.xlu0 %842 }
 0x19a   : > { %1943 = vrot.lane.b32.xlu1 %v1768_v49, %s2825_s22  ;;  %1900 = vrot.lane.b32.xlu0 %v1789_v2, %s2823_s30 }
 0x19c   : > { %v821_v51 = vpop.permute.xlu1 %820  ;;  %v1822_v58 = vpop.permute.xlu0 %1821 }
 0x19d   : > { %v4162_v28 = vsel %vm915_vm5, %v1976_v53, %v1822_v58  ;;  %v1998_v58 = vsel %vm933_vm7, %v1990_v29, %v4153_v33 }
 0x19e   : > { %1878 = vrot.lane.b32.xlu1 %v1794_v31, %s2822_s17  ;;  %1902 = vrot.lane.b32.xlu0 %v1797_v11, %s2823_s30 }
 0x1a0   : > { %v4166_v6 = vpop.permute.xlu1 %1802  ;;  %v1913_v49 = vpop.permute.xlu0 %1912 }
 0x1a1   : > { %v2013_v27 = vsel %vm951_vm9, %v2005_v15, %v1913_v49 }
 0x1a2   : > { %1964 = vrot.lane.b32.xlu1 %v1789_v2, %s2826_s23  ;;  %1945 = vrot.lane.b32.xlu0 %v1794_v31, %s2825_s22  ;;  %v4435_v2 = vld [vmem:[#allocation18_spill] sm:$0xff] }
 0x1a3   : > { %v929_v0 = vsel %vm924_vm6, %v920_v61, %v4435_v2  ;;  %v4439_v61 = vld [vmem:[#allocation11_spill] sm:$0xff] }
 0x1a4   : > { %v1891_v9 = vpop.permute.xlu1 %1890  ;;  %v867_v18 = vpop.permute.xlu0 %866  ;;  %v938_v3 = vsel %vm933_vm7, %v929_v0, %v4063_v43  ;;  %v4438_v43 = vld [vmem:[#allocation21_spill] sm:$0xff]  ;;  %v4441_v0 = vld [vmem:[#allocation22_spill] sm:$0xff] }
 0x1a5   : > { %v947_v13 = vsel %vm942_vm8, %v938_v3, %v819_v37  ;;  %v2006_v49 = vsel %vm942_vm8, %v1998_v58, %v1891_v9  ;;  %v914_v9 = vsel %vm906_vm4, %v3085_v24, %v4439_v61 }
 0x1a6   : > { %1924 = vrot.lane.b32.xlu1 %v1725_v8, %s2824_s15  ;;  %v956_v20 = vsel %vm951_vm9, %v947_v13, %v843_v21  ;;  %v921_v8 = vsel %vm915_vm5, %v912_v26, %v4437_v45  ;;  %v4444_v45 = vld [vmem:[#allocation20_spill] sm:$0xff] }
 0x1a7   : > { %v965_v44 = vsel %vm960_vm10, %v956_v20, %v867_v18  ;;  %v930_v37 = vsel %vm924_vm6, %v921_v8, %v4438_v43 }
 0x1a8   : > { %v845_v16 = vpop.permute.xlu1 %844  ;;  %v4171_v47 = vpop.permute.xlu0 %1844  ;;  %v939_v23 = vsel %vm933_vm7, %v930_v37, %v4101_v50 }
 0x1a9   : > { %v948_v60 = vsel %vm942_vm8, %v939_v23, %v821_v51 }
 0x1aa   : > { %1966 = vrot.lane.b32.xlu1 %v1797_v11, %s2826_s23  ;;  %v957_v21 = vsel %vm951_vm9, %v948_v60, %v845_v16 }
 0x1ac   : > { %v4174_v57 = vpop.permute.xlu1 %1823  ;;  %v1934_v46 = vpop.permute.xlu0 %1933 }
 0x1ad   : > { %v2021_v31 = vsel %vm960_vm10, %v2013_v27, %v1934_v46 }
 0x1b0   : > { %v1915_v36 = vpop.permute.xlu1 %1914  ;;  %v869_v59 = vpop.permute.xlu0 %868 }
 0x1b1   : > { %v966_v10 = vsel %vm960_vm10, %v957_v21, %v869_v59  ;;  %v2014_v18 = vsel %vm951_vm9, %v2006_v49, %v1915_v36  ;;  %v4440_v36 = vld [vmem:[#allocation17_spill] sm:$0xff]  ;;  %v4445_v49 = vld [vmem:[#allocation23_spill] sm:$0xff] }
 0x1b2   : > { %v923_v2 = vsel %vm915_vm5, %v914_v9, %v4440_v36 }
 0x1b3   : > { %v932_v3 = vsel %vm924_vm6, %v923_v2, %v4441_v0 }
 0x1b4   : > { %v799_v30 = vpop.permute.xlu1 %798  ;;  %v4183_v4 = vpop.permute.xlu0 %1846 }
 0x1b8   : > { %v891_v39 = vpop.permute.xlu1 %890  ;;  %v1936_v55 = vpop.permute.xlu0 %1935 }
 0x1b9   : > { %v974_v35 = vsel %vm969_vm11, %v965_v44, %v891_v39  ;;  %v2022_v16 = vsel %vm960_vm10, %v2014_v18, %v1936_v55  ;;  %v4442_v55 = vld [vmem:[#allocation10_spill] sm:$0xff]  ;;  %v1977_v18 = vsel %vm906_vm4, %v4445_v49, %v4166_v6 }
 0x1ba   : > { %2671 = vmatprep.mubr.msk.f32.mxu1 %vm1387_vm12, %v974_v35  ;;  %v913_v35 = vsel %vm906_vm4, %v3070_v17, %v4442_v55 }
 0x1bb   : > { %v922_v24 = vsel %vm915_vm5, %v913_v35, %v4443_v25 }
 0x1bc   : > { %v1869_v62 = vpop.permute.xlu1 %1868  ;;  %v801_v41 = vpop.permute.xlu0 %800  ;;  %v931_v8 = vsel %vm924_vm6, %v922_v24, %v4444_v45 }
 0x1bd   : > { %v941_v20 = vsel %vm933_vm7, %v932_v3, %v801_v41  ;;  %v940_v32 = vsel %vm933_vm7, %v931_v8, %v799_v30 }
 0x1c0   : > { %v1955_v48 = vpop.permute.xlu1 %1954  ;;  %v893_v11 = vpop.permute.xlu0 %892 }
 0x1c1   : > { %v2029_v53 = vsel %vm969_vm11, %v2021_v31, %v1955_v48  ;;  %v975_v50 = vsel %vm969_vm11, %v966_v10, %v893_v11  ;;  %v1991_v31 = vsel %vm924_vm6, %v4162_v28, %v4171_v47  ;;  %v1984_v28 = vsel %vm915_vm5, %v1977_v18, %v4174_v57 }
 0x1c2   : > { %2672 = vmatmul.mubr.msk.f32.gmra.mxu1 %vm1387_vm12, %v975_v50  ;;  %2695 = vmatprep.mubr.msk.f32.mxu0 %vm1387_vm12, %v2029_v53  ;;  %v1999_v48 = vsel %vm933_vm7, %v1991_v31, %v1869_v62  ;;  %v1992_v62 = vsel %vm924_vm6, %v1984_v28, %v4183_v4 }
 0x1c4   : > { %v823_v1 = vpop.permute.xlu1 %822  ;;  %v1871_v51 = vpop.permute.xlu0 %1870 }
 0x1c5   : > { %v949_v41 = vsel %vm942_vm8, %v940_v32, %v823_v1 }
 0x1c8   : > { %v4224_v46 = vpop.permute.xlu1 %1804  ;;  %v1957_v59 = vpop.permute.xlu0 %1956 }
 0x1c9   : > { %v2030_v38 = vsel %vm969_vm11, %v2022_v16, %v1957_v59  ;;  %v2000_v59 = vsel %vm933_vm7, %v1992_v62, %v1871_v51  ;;  %v1978_v3 = vsel %vm906_vm4, %v3762_v14, %v4224_v46 }
 0x1ca   : > { %2696 = vmatmul.mubr.msk.f32.vlgmr.msra.gmra.mxu0 %vm1387_vm12, %v2030_v38 }
 0x1cc   : > { %v1893_v22 = vpop.permute.xlu1 %1892  ;;  %v847_v63 = vpop.permute.xlu0 %846 }
 0x1cd   : > { %v958_v23 = vsel %vm951_vm9, %v949_v41, %v847_v63  ;;  %v2007_v11 = vsel %vm942_vm8, %v1999_v48, %v1893_v22 }
 0x1d0   : > { %v825_v40 = vpop.permute.xlu1 %824  ;;  %v1826_v5 = vpop.permute.xlu0 %1825 }
 0x1d1   : > { %v950_v39 = vsel %vm942_vm8, %v941_v20, %v825_v40 }
 0x1d2   : > { %v959_v43 = vsel %vm951_vm9, %v950_v39, %v4003_v54 }
 0x1d3   : > { %v968_v17 = vsel %vm960_vm10, %v959_v43, %v4080_v52 }
 0x1d4   : > { %v4228_v34 = vpop.permute.xlu1 %1806  ;;  %v1917_v33 = vpop.permute.xlu0 %1916  ;;  %v977_v21 = vsel %vm969_vm11, %v968_v17, %v4144_v56 }
 0x1d5   : > { %v2015_v53 = vsel %vm951_vm9, %v2007_v11, %v1917_v33 }
 0x1d8   : > { %v1895_v13 = vpop.permute.xlu1 %1894  ;;  %v4238_v44 = vpop.permute.xlu0 %1827 }
 0x1d9   : > { %v2008_v38 = vsel %vm942_vm8, %v2000_v59, %v1895_v13  ;;  %v1985_v13 = vsel %vm915_vm5, %v1978_v3, %v1826_v5  ;;  %v1979_v5 = vsel %vm906_vm4, %v3915_v19, %v4228_v34 }
 0x1dc   : > { %v871_v26 = vpop.permute.xlu1 %870  ;;  %v1919_v37 = vpop.permute.xlu0 %1918 }
 0x1dd   : > { %v967_v15 = vsel %vm960_vm10, %v958_v23, %v871_v26  ;;  %v2016_v22 = vsel %vm951_vm9, %v2008_v38, %v1919_v37  ;;  %v1986_v37 = vsel %vm915_vm5, %v1979_v5, %v4238_v44 }
 0x1e0   : > { %v1849_v12 = vpop.permute.xlu1 %1848  ;;  %v895_v60 = vpop.permute.xlu0 %894 }
 0x1e1   : > { %v976_v27 = vsel %vm969_vm11, %v967_v15, %v895_v60  ;;  %v1993_v39 = vsel %vm924_vm6, %v1985_v13, %v1849_v12 }
 0x1e2   : > { %2674 = vmatprep.mubr.msk.f32.mxu1 %vm1387_vm12, %v976_v27 }
 0x1e3   : > { %2675 = vmatmul.mubr.msk.f32.gmra.mxu1 %vm1387_vm12, %v977_v21 }
 0x1e4   : > { %v1938_v30 = vpop.permute.xlu1 %1937  ;;  %v1873_v10 = vpop.permute.xlu0 %1872 }
 0x1e5   : > { %v2023_v29 = vsel %vm960_vm10, %v2015_v53, %v1938_v30  ;;  %v2001_v35 = vsel %vm933_vm7, %v1993_v39, %v1873_v10 }
 0x1e8   : > { %v1851_v50 = vpop.permute.xlu1 %1850  ;;  %v1959_v1 = vpop.permute.xlu0 %1958 }
 0x1e9   : > { %v2031_v58 = vsel %vm969_vm11, %v2023_v29, %v1959_v1  ;;  %v1994_v41 = vsel %vm924_vm6, %v1986_v37, %v1851_v50 }
 0x1ea   : > { %2698 = vmatprep.mubr.msk.f32.mxu0 %vm1387_vm12, %v2031_v58 }
 0x1ec   : > { %v1940_v47 = vpop.permute.xlu1 %1939  ;;  %v1875_v16 = vpop.permute.xlu0 %1874 }
 0x1ed   : > { %v2024_v40 = vsel %vm960_vm10, %v2016_v22, %v1940_v47  ;;  %v2002_v17 = vsel %vm933_vm7, %v1994_v41, %v1875_v16 }
 0x1f0   : > { %v1809_v63 = vpop.permute.xlu1 %1808  ;;  %v1961_v6 = vpop.permute.xlu0 %1960 }
 0x1f1   : > { %v2032_v33 = vsel %vm969_vm11, %v2024_v40, %v1961_v6  ;;  %v1980_v44 = vsel %vm906_vm4, %v4006_v7, %v1809_v63 }
 0x1f2   : > { %2699 = vmatmul.mubr.msk.f32.gmra.mxu0 %vm1387_vm12, %v2032_v33 }
 0x1f4   : > { %v1897_v57 = vpop.permute.xlu1 %1896  ;;  %v1830_v61 = vpop.permute.xlu0 %1829 }
 0x1f5   : > { %v2009_v25 = vsel %vm942_vm8, %v2001_v35, %v1897_v57  ;;  %v1987_v30 = vsel %vm915_vm5, %v1980_v44, %v1830_v61 }
 0x1f8   : > { %v1811_v9 = vpop.permute.xlu1 %1810  ;;  %v1921_v36 = vpop.permute.xlu0 %1920 }
 0x1f9   : > { %v2017_v24 = vsel %vm951_vm9, %v2009_v25, %v1921_v36  ;;  %v1981_v32 = vsel %vm906_vm4, %v4041_v42, %v1811_v9 }
 0x1fc   : > { %v1899_v4 = vpop.permute.xlu1 %1898  ;;  %v1853_v2 = vpop.permute.xlu0 %1852 }
 0x1fd   : > { %v2010_v60 = vsel %vm942_vm8, %v2002_v17, %v1899_v4  ;;  %v1995_v48 = vsel %vm924_vm6, %v1987_v30, %v1853_v2 }
 0x200   : > { %v1832_v0 = vpop.permute.xlu1 %1831  ;;  %v1942_v51 = vpop.permute.xlu0 %1941 }
 0x201   : > { %v2025_v45 = vsel %vm960_vm10, %v2017_v24, %v1942_v51  ;;  %v1988_v23 = vsel %vm915_vm5, %v1981_v32, %v1832_v0 }
 0x204   : > { %v1923_v20 = vpop.permute.xlu1 %1922  ;;  %v1877_v55 = vpop.permute.xlu0 %1876 }
 0x205   : > { %v2018_v34 = vsel %vm951_vm9, %v2010_v60, %v1923_v20  ;;  %v2003_v11 = vsel %vm933_vm7, %v1995_v48, %v1877_v55 }
 0x208   : > { %v1855_v26 = vpop.permute.xlu1 %1854  ;;  %v1963_v8 = vpop.permute.xlu0 %1962 }
 0x209   : > { %v2033_v43 = vsel %vm969_vm11, %v2025_v45, %v1963_v8  ;;  %v1996_v15 = vsel %vm924_vm6, %v1988_v23, %v1855_v26 }
 0x20a   : > { %2701 = vmatprep.mubr.msk.f32.mxu1 %vm1387_vm12, %v2033_v43 }
 0x20c   : > { %v1944_v14 = vpop.permute.xlu1 %1943  ;;  %v1901_v46 = vpop.permute.xlu0 %1900 }
 0x20d   : > { %v2026_v42 = vsel %vm960_vm10, %v2018_v34, %v1944_v14  ;;  %v2011_v53 = vsel %vm942_vm8, %v2003_v11, %v1901_v46 }
 0x210   : > { %v1879_v12 = vpop.permute.xlu1 %1878  ;;  %v1903_v19 = vpop.permute.xlu0 %1902 }
 0x211   : > { %v2004_v27 = vsel %vm933_vm7, %v1996_v15, %v1879_v12 }
 0x212   : > { %v2012_v31 = vsel %vm942_vm8, %v2004_v27, %v1903_v19 }
 0x213   : > { %v2020_v7 = vsel %vm951_vm9, %v2012_v31, %v4003_v54  ;;  %v2637_v54 = vpop.f32.mrf.mxu0  ;;  %v2667_v22 = vpop.f32.mrf.mxu1 }
 0x214   : > { %v1965_v21 = vpop.permute.xlu1 %1964  ;;  %v1946_v1 = vpop.permute.xlu0 %1945  ;;  %v2028_v58 = vsel %vm960_vm10, %v2020_v7, %v4080_v52  ;;  %v1613_v33 = vadd.f32 %v2667_v22, %v2637_v54 }
 0x215   : > { %v2034_v10 = vsel %vm969_vm11, %v2026_v42, %v1965_v21  ;;  %v2036_v47 = vsel %vm969_vm11, %v2028_v58, %v4144_v56  ;;  %v1478_v62 = vpop.f32.mrf.mxu0  ;;  %v1607_v40 = vpop.f32.mrf.mxu1 }
 0x216   : > { %2702 = vmatmul.mubr.msk.f32.vlgmr.msra.gmra.mxu1 %vm1387_vm12, %v2034_v10  ;;  %v1608_v61 = vadd.f32 %v1607_v40, %v1478_v62 }
 0x217   : > { %v2640_v16 = vpop.f32.mrf.mxu0 }
 0x218   : > { %v1925_v50 = vpop.permute.xlu1 %1924 }
 0x219   : > { %v2019_v29 = vsel %vm951_vm9, %v2011_v53, %v1925_v50  ;;  %v1488_v59 = vpop.f32.mrf.mxu0 }
 0x21a   : > { %v2027_v49 = vsel %vm960_vm10, %v2019_v29, %v1946_v1 }
 0x21c   : > { %v1967_v18 = vpop.permute.xlu1 %1966 }
 0x21d   : > { %v2035_v28 = vsel %vm969_vm11, %v2027_v49, %v1967_v18 }
 0x21e   : > { %2704 = vmatprep.mubr.msk.f32.mxu1 %vm1387_vm12, %v2035_v28 }
 0x21f   : > { %2705 = vmatmul.mubr.msk.f32.gmra.mxu1 %vm1387_vm12, %v2036_v47 }
 0x22b   : > { %v2643_v38 = vpop.f32.mrf.mxu0 }
 0x22d   : > { %v1498_v52 = vpop.f32.mrf.mxu0 }
 0x24f   : > { %v2670_v55 = vpop.f32.mrf.mxu1 }
 0x250   : > { %v1623_v25 = vadd.f32 %v2670_v55, %v2640_v16 }
 0x251   : > { %v1617_v35 = vpop.f32.mrf.mxu1 }
 0x252   : > { %v1618_v26 = vadd.f32 %v1617_v35, %v1488_v59 }
 0x257   : > { %v2646_v63 = vpop.f32.mrf.mxu0 }
 0x259   : > { %v1508_v6 = vpop.f32.mrf.mxu0 }
 0x282   : > { %v2673_v14 = vpop.f32.mrf.mxu1 }
 0x283   : > { %v1633_v23 = vadd.f32 %v2673_v14, %v2643_v38 }
 0x284   : > { %v1627_v46 = vpop.f32.mrf.mxu1 }
 0x285   : > { %v1628_v60 = vadd.f32 %v1627_v46, %v1498_v52 }
 0x28a   : > { %v2697_v57 = vpop.f32.mrf.mxu0 }
 0x28b   : > { %v2177_v9 = vadd.f32 %v2697_v57, %v1613_v33 }
 0x28c   : > { %v2137_v36 = vpop.f32.mrf.mxu0 }
 0x28d   : > { %2185 = vst.msk [vmem:[%s2953_s11 + $0x8] sm:$0xff] %vm906_vm4, %v2177_v9  ;;  %v2219_v56 = vmul.f32 %v2177_v9, %v2177_v9  ;;  %v2176_v4 = vadd.f32 %v2137_v36, %v1608_v61  ;;  %v2194_v2 = vsel %vm906_vm4, %v2177_v9, 0.0 }
 0x28f   : > { %2184 = vst.msk [vmem:[%s2953_s11] sm:$0xff] %vm906_vm4, %v2176_v4  ;;  %v2193_v0 = vsel %vm906_vm4, %v2176_v4, 0.0  ;;  %v2218_v51 = vmul.f32 %v2176_v4, %v2176_v4  ;;  %v2227_v13 = vsel %vm906_vm4, %v2219_v56, 0.0 }
 0x290   : > { %v2195_v3 = vadd.f32 %v2194_v2, %v2193_v0 }
 0x291   : > { %v2226_v20 = vsel %vm906_vm4, %v2218_v51, 0.0 }
 0x292   : > { %v2228_v39 = vadd.f32 %v2227_v13, %v2226_v20 }
 0x2a3   : > { %v2676_v5 = vpop.f32.mrf.mxu1 }
 0x2a4   : > { %v1643_v50 = vadd.f32 %v2676_v5, %v2646_v63 }
 0x2a5   : > { %v1637_v41 = vpop.f32.mrf.mxu1 }
 0x2a6   : > { %v1638_v58 = vadd.f32 %v1637_v41, %v1508_v6 }
 0x2b2   : > { %v2700_v24 = vpop.f32.mrf.mxu0 }
 0x2b3   : > { %v2179_v45 = vadd.f32 %v2700_v24, %v1623_v25  ;;  %v2217_v25 = vld [vmem:[%s2935_s18] sm:$0x1] }
 0x2b4   : > { %v2147_v8 = vpop.f32.mrf.mxu0 }
 0x2b5   : > { %2187 = vst.msk [vmem:[%s2953_s11 + $0x18] sm:$0xff] %vm906_vm4, %v2179_v45  ;;  %v2178_v43 = vadd.f32 %v2147_v8, %v1618_v26  ;;  %v2221_v27 = vmul.f32 %v2179_v45, %v2179_v45  ;;  %v2198_v42 = vsel %vm906_vm4, %v2179_v45, 0.0 }
 0x2b7   : > { %2186 = vst.msk [vmem:[%s2953_s11 + $0x10] sm:$0xff] %vm906_vm4, %v2178_v43  ;;  %v2220_v37 = vmul.f32 %v2178_v43, %v2178_v43  ;;  %v2196_v32 = vsel %vm906_vm4, %v2178_v43, 0.0  ;;  %v2231_v31 = vsel %vm906_vm4, %v2221_v27, 0.0 }
 0x2b8   : > { %v2197_v17 = vadd.f32 %v2196_v32, %v2195_v3 }
 0x2b9   : > { %v2229_v12 = vsel %vm906_vm4, %v2220_v37, 0.0 }
 0x2ba   : > { %v2230_v34 = vadd.f32 %v2229_v12, %v2228_v39  ;;  %v2199_v30 = vadd.f32 %v2198_v42, %v2197_v17  ;;  %v2192_v39 = vld [vmem:[%s2921_s19] sm:$0x1] }
 0x2bc   : > { %v2232_v53 = vadd.f32 %v2231_v31, %v2230_v34 }
 0x2d6   : > { %v2703_v15 = vpop.f32.mrf.mxu1 }
 0x2d7   : > { %v2181_v19 = vadd.f32 %v2703_v15, %v1633_v23 }
 0x2d8   : > { %v2157_v44 = vpop.f32.mrf.mxu1 }
 0x2d9   : > { %2189 = vst.msk [vmem:[%s2953_s11 + $0x28] sm:$0xff] %vm906_vm4, %v2181_v19  ;;  %v2180_v21 = vadd.f32 %v2157_v44, %v1628_v60  ;;  %v2223_v49 = vmul.f32 %v2181_v19, %v2181_v19  ;;  %v2202_v47 = vsel %vm906_vm4, %v2181_v19, 0.0 }
 0x2db   : > { %2188 = vst.msk [vmem:[%s2953_s11 + $0x20] sm:$0xff] %vm906_vm4, %v2180_v21  ;;  %v2200_v10 = vsel %vm906_vm4, %v2180_v21, 0.0  ;;  %v2222_v48 = vmul.f32 %v2180_v21, %v2180_v21  ;;  %v2235_v16 = vsel %vm906_vm4, %v2223_v49, 0.0 }
 0x2dc   : > { %v2201_v11 = vadd.f32 %v2200_v10, %v2199_v30 }
 0x2dd   : > { %v2233_v7 = vsel %vm906_vm4, %v2222_v48, 0.0 }
 0x2de   : > { %v2234_v29 = vadd.f32 %v2233_v7, %v2232_v53  ;;  %v2203_v62 = vadd.f32 %v2202_v47, %v2201_v11 }
 0x2df   : > { %v2706_v1 = vpop.f32.mrf.mxu1 }
 0x2e0   : > { %v2183_v18 = vadd.f32 %v2706_v1, %v1643_v50  ;;  %v2236_v63 = vadd.f32 %v2235_v16, %v2234_v29 }
 0x2e1   : > { %v2167_v28 = vpop.f32.mrf.mxu1 }
 0x2e2   : > { %2191 = vst.msk [vmem:[%s2953_s11 + $0x38] sm:$0xff] %vm906_vm4, %v2183_v18  ;;  %v2182_v54 = vadd.f32 %v2167_v28, %v1638_v58  ;;  %v2225_v59 = vmul.f32 %v2183_v18, %v2183_v18  ;;  %v2206_v40 = vsel %vm906_vm4, %v2183_v18, 0.0 }
 0x2e4   : > { %2190 = vst.msk [vmem:[%s2953_s11 + $0x30] sm:$0xff] %vm906_vm4, %v2182_v54  ;;  %v2204_v38 = vsel %vm906_vm4, %v2182_v54, 0.0  ;;  %v2224_v52 = vmul.f32 %v2182_v54, %v2182_v54  ;;  %v2239_v61 = vsel %vm906_vm4, %v2225_v59, 0.0 }
 0x2e5   : > { %v2205_v22 = vadd.f32 %v2204_v38, %v2203_v62 }
 0x2e6   : > { %v2237_v6 = vsel %vm906_vm4, %v2224_v52, 0.0 }
 0x2e7   : > { %v2207_v33 = vadd.f32 %v2206_v40, %v2205_v22  ;;  %v2238_v57 = vadd.f32 %v2237_v6, %v2236_v63 }
 0x2e9   : > { %v2208_v9 = vrot.slane %v2207_v33, 4  ;;  %v2240_v36 = vadd.f32 %v2239_v61, %v2238_v57 }
 0x2eb   : > { %v2209_v56 = vadd.f32 %v2208_v9, %v2207_v33  ;;  %v2241_v4 = vrot.slane %v2240_v36, 4 }
 0x2ed   : > { %v2210_v2 = vrot.slane %v2209_v56, 2  ;;  %v2242_v0 = vadd.f32 %v2241_v4, %v2240_v36 }
 0x2ef   : > { %v2211_v51 = vadd.f32 %v2210_v2, %v2209_v56  ;;  %v2243_v3 = vrot.slane %v2242_v0, 2 }
 0x2f1   : > { %v2212_v13 = vrot.slane %v2211_v51, 1  ;;  %v2244_v20 = vadd.f32 %v2243_v3, %v2242_v0 }
 0x2f3   : > { %v2213_v55 = vadd.f32 %v2212_v13, %v2211_v51  ;;  %v2245_v35 = vrot.slane %v2244_v20, 1 }
 0x2f5   : > { %v2214_v24 = vadd.f32 %v2213_v55, %v2192_v39  ;;  %v2246_v26 = vadd.f32 %v2245_v35, %v2244_v20 }
 0x2f7   : > { %2216 = vst.msk [vmem:[%s2921_s19] sm:$0x1] %vm2215_vm13, %v2214_v24  ;;  %v2247_v45 = vadd.f32 %v2246_v26, %v2217_v25 }
 0x2f9   : > { %2248 = vst.msk [vmem:[%s2935_s18] sm:$0x1] %vm2215_vm13, %v2247_v45 }
 0x2fa PF: > { %s19_s9 = sadd.s32 1, %s2815_s9   ;;  %s4446_s28 = sld [smem:[#allocation2_spill]] }
 0x2fb   : > { %p16_p11 = scmp.ge.s32.totalorder %s19_s9, 18   ;;  %s4447_s11 = sld [smem:[#allocation3_spill]] }
 0x2fc   : > { %s4448_s30 = sld [smem:[#allocation4_spill]]  ;;  %s4449_s27 = smov %s2807_s29 }
 0x2fd   :  { %18 = sbr.rel (!%p16_p11) target bundleno = 4 (0x4), region = 110 }
 0x301   : > { %s4450_s29 = smov %s4447_s11 }

</bundles_post_ra>
